<compile_context>
chip_gen: v7x
topology: tpu7x:2x2x1
jax: 0.10.0
libtpu: 0.0.40
codegen_flags: <defaults>
</compile_context>

<pallas_src>
import functools

import jax
import jax.numpy as jnp
from jax.experimental import pallas as pl
from jax.experimental.pallas import tpu as pltpu

EMB_DIM = 32
NUM_LAYERS = 2
BATCH = 8
SEQ = 8


def holo_kernel(x_ref, wn_ref, wg_ref, bn_ref, bg_ref, lw_ref, lb_ref, out_ref,
                *, num_layers):
    # x_ref:   (nb, B, S, D)   one block of nb independent problems
    # wn_ref:  (L, D, D)       highway "nonlinear" weights (pre-transposed: y = x @ W)
    # wg_ref:  (L, D, D)       highway "gate" weights
    # bn_ref:  (L, 1, D)       highway "nonlinear" biases
    # bg_ref:  (L, 1, D)       highway "gate" biases
    # lw_ref:  (1, D)          final linear weight (row layout)
    # lb_ref:  (1,)            final linear bias (SMEM scalar)
    # out_ref: (1, 1, nb*B)    lane-dense output slab for this grid step
    nb, B, S, D = x_ref.shape
    R = nb * B

    # Merge the (problem, batch) leading dims (layout-preserving), then mean
    # over the sequence axis (dim=1 of each original (B, S, D) input).
    x = x_ref[...].reshape(R, S, D)
    cur = jnp.mean(x, axis=1)                                   # (R, D)

    # Highway layers (static Python loop; num_layers is compile-time constant).
    for l in range(num_layers):
        nonlinear = jax.nn.relu(
            jnp.dot(cur, wn_ref[l], preferred_element_type=jnp.float32)
            + bn_ref[l])                                        # (R, D)
        gate = jax.nn.sigmoid(
            jnp.dot(cur, wg_ref[l], preferred_element_type=jnp.float32)
            + bg_ref[l])                                        # (R, D)
        # gate*cur + (1-gate)*nonlinear  ==  nonlinear + gate*(cur - nonlinear)
        cur = nonlinear + gate * (cur - nonlinear)

    # Final linear (out_features=1): VPU multiply + lane reduce instead of an
    # (R, D) @ (D, 1) MXU matmul; bias comes from SMEM as a scalar.
    vals = jnp.sum(cur * lw_ref[...], axis=-1)                  # (R,)
    out_ref[...] = (vals + lb_ref[0]).reshape(1, 1, R)


def holo_forward(inputs, hw_w, hw_b, lin_w, lin_b, *, nb=16):
    """Apply HoloLearnableModule.forward to N stacked problems in one call.

    inputs: (N, B, S, D) float32 -- N independent (B, S, D) module inputs
    hw_w:   (L, D, 2D)  highway weights, pre-transposed so y = x @ W + b
    hw_b:   (L, 2D)     highway biases  (layout: [nonlinear | gate], as in chunk(2, -1))
    lin_w:  (D, 1)      final linear weight, pre-transposed
    lin_b:  (1,)        final linear bias
    returns (N, B, 1)
    """
    N, B, S, D = inputs.shape
    L = hw_w.shape[0]
    assert N % nb == 0, "N must be divisible by the per-step problem count nb"
    G = N // nb
    R = nb * B

    # Pre-split highway params (wrapper-side, once) so the kernel never slices
    # the projection at a lane offset. Chunk order matches proj.chunk(2, -1):
    # first half -> nonlinear, second half -> gate.
    wn = hw_w[:, :, :D]                       # (L, D, D)
    wg = hw_w[:, :, D:]                       # (L, D, D)
    bn = hw_b[:, None, :D]                    # (L, 1, D)
    bg = hw_b[:, None, D:]                    # (L, 1, D)
    lw = lin_w.reshape(1, D)                  # (1, D) row layout for VPU reduce
    lb = lin_b.reshape(1)                     # (1,)   SMEM scalar

    kernel = functools.partial(holo_kernel, num_layers=L)
    out = pl.pallas_call(
        kernel,
        out_shape=jax.ShapeDtypeStruct((G, 1, R), jnp.float32),
        grid=(G,),
        in_specs=[
            pl.BlockSpec((nb, B, S, D), lambda i: (i, 0, 0, 0)),
            pl.BlockSpec((L, D, D), lambda i: (0, 0, 0)),
            pl.BlockSpec((L, D, D), lambda i: (0, 0, 0)),
            pl.BlockSpec((L, 1, D), lambda i: (0, 0, 0)),
            pl.BlockSpec((L, 1, D), lambda i: (0, 0, 0)),
            pl.BlockSpec((1, D), lambda i: (0, 0)),
            pl.BlockSpec(memory_space=pltpu.MemorySpace.SMEM),
        ],
        out_specs=pl.BlockSpec((1, 1, R), lambda i: (i, 0, 0)),
        compiler_params=pltpu.CompilerParams(
            dimension_semantics=("parallel",)),
    )(inputs, wn, wg, bn, bg, lw, lb)
    return out.reshape(N, B, 1)


def holo_forward_single(inputs, hw_w, hw_b, lin_w, lin_b):
    """Single-problem convenience wrapper matching the PyTorch forward signature."""
    return holo_forward(inputs[None], hw_w, hw_b, lin_w, lin_b, nb=1)[0]


def holo_reference(inputs, hw_w, hw_b, lin_w, lin_b):
    """Pure-JAX reference with the exact PyTorch structure (concatenated proj + chunk)."""
    N, B, S, D = inputs.shape
    cur = jnp.mean(inputs, axis=2)                              # (N, B, D)
    for l in range(hw_w.shape[0]):
        proj = jnp.einsum('nbd,de->nbe', cur, hw_w[l]) + hw_b[l]
        nonlinear = jax.nn.relu(proj[..., :D])
        gate = jax.nn.sigmoid(proj[..., D:])
        cur = gate * cur + (1.0 - gate) * nonlinear
    return jnp.einsum('nbd,do->nbo', cur, lin_w) + lin_b[0]     # (N, B, 1)


if __name__ == "__main__":
    key = jax.random.PRNGKey(0)
    k_x, k_hw, k_lw, k_lb = jax.random.split(key, 4)

    N = 64  # number of independent module invocations batched into one call
    inputs = jax.random.normal(k_x, (N, BATCH, SEQ, EMB_DIM), dtype=jnp.float32)

    # Deterministic synthetic parameters (shapes from HoloLearnableModule.__init__)
    hw_w = 0.1 * jax.random.normal(
        k_hw, (NUM_LAYERS, EMB_DIM, 2 * EMB_DIM), dtype=jnp.float32)
    # Highway bias: gate half initialized to 1.0 (as in the holodetect Highway init)
    hw_b = jnp.concatenate(
        [jnp.zeros((NUM_LAYERS, EMB_DIM), jnp.float32),
         jnp.ones((NUM_LAYERS, EMB_DIM), jnp.float32)], axis=-1)
    lin_w = 0.1 * jax.random.normal(k_lw, (EMB_DIM, 1), dtype=jnp.float32)
    lin_b = 0.1 * jax.random.normal(k_lb, (1,), dtype=jnp.float32)

    # Batched (gridded) path: 64 problems, 16 per grid step -> grid=(4,)
    out = jax.block_until_ready(
        holo_forward(inputs, hw_w, hw_b, lin_w, lin_b, nb=16))
    ref = holo_reference(inputs, hw_w, hw_b, lin_w, lin_b)
    assert out.shape == (N, BATCH, 1)
    assert jnp.allclose(out, ref, atol=1e-5, rtol=1e-5), "batched mismatch vs reference"

    # Single-problem path (matches the original PyTorch forward signature).
    out1 = jax.block_until_ready(
        holo_forward_single(inputs[0], hw_w, hw_b, lin_w, lin_b))
    assert out1.shape == (BATCH, 1)
    assert jnp.allclose(out1, ref[0], atol=1e-5, rtol=1e-5), "single mismatch vs reference"

    print("KERNEL_OK")
</pallas_src>

<mosaic_0001>
module attributes {stable_mosaic.version = 11 : i64} {
  func.func @holo_kernel(%arg0: i32, %arg1: memref<16x8x8x32xf32, #tpu.memory_space<vmem>>, %arg2: memref<2x32x32xf32, #tpu.memory_space<vmem>>, %arg3: memref<2x32x32xf32, #tpu.memory_space<vmem>>, %arg4: memref<2x1x32xf32, #tpu.memory_space<vmem>>, %arg5: memref<2x1x32xf32, #tpu.memory_space<vmem>>, %arg6: memref<1x32xf32, #tpu.memory_space<vmem>>, %arg7: memref<1xf32, #tpu.memory_space<smem>>, %arg8: memref<1x1x128xf32, #tpu.memory_space<vmem>>) attributes {dimension_semantics = [#tpu.dimension_semantics<parallel>], iteration_bounds = array<i64: 4>, scalar_prefetch = 0 : i64, scratch_operands = 0 : i64, tpu.core_type = #tpu.core_type<tc>, window_params = [{transform_indices = @transform_0, window_bounds = array<i64: 16, 8, 8, 32>}, {pipeline_mode = #tpu.pipeline_mode<synchronous>, transform_indices = @transform_1, window_bounds = array<i64: 2, 32, 32>}, {pipeline_mode = #tpu.pipeline_mode<synchronous>, transform_indices = @transform_2, window_bounds = array<i64: 2, 32, 32>}, {pipeline_mode = #tpu.pipeline_mode<synchronous>, transform_indices = @transform_3, window_bounds = array<i64: 2, 1, 32>}, {pipeline_mode = #tpu.pipeline_mode<synchronous>, transform_indices = @transform_4, window_bounds = array<i64: 2, 1, 32>}, {pipeline_mode = #tpu.pipeline_mode<synchronous>, transform_indices = @transform_5, window_bounds = array<i64: 1, 32>}, {transform_indices = @transform_6, window_bounds = array<i64: 1>}, {transform_indices = @transform_7, window_bounds = array<i64: 1, 1, 128>}]} {
    %c0 = arith.constant 0 : index
    %c0_0 = arith.constant 0 : index
    %c0_1 = arith.constant 0 : index
    %c0_2 = arith.constant 0 : index
    %0 = vector.load %arg1[%c0, %c0_0, %c0_1, %c0_2] : memref<16x8x8x32xf32, #tpu.memory_space<vmem>>, vector<16x8x8x32xf32>
    %1 = vector.shape_cast %0 : vector<16x8x8x32xf32> to vector<128x8x32xf32>
    %cst = arith.constant dense<0.000000e+00> : vector<128x32xf32>
    %2 = vector.multi_reduction <add>, %1, %cst [1] : vector<128x8x32xf32> to vector<128x32xf32>
    %cst_3 = arith.constant 8.000000e+00 : f32
    %3 = vector.broadcast %cst_3 : f32 to vector<128x32xf32>
    %4 = arith.divf %2, %3 : vector<128x32xf32>
    %c0_4 = arith.constant 0 : index
    %c0_5 = arith.constant 0 : index
    %c0_6 = arith.constant 0 : index
    %5 = vector.load %arg2[%c0_4, %c0_5, %c0_6] : memref<2x32x32xf32, #tpu.memory_space<vmem>>, vector<1x32x32xf32>
    %6 = vector.shape_cast %5 : vector<1x32x32xf32> to vector<32x32xf32>
    %cst_7 = arith.constant dense<0.000000e+00> : vector<128x32xf32>
    %7 = tpu.matmul %4, %6, %cst_7 {dimension_numbers = #tpu.dot_dimension_numbers<[1], [0], [0], [1], [0, 0, 1, 1], [], []>} : vector<128x32xf32>, vector<32x32xf32>, vector<128x32xf32> -> vector<128x32xf32>
    %c0_8 = arith.constant 0 : index
    %c0_9 = arith.constant 0 : index
    %c0_10 = arith.constant 0 : index
    %8 = vector.load %arg4[%c0_8, %c0_9, %c0_10] : memref<2x1x32xf32, #tpu.memory_space<vmem>>, vector<1x1x32xf32>
    %9 = vector.shape_cast %8 : vector<1x1x32xf32> to vector<1x32xf32>
    %10 = vector.broadcast %9 : vector<1x32xf32> to vector<128x32xf32>
    %11 = arith.addf %7, %10 : vector<128x32xf32>
    %cst_11 = arith.constant 0.000000e+00 : f32
    %12 = vector.broadcast %cst_11 : f32 to vector<128x32xf32>
    %13 = arith.maximumf %11, %12 : vector<128x32xf32>
    %c0_12 = arith.constant 0 : index
    %c0_13 = arith.constant 0 : index
    %c0_14 = arith.constant 0 : index
    %14 = vector.load %arg3[%c0_12, %c0_13, %c0_14] : memref<2x32x32xf32, #tpu.memory_space<vmem>>, vector<1x32x32xf32>
    %15 = vector.shape_cast %14 : vector<1x32x32xf32> to vector<32x32xf32>
    %cst_15 = arith.constant dense<0.000000e+00> : vector<128x32xf32>
    %16 = tpu.matmul %4, %15, %cst_15 {dimension_numbers = #tpu.dot_dimension_numbers<[1], [0], [0], [1], [0, 0, 1, 1], [], []>} : vector<128x32xf32>, vector<32x32xf32>, vector<128x32xf32> -> vector<128x32xf32>
    %c0_16 = arith.constant 0 : index
    %c0_17 = arith.constant 0 : index
    %c0_18 = arith.constant 0 : index
    %17 = vector.load %arg5[%c0_16, %c0_17, %c0_18] : memref<2x1x32xf32, #tpu.memory_space<vmem>>, vector<1x1x32xf32>
    %18 = vector.shape_cast %17 : vector<1x1x32xf32> to vector<1x32xf32>
    %19 = vector.broadcast %18 : vector<1x32xf32> to vector<128x32xf32>
    %20 = arith.addf %16, %19 : vector<128x32xf32>
    %21 = arith.negf %20 : vector<128x32xf32>
    %22 = math.exp %21 : vector<128x32xf32>
    %cst_19 = arith.constant 1.000000e+00 : f32
    %23 = vector.broadcast %cst_19 : f32 to vector<128x32xf32>
    %24 = arith.addf %23, %22 : vector<128x32xf32>
    %25 = arith.divf %23, %24 : vector<128x32xf32>
    %26 = arith.subf %4, %13 : vector<128x32xf32>
    %27 = arith.mulf %25, %26 : vector<128x32xf32>
    %28 = arith.addf %13, %27 : vector<128x32xf32>
    %c1 = arith.constant 1 : index
    %c0_20 = arith.constant 0 : index
    %c0_21 = arith.constant 0 : index
    %29 = vector.load %arg2[%c1, %c0_20, %c0_21] : memref<2x32x32xf32, #tpu.memory_space<vmem>>, vector<1x32x32xf32>
    %30 = vector.shape_cast %29 : vector<1x32x32xf32> to vector<32x32xf32>
    %cst_22 = arith.constant dense<0.000000e+00> : vector<128x32xf32>
    %31 = tpu.matmul %28, %30, %cst_22 {dimension_numbers = #tpu.dot_dimension_numbers<[1], [0], [0], [1], [0, 0, 1, 1], [], []>} : vector<128x32xf32>, vector<32x32xf32>, vector<128x32xf32> -> vector<128x32xf32>
    %c1_23 = arith.constant 1 : index
    %c0_24 = arith.constant 0 : index
    %c0_25 = arith.constant 0 : index
    %32 = vector.load %arg4[%c1_23, %c0_24, %c0_25] : memref<2x1x32xf32, #tpu.memory_space<vmem>>, vector<1x1x32xf32>
    %33 = vector.shape_cast %32 : vector<1x1x32xf32> to vector<1x32xf32>
    %34 = vector.broadcast %33 : vector<1x32xf32> to vector<128x32xf32>
    %35 = arith.addf %31, %34 : vector<128x32xf32>
    %cst_26 = arith.constant 0.000000e+00 : f32
    %36 = vector.broadcast %cst_26 : f32 to vector<128x32xf32>
    %37 = arith.maximumf %35, %36 : vector<128x32xf32>
    %c1_27 = arith.constant 1 : index
    %c0_28 = arith.constant 0 : index
    %c0_29 = arith.constant 0 : index
    %38 = vector.load %arg3[%c1_27, %c0_28, %c0_29] : memref<2x32x32xf32, #tpu.memory_space<vmem>>, vector<1x32x32xf32>
    %39 = vector.shape_cast %38 : vector<1x32x32xf32> to vector<32x32xf32>
    %cst_30 = arith.constant dense<0.000000e+00> : vector<128x32xf32>
    %40 = tpu.matmul %28, %39, %cst_30 {dimension_numbers = #tpu.dot_dimension_numbers<[1], [0], [0], [1], [0, 0, 1, 1], [], []>} : vector<128x32xf32>, vector<32x32xf32>, vector<128x32xf32> -> vector<128x32xf32>
    %c1_31 = arith.constant 1 : index
    %c0_32 = arith.constant 0 : index
    %c0_33 = arith.constant 0 : index
    %41 = vector.load %arg5[%c1_31, %c0_32, %c0_33] : memref<2x1x32xf32, #tpu.memory_space<vmem>>, vector<1x1x32xf32>
    %42 = vector.shape_cast %41 : vector<1x1x32xf32> to vector<1x32xf32>
    %43 = vector.broadcast %42 : vector<1x32xf32> to vector<128x32xf32>
    %44 = arith.addf %40, %43 : vector<128x32xf32>
    %45 = arith.negf %44 : vector<128x32xf32>
    %46 = math.exp %45 : vector<128x32xf32>
    %cst_34 = arith.constant 1.000000e+00 : f32
    %47 = vector.broadcast %cst_34 : f32 to vector<128x32xf32>
    %48 = arith.addf %47, %46 : vector<128x32xf32>
    %49 = arith.divf %47, %48 : vector<128x32xf32>
    %50 = arith.subf %28, %37 : vector<128x32xf32>
    %51 = arith.mulf %49, %50 : vector<128x32xf32>
    %52 = arith.addf %37, %51 : vector<128x32xf32>
    %c0_35 = arith.constant 0 : index
    %c0_36 = arith.constant 0 : index
    %53 = vector.load %arg6[%c0_35, %c0_36] : memref<1x32xf32, #tpu.memory_space<vmem>>, vector<1x32xf32>
    %54 = vector.broadcast %53 : vector<1x32xf32> to vector<128x32xf32>
    %55 = arith.mulf %52, %54 : vector<128x32xf32>
    %cst_37 = arith.constant dense<0.000000e+00> : vector<128xf32>
    %56 = vector.multi_reduction <add>, %55, %cst_37 [1] : vector<128x32xf32> to vector<128xf32>
    %c0_38 = arith.constant 0 : index
    %57 = memref.load %arg7[%c0_38] : memref<1xf32, #tpu.memory_space<smem>>
    %58 = vector.broadcast %57 : f32 to vector<128xf32>
    %59 = arith.addf %56, %58 : vector<128xf32>
    %60 = vector.shape_cast %59 : vector<128xf32> to vector<1x1x128xf32>
    %c0_39 = arith.constant 0 : index
    %c0_40 = arith.constant 0 : index
    %c0_41 = arith.constant 0 : index
    %61 = vector.load %arg8[%c0_39, %c0_40, %c0_41] : memref<1x1x128xf32, #tpu.memory_space<vmem>>, vector<1x1x128xf32>
    tpu.vector_store %arg8[%c0_39, %c0_40, %c0_41], %60 {strides = array<i32>} : memref<1x1x128xf32, #tpu.memory_space<vmem>>, vector<1x1x128xf32>,
    return
  }
  func.func @transform_0(%arg0: i32) -> (i32, i32, i32, i32) {
    %c0_i32 = arith.constant 0 : i32
    %c0_i32_0 = arith.constant 0 : i32
    %c0_i32_1 = arith.constant 0 : i32
    %c0_i32_2 = arith.constant 0 : i32
    return %arg0, %c0_i32, %c0_i32_0, %c0_i32_1 : i32, i32, i32, i32
  }
  func.func @transform_1(%arg0: i32) -> (i32, i32, i32) {
    %c0_i32 = arith.constant 0 : i32
    %c0_i32_0 = arith.constant 0 : i32
    %c0_i32_1 = arith.constant 0 : i32
    %c0_i32_2 = arith.constant 0 : i32
    return %c0_i32, %c0_i32_0, %c0_i32_1 : i32, i32, i32
  }
  func.func @transform_2(%arg0: i32) -> (i32, i32, i32) {
    %c0_i32 = arith.constant 0 : i32
    %c0_i32_0 = arith.constant 0 : i32
    %c0_i32_1 = arith.constant 0 : i32
    %c0_i32_2 = arith.constant 0 : i32
    return %c0_i32, %c0_i32_0, %c0_i32_1 : i32, i32, i32
  }
  func.func @transform_3(%arg0: i32) -> (i32, i32, i32) {
    %c0_i32 = arith.constant 0 : i32
    %c0_i32_0 = arith.constant 0 : i32
    %c0_i32_1 = arith.constant 0 : i32
    %c0_i32_2 = arith.constant 0 : i32
    return %c0_i32, %c0_i32_0, %c0_i32_1 : i32, i32, i32
  }
  func.func @transform_4(%arg0: i32) -> (i32, i32, i32) {
    %c0_i32 = arith.constant 0 : i32
    %c0_i32_0 = arith.constant 0 : i32
    %c0_i32_1 = arith.constant 0 : i32
    %c0_i32_2 = arith.constant 0 : i32
    return %c0_i32, %c0_i32_0, %c0_i32_1 : i32, i32, i32
  }
  func.func @transform_5(%arg0: i32) -> (i32, i32) {
    %c0_i32 = arith.constant 0 : i32
    %c0_i32_0 = arith.constant 0 : i32
    %c0_i32_1 = arith.constant 0 : i32
    return %c0_i32, %c0_i32_0 : i32, i32
  }
  func.func @transform_6(%arg0: i32) -> i32 {
    %c0_i32 = arith.constant 0 : i32
    %c0_i32_0 = arith.constant 0 : i32
    return %c0_i32 : i32
  }
  func.func @transform_7(%arg0: i32) -> (i32, i32, i32) {
    %c0_i32 = arith.constant 0 : i32
    %c0_i32_0 = arith.constant 0 : i32
    %c0_i32_1 = arith.constant 0 : i32
    return %arg0, %c0_i32, %c0_i32_0 : i32, i32, i32
  }
}

</mosaic_0001>

<bundles_post_ra>
// kernel: tpu_custom_call.1
= control target key start
LH: loop header
LB: loop body
LE: loop exit
PB: predicated region body
PF: predicated region fallthrough
CT: control target
= control target key end

     0   :  { %s6054_s0 = inlined_call_operand.vmem [shape: f32[64,8,8,32], index: 0, kind: input, shape index: {}]   ;;  %s6055_s1 = inlined_call_operand.vmem [shape: f32[2,32,32], index: 1, kind: input, shape index: {}]   ;;  %s6056_s2 = inlined_call_operand.vmem [shape: f32[2,32,32], index: 2, kind: input, shape index: {}]   ;;  %s6057_s3 = inlined_call_operand.vmem [shape: f32[2,1,32], index: 3, kind: input, shape index: {}]   ;;  %s6058_s4 = inlined_call_operand.vmem [shape: f32[2,1,32], index: 4, kind: input, shape index: {}]   ;;  %s6059_s5 = inlined_call_operand.vmem [shape: f32[1,32], index: 5, kind: input, shape index: {}]   ;;  %s6060_s6 = inlined_call_operand.<no memory space> [shape: f32[1], index: 6, kind: input, shape index: {}]   ;;  %s6061_s7 = inlined_call_operand.hbm [shape: f32[4,1,128], index: 7, kind: output, shape index: {}]  }
   0x1   :  { %12 = sst [smem:[#allocation2]] %s6060_s6 }
   0x2   :  { %13 = vsyncpa [#allocation4], 0 }
   0x3   :  { %15 = vsyncpa [#allocation4 + $0x1], 0  ;;  %s4372_s26 = smov 0   ;;  %s4374_s27 = smov 0  }
   0x4   :  { %s4376_s28 = smov 0   ;;  %s4378_s29 = smov 0  }
   0x5 LB: > { %s3732_s6 = sadd.s32 4294967295, %s4326_s29   ;;  %s3733_s30 = sadd.s32 4294967294, %s4326_s29   ;;  %s4326_s29 = sphi %s4378_s29, %s6355_s29   ;;  %s4322_s28 = sphi %s4376_s28, %s6354_s28   ;;  %s4318_s27 = sphi %s4374_s27, %s6353_s27   ;;  %s4314_s26 = sphi %s4372_s26, %s6352_s26  }
   0x6   : > { %s4395_s8 = sadd.s32 1, %s4326_s29   ;;  %s180_s9 = sadd.s32 1, %s4322_s28 }
   0x7   : > { %s177_s10 = ssub.s32 %s4326_s29, %s4395_s8  ;;  %p190_p0 = scmp.ne.s32.totalorder %s4322_s28, %s4318_s27 }
   0x8   : > { %p178_p1 = scmp.eq.s32.totalorder %s177_s10, 0  ;;  %p191_p2 = scmp.eq.s32.totalorder %s3732_s6, 3 }
   0x9   : > { %p196_p3 = scmp.ne.s32.totalorder %s4318_s27, %s4314_s26  ;;  %p197_p4 = scmp.eq.s32.totalorder %s3733_s30, 3 }
   0xa   : > { %s4405_s11 = scalar_select %p178_p1, %s4322_s28, %s180_s9  }
   0xb   : > { %p4407_p5 = por %p191_p2, %p190_p0  ;;  %p4411_p6 = por %p197_p4, %p196_p3 }
   0xc   : > { %p3736_p7 = scmp.ge.s32.totalorder %s4326_s29, 1  ;;  %p243_p8 = scmp.lt.s32.totalorder %s4326_s29, 5 }
   0xe   : > { %p244_p9 = pnand %p3736_p7, %p243_p8 }
  0x10   : > { %247 = sbr.rel (%p244_p9) target bundleno = 976 (0x3d0), region = 48 }
  0x17   : > { %v1887_v0 = vld [vmem:[%s6056_s2] sm:$0xff]  ;;  %v1888_v1 = vld [vmem:[%s6056_s2 + $0x8] sm:$0xff]  ;;  %s4426_s20 = sshll.u32 %s3732_s6, 4  ;;  %v1889_v5 = vld [vmem:[%s6056_s2 + $0x10] sm:$0xff]  ;;  %vm410_vm0 = vcmask 261120   ;;  %vm1575_vm1 = vcmask 1041409  }
  0x18   : > { %v1436_v2 = vld [vmem:[%s6055_s1] sm:$0xff]  ;;  %v4071_v3 = vpack.c.bf16 %v1888_v1, %v1887_v0  ;;  %v1437_v4 = vld [vmem:[%s6055_s1 + $0x8] sm:$0xff]  ;;  %v1890_v6 = vld [vmem:[%s6056_s2 + $0x18] sm:$0xff]  ;;  %p276_p10 = scmp.lt.s32.totalorder %s4426_s20, 63  ;;  %vm1577_vm2 = vcmask 1042434   ;;  %vm1579_vm3 = vcmask 1043459   ;;  %s6012_s6 = scalar_lea.hbm %s6061_s7, %s4426_s20 }
  0x19   : > { %v4063_v7 = vpack.c.bf16 %v1437_v4, %v1436_v2  ;;  %v4075_v8 = vpack.c.bf16 %v1890_v6, %v1889_v5  ;;  %v1438_v9 = vld [vmem:[%s6055_s1 + $0x10] sm:$0xff]  ;;  %v1439_v10 = vld [vmem:[%s6055_s1 + $0x18] sm:$0xff]  ;;  %vm1581_vm4 = vcmask 1044484   ;;  %vm1583_vm5 = vcmask 1045509   ;;  %s3518_s21 = sld [smem:[#allocation2]]  ;;  %s273_s22 = sand.u32 1, %s4318_s27  }
  0x1a   : > { %4072 = vmatprep.subr.bf16.mxu1 %v4071_v3  ;;  %s277_s15 = scalar_select %p276_p10, %s4426_s20, 63  ;;  %v4067_v11 = vpack.c.bf16 %v1439_v10, %v1438_v9  ;;  %vm1585_vm6 = vcmask 1046534   ;;  %vm1587_vm7 = vcmask 1047559   ;;  %vm3563_vm8 = vcmask 130112  }
  0x1b   : > { %4074 = vmatpush3.bf16.msra.mxu1 %v4071_v3  ;;  %4064 = vmatprep.subr.bf16.mxu0 %v4063_v7  ;;  %vm3570_vm9 = vcmask 195712   ;;  %vm3577_vm10 = vcmask 261312   ;;  %vm3584_vm11 = vcmask 326912   ;;  %vm3591_vm12 = vcmask 392512   ;;  %s274_s23 = scalar_lea.vmem [#allocation3], %s273_s22  ;;  %s3666_s9 = scalar_lea.sflag [#allocation4], %s273_s22 }
  0x1c   : > { %4076 = vmatprep.subr.bf16.mxu1 %v4075_v8  ;;  %4066 = vmatpush3.bf16.msra.mxu0 %v4063_v7  ;;  %s3854_s16 = sshll.u32 %s277_s15, 6  ;;  %vm3598_vm13 = vcmask 458112   ;;  %vm3605_vm14 = vcmask 523712   ;;  %vm3612_vm15 = vcmask 589312   ;;  %s3678_s24 = sshll.u32 %s274_s23, 4  ;;  %s6014_s24 = int_to_ptr.vmem [resolvable:$true] %s3678_s24 }
  0x1d   : > { %s4448_s19 = scalar_lea.vmem %s6054_s0, %s3854_s16  ;;  %4068 = vmatprep.subr.bf16.mxu0 %v4067_v11  ;;  %s4264_s10 = scalar_lea.vmem %s6014_s24, 16 }
  0x1e   : > { %v282_v12 = vld [vmem:[%s4448_s19] sm:$0xff]  ;;  %v283_v13 = vld [vmem:[%s4448_s19 + $0x8] sm:$0xff]  ;;  %v284_v14 = vld [vmem:[%s4448_s19 + $0x10] sm:$0xff]  ;;  %p4265_p11 = scmp.ne.s32.totalorder %s6014_s24, %s4264_s10  ;;  %s4328_s14 = smov [#allocation3]  }
  0x1f   : > { %4078 = vmatpush3.bf16.msra.mxu1 %v4075_v8  ;;  %v285_v15 = vld [vmem:[%s4448_s19 + $0x18] sm:$0xff]  ;;  %v286_v16 = vld [vmem:[%s4448_s19 + $0x20] sm:$0xff]  ;;  %v287_v17 = vld [vmem:[%s4448_s19 + $0x28] sm:$0xff]  ;;  %v411_v18 = vsel %vm410_vm0, %v282_v12, 0.0  ;;  %v418_v19 = vsel %vm410_vm0, %v283_v13, 0.0  ;;  %v425_v20 = vsel %vm410_vm0, %v284_v14, 0.0 }
  0x20   : > { %v288_v21 = vld [vmem:[%s4448_s19 + $0x30] sm:$0xff]  ;;  %v289_v22 = vld [vmem:[%s4448_s19 + $0x38] sm:$0xff]  ;;  %v412_v23 = vrot.slane %v411_v18, 4  ;;  %v419_v24 = vrot.slane %v418_v19, 4  ;;  %v426_v25 = vrot.slane %v425_v20, 4  ;;  %v432_v26 = vsel %vm410_vm0, %v285_v15, 0.0  ;;  %4070 = vmatpush3.bf16.msra.mxu0 %v4067_v11  ;;  %p4266_p12 = pnand %p4265_p11, %p4407_p5 }
  0x21   : > { %v433_v27 = vrot.slane %v432_v26, 4  ;;  %v439_v28 = vsel %vm410_vm0, %v286_v16, 0.0  ;;  %v446_v29 = vsel %vm410_vm0, %v287_v17, 0.0  ;;  %v453_v30 = vsel %vm410_vm0, %v288_v21, 0.0  ;;  %v290_v7 = vld [vmem:[%s4448_s19 + $0x40] sm:$0xff]  ;;  %v291_v8 = vld [vmem:[%s4448_s19 + $0x48] sm:$0xff] }
  0x22   : > { %v413_v31 = vadd.f32 %v412_v23, %v411_v18  ;;  %v420_v32 = vadd.f32 %v419_v24, %v418_v19  ;;  %v427_v33 = vadd.f32 %v426_v25, %v425_v20  ;;  %v440_v34 = vrot.slane %v439_v28, 4  ;;  %v292_v17 = vld [vmem:[%s4448_s19 + $0x50] sm:$0xff]  ;;  %v293_v20 = vld [vmem:[%s4448_s19 + $0x58] sm:$0xff]  ;;  %p4267_p13 = pneg %p4266_p12  ;;  %s4268_s15 = sshll.u32 %s4328_s14, 4  ;;  %s4269_s15 = int_to_ptr.vmem [resolvable:$false] %s4268_s15 }
  0x23   : > { %v434_v35 = vadd.f32 %v433_v27, %v432_v26  ;;  %v447_v36 = vrot.slane %v446_v29, 4  ;;  %v454_v37 = vrot.slane %v453_v30, 4  ;;  %v460_v38 = vsel %vm410_vm0, %v289_v22, 0.0  ;;  %s4270_s16 = scalar_lea.vmem %s4269_s15, 32  ;;  %p4271_p0 = scmp.lt.s32.totalorder %s6014_s24, %s4269_s15 }
  0x24   : > { %v414_v39 = vrot.slane %v413_v31, 2  ;;  %v421_v40 = vrot.slane %v420_v32, 2  ;;  %v428_v41 = vrot.slane %v427_v33, 2  ;;  %v441_v42 = vadd.f32 %v440_v34, %v439_v28  ;;  %v294_v28 = vld [vmem:[%s4448_s19 + $0x60] sm:$0xff]  ;;  %p4272_p1 = scmp.lt.s32.totalorder %s4270_s16, %s4264_s10 }
  0x25   : > { %v435_v43 = vrot.slane %v434_v35, 2  ;;  %v448_v44 = vadd.f32 %v447_v36, %v446_v29  ;;  %v455_v45 = vadd.f32 %v454_v37, %v453_v30  ;;  %v461_v46 = vrot.slane %v460_v38, 4  ;;  %v295_v29 = vld [vmem:[%s4448_s19 + $0x68] sm:$0xff] }
  0x26   : > { %v415_v47 = vadd.f32 %v414_v39, %v413_v31  ;;  %v422_v48 = vadd.f32 %v421_v40, %v420_v32  ;;  %v429_v49 = vadd.f32 %v428_v41, %v427_v33  ;;  %v442_v50 = vrot.slane %v441_v42, 2  ;;  %p4273_p2 = por %p4272_p1, %p4271_p0 }
  0x27   : > { %v436_v51 = vadd.f32 %v435_v43, %v434_v35  ;;  %v449_v52 = vrot.slane %v448_v44, 2  ;;  %v456_v53 = vrot.slane %v455_v45, 2  ;;  %v462_v54 = vadd.f32 %v461_v46, %v460_v38  ;;  %v296_v38 = vld [vmem:[%s4448_s19 + $0x70] sm:$0xff] }
  0x28   : > { %v416_v55 = vrot.slane %v415_v47, 1  ;;  %v423_v56 = vrot.slane %v422_v48, 1  ;;  %v430_v57 = vrot.slane %v429_v49, 1  ;;  %v443_v58 = vadd.f32 %v442_v50, %v441_v42  ;;  %p4274_p3 = pnand %p4273_p2, %p4267_p13 }
  0x29   : > { %v437_v59 = vrot.slane %v436_v51, 1  ;;  %v450_v60 = vadd.f32 %v449_v52, %v448_v44  ;;  %v457_v61 = vadd.f32 %v456_v53, %v455_v45  ;;  %v463_v62 = vrot.slane %v462_v54, 2 }
  0x2a   : > { %v417_v63 = vadd.f32 %v416_v55, %v415_v47  ;;  %v424_v0 = vadd.f32 %v423_v56, %v422_v48  ;;  %v431_v1 = vadd.f32 %v430_v57, %v429_v49  ;;  %v444_v2 = vrot.slane %v443_v58, 1  ;;  %v297_v47 = vld [vmem:[%s4448_s19 + $0x78] sm:$0xff] }
  0x2b   : > { %v438_v3 = vadd.f32 %v437_v59, %v436_v51  ;;  %v451_v4 = vrot.slane %v450_v60, 1  ;;  %v458_v5 = vrot.slane %v457_v61, 1  ;;  %v464_v6 = vadd.f32 %v463_v62, %v462_v54 }
  0x2c   : > { %v445_v9 = vadd.f32 %v444_v2, %v443_v58  ;;  %v4468_v10 = vmul.f32 0.125, %v417_v63  ;;  %v4470_v11 = vmul.f32 0.125, %v424_v0  ;;  %v4472_v12 = vmul.f32 0.125, %v431_v1 }
  0x2d   : > { %v452_v13 = vadd.f32 %v451_v4, %v450_v60  ;;  %v459_v14 = vadd.f32 %v458_v5, %v457_v61  ;;  %v465_v15 = vrot.slane %v464_v6, 1  ;;  %v4474_v16 = vmul.f32 0.125, %v438_v3 }
  0x2e   : > { %v4477_v18 = vmul.f32 0.125, %v445_v9  ;;  %v1576_v19 = vsel %vm1575_vm1, %v4470_v11, %v4468_v10  ;;  %v467_v21 = vsel %vm410_vm0, %v290_v7, 0.0  ;;  %v474_v22 = vsel %vm410_vm0, %v291_v8, 0.0 }
  0x2f   : > { %v466_v23 = vadd.f32 %v465_v15, %v464_v6  ;;  %v4485_v24 = vmul.f32 0.125, %v452_v13  ;;  %v4487_v25 = vmul.f32 0.125, %v459_v14  ;;  %v1578_v26 = vsel %vm1577_vm2, %v4472_v12, %v1576_v19 }
  0x30   : > { %v1580_v27 = vsel %vm1579_vm3, %v4474_v16, %v1578_v26  ;;  %v468_v30 = vrot.slane %v467_v21, 4  ;;  %v475_v31 = vrot.slane %v474_v22, 4  ;;  %v481_v32 = vsel %vm410_vm0, %v292_v17, 0.0 }
  0x31   : > { %v4496_v33 = vmul.f32 0.125, %v466_v23  ;;  %v1582_v34 = vsel %vm1581_vm4, %v4477_v18, %v1580_v27  ;;  %v482_v35 = vrot.slane %v481_v32, 4  ;;  %v488_v36 = vsel %vm410_vm0, %v293_v20, 0.0  ;;  %v298_v20 = vld [vmem:[%s4448_s19 + $0x80] sm:$0xff] }
  0x32   : > { %v1584_v37 = vsel %vm1583_vm5, %v4485_v24, %v1582_v34  ;;  %v469_v39 = vadd.f32 %v468_v30, %v467_v21  ;;  %v476_v40 = vadd.f32 %v475_v31, %v474_v22  ;;  %v489_v41 = vrot.slane %v488_v36, 4  ;;  %v299_v31 = vld [vmem:[%s4448_s19 + $0x88] sm:$0xff] }
  0x33   : > { %v1586_v42 = vsel %vm1585_vm6, %v4487_v25, %v1584_v37  ;;  %v483_v43 = vadd.f32 %v482_v35, %v481_v32  ;;  %v495_v44 = vsel %vm410_vm0, %v294_v28, 0.0  ;;  %v502_v45 = vsel %vm410_vm0, %v295_v29, 0.0 }
  0x34   : > { %v1588_v46 = vsel %vm1587_vm7, %v4496_v33, %v1586_v42  ;;  %v470_v48 = vrot.slane %v469_v39, 2  ;;  %v477_v49 = vrot.slane %v476_v40, 2  ;;  %v490_v50 = vadd.f32 %v489_v41, %v488_v36  ;;  %v300_v41 = vld [vmem:[%s4448_s19 + $0x90] sm:$0xff]  ;;  %v301_v42 = vld [vmem:[%s4448_s19 + $0x98] sm:$0xff] }
  0x35   : > { %3975 = vmatprep.mubr.msk.f32.mxu1 %vm410_vm0, %v1588_v46  ;;  %v484_v51 = vrot.slane %v483_v43, 2  ;;  %v496_v52 = vrot.slane %v495_v44, 4  ;;  %v503_v53 = vrot.slane %v502_v45, 4  ;;  %v509_v54 = vsel %vm410_vm0, %v296_v38, 0.0  ;;  %3943 = vmatprep.mubr.msk.f32.mxu0 %vm410_vm0, %v1588_v46 }
  0x36   : > { %v471_v55 = vadd.f32 %v470_v48, %v469_v39  ;;  %v478_v56 = vadd.f32 %v477_v49, %v476_v40  ;;  %v491_v57 = vrot.slane %v490_v50, 2  ;;  %v510_v58 = vrot.slane %v509_v54, 4 }
  0x37   : > { %v485_v59 = vadd.f32 %v484_v51, %v483_v43  ;;  %v497_v60 = vadd.f32 %v496_v52, %v495_v44  ;;  %v504_v61 = vadd.f32 %v503_v53, %v502_v45  ;;  %v516_v62 = vsel %vm410_vm0, %v297_v47, 0.0 }
  0x38   : > { %v472_v63 = vrot.slane %v471_v55, 1  ;;  %v479_v0 = vrot.slane %v478_v56, 1  ;;  %v492_v1 = vadd.f32 %v491_v57, %v490_v50  ;;  %v511_v2 = vadd.f32 %v510_v58, %v509_v54  ;;  %v302_v50 = vld [vmem:[%s4448_s19 + $0xa0] sm:$0xff]  ;;  %v303_v58 = vld [vmem:[%s4448_s19 + $0xa8] sm:$0xff] }
  0x39   : > { %v486_v3 = vrot.slane %v485_v59, 1  ;;  %v498_v4 = vrot.slane %v497_v60, 2  ;;  %v505_v5 = vrot.slane %v504_v61, 2  ;;  %v517_v6 = vrot.slane %v516_v62, 4 }
  0x3a   : > { %v473_v7 = vadd.f32 %v472_v63, %v471_v55  ;;  %v480_v8 = vadd.f32 %v479_v0, %v478_v56  ;;  %v493_v9 = vrot.slane %v492_v1, 1  ;;  %v512_v13 = vrot.slane %v511_v2, 2 }
  0x3b   : > { %v487_v14 = vadd.f32 %v486_v3, %v485_v59  ;;  %v499_v15 = vadd.f32 %v498_v4, %v497_v60  ;;  %v506_v17 = vadd.f32 %v505_v5, %v504_v61  ;;  %v518_v19 = vadd.f32 %v517_v6, %v516_v62  ;;  %v304_v3 = vld [vmem:[%s4448_s19 + $0xb0] sm:$0xff] }
  0x3c   : > { %v494_v21 = vadd.f32 %v493_v9, %v492_v1  ;;  %v513_v22 = vadd.f32 %v512_v13, %v511_v2  ;;  %v4516_v23 = vmul.f32 0.125, %v473_v7  ;;  %v4518_v26 = vmul.f32 0.125, %v480_v8 }
  0x3d   : > { %v500_v27 = vrot.slane %v499_v15, 1  ;;  %v507_v28 = vrot.slane %v506_v17, 1  ;;  %v519_v29 = vrot.slane %v518_v19, 2  ;;  %v4520_v30 = vmul.f32 0.125, %v487_v14  ;;  %v305_v14 = vld [vmem:[%s4448_s19 + $0xb8] sm:$0xff] }
  0x3e   : > { %v514_v32 = vrot.slane %v513_v22, 1  ;;  %v4523_v34 = vmul.f32 0.125, %v494_v21  ;;  %v1589_v35 = vsel %vm1575_vm1, %v4518_v26, %v4516_v23  ;;  %v523_v36 = vsel %vm410_vm0, %v298_v20, 0.0 }
  0x3f   : > { %v501_v37 = vadd.f32 %v500_v27, %v499_v15  ;;  %v508_v38 = vadd.f32 %v507_v28, %v506_v17  ;;  %v520_v39 = vadd.f32 %v519_v29, %v518_v19  ;;  %v1590_v40 = vsel %vm1577_vm2, %v4520_v30, %v1589_v35 }
  0x40   : > { %v515_v43 = vadd.f32 %v514_v32, %v513_v22  ;;  %v1591_v44 = vsel %vm1579_vm3, %v4523_v34, %v1590_v40  ;;  %v524_v45 = vrot.slane %v523_v36, 4  ;;  %v530_v46 = vsel %vm410_vm0, %v299_v31, 0.0 }
  0x41   : > { %v521_v47 = vrot.slane %v520_v39, 1  ;;  %v4536_v48 = vmul.f32 0.125, %v501_v37  ;;  %v4538_v49 = vmul.f32 0.125, %v508_v38  ;;  %v531_v51 = vrot.slane %v530_v46, 4 }
  0x42   : > { %v4541_v52 = vmul.f32 0.125, %v515_v43  ;;  %v525_v53 = vadd.f32 %v524_v45, %v523_v36  ;;  %v537_v54 = vsel %vm410_vm0, %v300_v41, 0.0  ;;  %v544_v55 = vsel %vm410_vm0, %v301_v42, 0.0  ;;  %v306_v43 = vld [vmem:[%s4448_s19 + $0xc0] sm:$0xff] }
  0x43   : > { %v522_v56 = vadd.f32 %v521_v47, %v520_v39  ;;  %v1592_v57 = vsel %vm1581_vm4, %v4536_v48, %v1591_v44  ;;  %v532_v59 = vadd.f32 %v531_v51, %v530_v46  ;;  %v538_v60 = vrot.slane %v537_v54, 4 }
  0x44   : > { %v1593_v61 = vsel %vm1583_vm5, %v4538_v49, %v1592_v57  ;;  %v526_v62 = vrot.slane %v525_v53, 2  ;;  %v545_v63 = vrot.slane %v544_v55, 4  ;;  %v551_v0 = vsel %vm410_vm0, %v302_v50, 0.0 }
  0x45   : > { %v4551_v1 = vmul.f32 0.125, %v522_v56  ;;  %v1594_v2 = vsel %vm1585_vm6, %v4541_v52, %v1593_v61  ;;  %v533_v4 = vrot.slane %v532_v59, 2  ;;  %v539_v5 = vadd.f32 %v538_v60, %v537_v54 }
  0x46   : > { %v527_v6 = vadd.f32 %v526_v62, %v525_v53  ;;  %v546_v7 = vadd.f32 %v545_v63, %v544_v55  ;;  %v552_v8 = vrot.slane %v551_v0, 4  ;;  %v558_v9 = vsel %vm410_vm0, %v303_v58, 0.0  ;;  %v307_v58 = vld [vmem:[%s4448_s19 + $0xc8] sm:$0xff] }
  0x47   : > { %v1595_v13 = vsel %vm1587_vm7, %v4551_v1, %v1594_v2  ;;  %v534_v15 = vadd.f32 %v533_v4, %v532_v59  ;;  %v540_v17 = vrot.slane %v539_v5, 2  ;;  %v559_v19 = vrot.slane %v558_v9, 4  ;;  %v308_v4 = vld [vmem:[%s4448_s19 + $0xd0] sm:$0xff] }
  0x48   : > { %3976 = vmatmul.mubr.msk.f32.vlgmr.msra.gmra.mrb[0].mxu1 %vm410_vm0, %v1595_v13  ;;  %v528_v20 = vrot.slane %v527_v6, 1  ;;  %v547_v21 = vrot.slane %v546_v7, 2  ;;  %v553_v22 = vadd.f32 %v552_v8, %v551_v0  ;;  %v565_v27 = vsel %vm410_vm0, %v304_v3, 0.0  ;;  %3944 = vmatmul.mubr.msk.f32.vlgmr.msra.gmra.mrb[0].mxu0 %vm410_vm0, %v1595_v13 }
  0x49   : > { %v535_v28 = vrot.slane %v534_v15, 1  ;;  %v541_v29 = vadd.f32 %v540_v17, %v539_v5  ;;  %v560_v31 = vadd.f32 %v559_v19, %v558_v9  ;;  %v566_v32 = vrot.slane %v565_v27, 4  ;;  %v309_v17 = vld [vmem:[%s4448_s19 + $0xd8] sm:$0xff] }
  0x4a   : > { %v529_v35 = vadd.f32 %v528_v20, %v527_v6  ;;  %v548_v36 = vadd.f32 %v547_v21, %v546_v7  ;;  %v554_v37 = vrot.slane %v553_v22, 2  ;;  %v572_v38 = vsel %vm410_vm0, %v305_v14, 0.0 }
  0x4b   : > { %v536_v39 = vadd.f32 %v535_v28, %v534_v15  ;;  %v542_v40 = vrot.slane %v541_v29, 1  ;;  %v561_v41 = vrot.slane %v560_v31, 2  ;;  %v567_v42 = vadd.f32 %v566_v32, %v565_v27  ;;  %v311_v32 = vld [vmem:[%s4448_s19 + $0xe8] sm:$0xff] }
  0x4c   : > { %v549_v44 = vrot.slane %v548_v36, 1  ;;  %v555_v45 = vadd.f32 %v554_v37, %v553_v22  ;;  %v573_v46 = vrot.slane %v572_v38, 4  ;;  %v4565_v47 = vmul.f32 0.125, %v529_v35 }
  0x4d   : > { %v543_v50 = vadd.f32 %v542_v40, %v541_v29  ;;  %v562_v51 = vadd.f32 %v561_v41, %v560_v31  ;;  %v568_v53 = vrot.slane %v567_v42, 2  ;;  %v4567_v54 = vmul.f32 0.125, %v536_v39  ;;  %v310_v31 = vld [vmem:[%s4448_s19 + $0xe0] sm:$0xff] }
  0x4e   : > { %v550_v55 = vadd.f32 %v549_v44, %v548_v36  ;;  %v556_v56 = vrot.slane %v555_v45, 1  ;;  %v574_v57 = vadd.f32 %v573_v46, %v572_v38  ;;  %v579_v59 = vsel %vm410_vm0, %v306_v43, 0.0 }
  0x4f   : > { %v563_v60 = vrot.slane %v562_v51, 1  ;;  %v569_v61 = vadd.f32 %v568_v53, %v567_v42  ;;  %v4571_v62 = vmul.f32 0.125, %v543_v50  ;;  %v1596_v63 = vsel %vm1575_vm1, %v4567_v54, %v4565_v47  ;;  %v312_v42 = vld [vmem:[%s4448_s19 + $0xf0] sm:$0xff] }
  0x50   : > { %v557_v0 = vadd.f32 %v556_v56, %v555_v45  ;;  %v575_v2 = vrot.slane %v574_v57, 2  ;;  %v4576_v3 = vmul.f32 0.125, %v550_v55  ;;  %v580_v5 = vrot.slane %v579_v59, 4 }
  0x51   : > { %v564_v6 = vadd.f32 %v563_v60, %v562_v51  ;;  %v570_v7 = vrot.slane %v569_v61, 1  ;;  %v1597_v8 = vsel %vm1577_vm2, %v4571_v62, %v1596_v63  ;;  %v586_v9 = vsel %vm410_vm0, %v307_v58, 0.0 }
  0x52   : > { %v576_v13 = vadd.f32 %v575_v2, %v574_v57  ;;  %v4582_v14 = vmul.f32 0.125, %v557_v0  ;;  %v1598_v15 = vsel %vm1579_vm3, %v4576_v3, %v1597_v8  ;;  %v581_v19 = vadd.f32 %v580_v5, %v579_v59  ;;  %v313_v59 = vld [vmem:[%s4448_s19 + $0xf8] sm:$0xff] }
  0x53   : > { %v571_v20 = vadd.f32 %v570_v7, %v569_v61  ;;  %v4587_v21 = vmul.f32 0.125, %v564_v6  ;;  %v587_v22 = vrot.slane %v586_v9, 4  ;;  %v593_v27 = vsel %vm410_vm0, %v308_v4, 0.0 }
  0x54   : > { %v577_v28 = vrot.slane %v576_v13, 1  ;;  %v1599_v29 = vsel %vm1581_vm4, %v4582_v14, %v1598_v15  ;;  %v582_v35 = vrot.slane %v581_v19, 2  ;;  %v594_v36 = vrot.slane %v593_v27, 4  ;;  %v314_v15 = vld [vmem:[%s4448_s19 + $0x100] sm:$0xff] }
  0x55   : > { %v4594_v37 = vmul.f32 0.125, %v571_v20  ;;  %v1600_v38 = vsel %vm1583_vm5, %v4587_v21, %v1599_v29  ;;  %v588_v39 = vadd.f32 %v587_v22, %v586_v9  ;;  %v600_v40 = vsel %vm410_vm0, %v309_v17, 0.0 }
  0x56   : > { %v578_v41 = vadd.f32 %v577_v28, %v576_v13  ;;  %v583_v43 = vadd.f32 %v582_v35, %v581_v19  ;;  %v595_v44 = vadd.f32 %v594_v36, %v593_v27  ;;  %v601_v45 = vrot.slane %v600_v40, 4 }
  0x57   : > { %v1601_v46 = vsel %vm1585_vm6, %v4594_v37, %v1600_v38  ;;  %v589_v50 = vrot.slane %v588_v39, 2  ;;  %v607_v51 = vsel %vm410_vm0, %v310_v31, 0.0  ;;  %v614_v53 = vsel %vm410_vm0, %v311_v32, 0.0 }
  0x58   : > { %v4604_v55 = vmul.f32 0.125, %v578_v41  ;;  %v584_v56 = vrot.slane %v583_v43, 1  ;;  %v596_v57 = vrot.slane %v595_v44, 2  ;;  %v602_v58 = vadd.f32 %v601_v45, %v600_v40 }
  0x59   : > { %v590_v60 = vadd.f32 %v589_v50, %v588_v39  ;;  %v608_v61 = vrot.slane %v607_v51, 4  ;;  %v615_v63 = vrot.slane %v614_v53, 4  ;;  %v621_v0 = vsel %vm410_vm0, %v312_v42, 0.0 }
  0x5a   : > { %v1602_v2 = vsel %vm1587_vm7, %v4604_v55, %v1601_v46  ;;  %v585_v4 = vadd.f32 %v584_v56, %v583_v43  ;;  %v597_v5 = vadd.f32 %v596_v57, %v595_v44  ;;  %v603_v6 = vrot.slane %v602_v58, 2  ;;  %v315_v46 = vld [vmem:[%s4448_s19 + $0x108] sm:$0xff] }
  0x5b   : > { %3978 = vmatprep.mubr.msk.f32.mxu1 %vm410_vm0, %v1602_v2  ;;  %v591_v7 = vrot.slane %v590_v60, 1  ;;  %v609_v8 = vadd.f32 %v608_v61, %v607_v51  ;;  %v616_v9 = vadd.f32 %v615_v63, %v614_v53  ;;  %v622_v13 = vrot.slane %v621_v0, 4  ;;  %3946 = vmatprep.mubr.msk.f32.mxu0 %vm410_vm0, %v1602_v2  ;;  %v316_v61 = vld [vmem:[%s4448_s19 + $0x110] sm:$0xff] }
  0x5c   : > { %v598_v17 = vrot.slane %v597_v5, 1  ;;  %v604_v19 = vadd.f32 %v603_v6, %v602_v58  ;;  %v628_v20 = vsel %vm410_vm0, %v313_v59, 0.0  ;;  %v4614_v22 = vmul.f32 0.125, %v585_v4 }
  0x5d   : > { %v592_v27 = vadd.f32 %v591_v7, %v590_v60  ;;  %v610_v28 = vrot.slane %v609_v8, 2  ;;  %v617_v29 = vrot.slane %v616_v9, 2  ;;  %v623_v31 = vadd.f32 %v622_v13, %v621_v0 }
  0x5e   : > { %v599_v32 = vadd.f32 %v598_v17, %v597_v5  ;;  %v605_v35 = vrot.slane %v604_v19, 1  ;;  %v629_v36 = vrot.slane %v628_v20, 4  ;;  %v635_v38 = vsel %vm410_vm0, %v314_v15, 0.0 }
  0x5f   : > { %v611_v39 = vadd.f32 %v610_v28, %v609_v8  ;;  %v618_v40 = vadd.f32 %v617_v29, %v616_v9  ;;  %v624_v41 = vrot.slane %v623_v31, 2  ;;  %v4617_v42 = vmul.f32 0.125, %v592_v27  ;;  %v317_v8 = vld [vmem:[%s4448_s19 + $0x118] sm:$0xff]  ;;  %v318_v9 = vld [vmem:[%s4448_s19 + $0x120] sm:$0xff] }
  0x60   : > { %v606_v43 = vadd.f32 %v605_v35, %v604_v19  ;;  %v630_v44 = vadd.f32 %v629_v36, %v628_v20  ;;  %v4619_v45 = vmul.f32 0.125, %v599_v32  ;;  %v636_v50 = vrot.slane %v635_v38, 4 }
  0x61   : > { %v612_v51 = vrot.slane %v611_v39, 1  ;;  %v619_v53 = vrot.slane %v618_v40, 1  ;;  %v625_v56 = vadd.f32 %v624_v41, %v623_v31  ;;  %v1603_v57 = vsel %vm1575_vm1, %v4617_v42, %v4614_v22 }
  0x62   : > { %v631_v58 = vrot.slane %v630_v44, 2  ;;  %v4625_v59 = vmul.f32 0.125, %v606_v43  ;;  %v1604_v60 = vsel %vm1577_vm2, %v4619_v45, %v1603_v57  ;;  %v637_v63 = vadd.f32 %v636_v50, %v635_v38  ;;  %v319_v38 = vld [vmem:[%s4448_s19 + $0x128] sm:$0xff] }
  0x63   : > { %v613_v0 = vadd.f32 %v612_v51, %v611_v39  ;;  %v620_v2 = vadd.f32 %v619_v53, %v618_v40  ;;  %v626_v4 = vrot.slane %v625_v56, 1  ;;  %v642_v5 = vsel %vm410_vm0, %v315_v46, 0.0  ;;  %v320_v51 = vld [vmem:[%s4448_s19 + $0x130] sm:$0xff]  ;;  %v321_v53 = vld [vmem:[%s4448_s19 + $0x138] sm:$0xff] }
  0x64   : > { %v632_v6 = vadd.f32 %v631_v58, %v630_v44  ;;  %v1605_v7 = vsel %vm1579_vm3, %v4625_v59, %v1604_v60  ;;  %v638_v13 = vrot.slane %v637_v63, 2  ;;  %v643_v15 = vrot.slane %v642_v5, 4 }
  0x65   : > { %v627_v17 = vadd.f32 %v626_v4, %v625_v56  ;;  %v4635_v19 = vmul.f32 0.125, %v613_v0  ;;  %v4637_v20 = vmul.f32 0.125, %v620_v2  ;;  %v649_v27 = vsel %vm410_vm0, %v316_v61, 0.0 }
  0x66   : > { %v633_v28 = vrot.slane %v632_v6, 1  ;;  %v639_v29 = vadd.f32 %v638_v13, %v637_v63  ;;  %v644_v31 = vadd.f32 %v643_v15, %v642_v5  ;;  %v650_v32 = vrot.slane %v649_v27, 4 }
  0x67   : > { %v4640_v35 = vmul.f32 0.125, %v627_v17  ;;  %v1606_v36 = vsel %vm1581_vm4, %v4635_v19, %v1605_v7  ;;  %v656_v39 = vsel %vm410_vm0, %v317_v8, 0.0  ;;  %v663_v40 = vsel %vm410_vm0, %v318_v9, 0.0 }
  0x68   : > { %v634_v41 = vadd.f32 %v633_v28, %v632_v6  ;;  %v1607_v43 = vsel %vm1583_vm5, %v4637_v20, %v1606_v36  ;;  %v640_v44 = vrot.slane %v639_v29, 1  ;;  %v645_v46 = vrot.slane %v644_v31, 2 }
  0x69   : > { %6160 = vst [vmem:[#allocation6_spill] sm:$0xff] %v4640_v35  ;;  %v1608_v50 = vsel %vm1585_vm6, %v4640_v35, %v1607_v43  ;;  %v651_v56 = vadd.f32 %v650_v32, %v649_v27  ;;  %v657_v57 = vrot.slane %v656_v39, 4  ;;  %v664_v58 = vrot.slane %v663_v40, 4 }
  0x6a   : > { %v4653_v60 = vmul.f32 0.125, %v634_v41  ;;  %v641_v61 = vadd.f32 %v640_v44, %v639_v29  ;;  %v646_v63 = vadd.f32 %v645_v46, %v644_v31  ;;  %v670_v0 = vsel %vm410_vm0, %v319_v38, 0.0  ;;  %v322_v29 = vld [vmem:[%s4448_s19 + $0x140] sm:$0xff] }
  0x6b   : > { %v652_v2 = vrot.slane %v651_v56, 2  ;;  %v658_v4 = vadd.f32 %v657_v57, %v656_v39  ;;  %v665_v5 = vadd.f32 %v664_v58, %v663_v40  ;;  %v671_v6 = vrot.slane %v670_v0, 4 }
  0x6c   : > { %6161 = vst [vmem:[#allocation7_spill] sm:$0xff] %v4653_v60  ;;  %v1609_v7 = vsel %vm1587_vm7, %v4653_v60, %v1608_v50  ;;  %v647_v8 = vrot.slane %v646_v63, 1  ;;  %v677_v9 = vsel %vm410_vm0, %v320_v51, 0.0  ;;  %v684_v13 = vsel %vm410_vm0, %v321_v53, 0.0 }
  0x6d   : > { %3979 = vmatmul.mubr.msk.f32.gmra.mrb[2].mxu1 %vm410_vm0, %v1609_v7  ;;  %v653_v15 = vadd.f32 %v652_v2, %v651_v56  ;;  %v659_v17 = vrot.slane %v658_v4, 2  ;;  %v666_v27 = vrot.slane %v665_v5, 2  ;;  %v672_v28 = vadd.f32 %v671_v6, %v670_v0  ;;  %3947 = vmatmul.mubr.msk.f32.gmra.mrb[2].mxu0 %vm410_vm0, %v1609_v7 }
  0x6e   : > { %v648_v31 = vadd.f32 %v647_v8, %v646_v63  ;;  %v678_v32 = vrot.slane %v677_v9, 4  ;;  %v685_v36 = vrot.slane %v684_v13, 4  ;;  %v4663_v38 = vmul.f32 0.125, %v641_v61  ;;  %v323_v63 = vld [vmem:[%s4448_s19 + $0x148] sm:$0xff] }
  0x6f   : > { %v654_v39 = vrot.slane %v653_v15, 1  ;;  %v660_v40 = vadd.f32 %v659_v17, %v658_v4  ;;  %v667_v41 = vadd.f32 %v666_v27, %v665_v5  ;;  %v673_v43 = vrot.slane %v672_v28, 2  ;;  %v325_v17 = vld [vmem:[%s4448_s19 + $0x158] sm:$0xff] }
  0x70   : > { %6162 = vst [vmem:[#allocation8_spill] sm:$0xff] %v4663_v38  ;;  %v679_v44 = vadd.f32 %v678_v32, %v677_v9  ;;  %v686_v46 = vadd.f32 %v685_v36, %v684_v13  ;;  %v4665_v50 = vmul.f32 0.125, %v648_v31  ;;  %v691_v51 = vsel %vm410_vm0, %v322_v29, 0.0 }
  0x71   : > { %v655_v53 = vadd.f32 %v654_v39, %v653_v15  ;;  %v661_v56 = vrot.slane %v660_v40, 1  ;;  %v668_v57 = vrot.slane %v667_v41, 1  ;;  %v674_v58 = vadd.f32 %v673_v43, %v672_v28  ;;  %v324_v15 = vld [vmem:[%s4448_s19 + $0x150] sm:$0xff] }
  0x72   : > { %6163 = vst [vmem:[#allocation9_spill] sm:$0xff] %v4665_v50  ;;  %v680_v0 = vrot.slane %v679_v44, 2  ;;  %v687_v61 = vrot.slane %v686_v46, 2  ;;  %v1610_v2 = vsel %vm1575_vm1, %v4665_v50, %v4663_v38  ;;  %v692_v4 = vrot.slane %v691_v51, 4 }
  0x73   : > { %v662_v5 = vadd.f32 %v661_v56, %v660_v40  ;;  %v669_v6 = vadd.f32 %v668_v57, %v667_v41  ;;  %v675_v7 = vrot.slane %v674_v58, 1  ;;  %v4672_v8 = vmul.f32 0.125, %v655_v53 }
  0x74   : > { %v681_v9 = vadd.f32 %v680_v0, %v679_v44  ;;  %v688_v13 = vadd.f32 %v687_v61, %v686_v46  ;;  %v693_v27 = vadd.f32 %v692_v4, %v691_v51  ;;  %v698_v28 = vsel %vm410_vm0, %v323_v63, 0.0  ;;  %v326_v51 = vld [vmem:[%s4448_s19 + $0x160] sm:$0xff]  ;;  %v328_v4 = vld [vmem:[%s4448_s19 + $0x170] sm:$0xff] }
  0x75   : > { %6164 = vst [vmem:[#allocation10_spill] sm:$0xff] %v4672_v8  ;;  %v676_v29 = vadd.f32 %v675_v7, %v674_v58  ;;  %v4677_v31 = vmul.f32 0.125, %v662_v5  ;;  %v4679_v32 = vmul.f32 0.125, %v669_v6  ;;  %v1611_v36 = vsel %vm1577_vm2, %v4672_v8, %v1610_v2  ;;  %v327_v2 = vld [vmem:[%s4448_s19 + $0x168] sm:$0xff] }
  0x76   : > { %v682_v39 = vrot.slane %v681_v9, 1  ;;  %v689_v40 = vrot.slane %v688_v13, 1  ;;  %v694_v41 = vrot.slane %v693_v27, 2  ;;  %v699_v43 = vrot.slane %v698_v28, 4 }
  0x77   : > { %6165 = vst [vmem:[#allocation11_spill] sm:$0xff] %v4677_v31  ;;  %6166 = vst [vmem:[#allocation12_spill] sm:$0xff] %v4679_v32  ;;  %v4683_v44 = vmul.f32 0.125, %v676_v29  ;;  %v1612_v46 = vsel %vm1579_vm3, %v4677_v31, %v1611_v36  ;;  %v705_v53 = vsel %vm410_vm0, %v324_v15, 0.0  ;;  %v712_v56 = vsel %vm410_vm0, %v325_v17, 0.0 }
  0x78   : > { %v683_v57 = vadd.f32 %v682_v39, %v681_v9  ;;  %v690_v58 = vadd.f32 %v689_v40, %v688_v13  ;;  %v1613_v63 = vsel %vm1581_vm4, %v4679_v32, %v1612_v46  ;;  %v695_v0 = vadd.f32 %v694_v41, %v693_v27  ;;  %v329_v13 = vld [vmem:[%s4448_s19 + $0x178] sm:$0xff] }
  0x79   : > { %6167 = vst [vmem:[#allocation13_spill] sm:$0xff] %v4683_v44  ;;  %v1614_v61 = vsel %vm1583_vm5, %v4683_v44, %v1613_v63  ;;  %v700_v5 = vadd.f32 %v699_v43, %v698_v28  ;;  %v706_v6 = vrot.slane %v705_v53, 4  ;;  %v713_v7 = vrot.slane %v712_v56, 4 }
  0x7a   : > { %v4696_v29 = vmul.f32 0.125, %v683_v57  ;;  %v4698_v15 = vmul.f32 0.125, %v690_v58  ;;  %v696_v36 = vrot.slane %v695_v0, 1  ;;  %v719_v9 = vsel %vm410_vm0, %v326_v51, 0.0 }
  0x7b   : > { %v701_v17 = vrot.slane %v700_v5, 2  ;;  %v707_v39 = vadd.f32 %v706_v6, %v705_v53  ;;  %v714_v40 = vadd.f32 %v713_v7, %v712_v56  ;;  %v720_v27 = vrot.slane %v719_v9, 4 }
  0x7c   : > { %6168 = vst [vmem:[#allocation14_spill] sm:$0xff] %v4696_v29  ;;  %6169 = vst [vmem:[#allocation15_spill] sm:$0xff] %v4698_v15  ;;  %v1615_v41 = vsel %vm1585_vm6, %v4696_v29, %v1614_v61  ;;  %v697_v46 = vadd.f32 %v696_v36, %v695_v0  ;;  %v726_v28 = vsel %vm410_vm0, %v327_v2, 0.0  ;;  %v733_v43 = vsel %vm410_vm0, %v328_v4, 0.0  ;;  %v330_v4 = vld [vmem:[%s4448_s19 + $0x180] sm:$0xff] }
  0x7d   : > { %v1616_v57 = vsel %vm1587_vm7, %v4698_v15, %v1615_v41  ;;  %v702_v58 = vadd.f32 %v701_v17, %v700_v5  ;;  %v708_v63 = vrot.slane %v707_v39, 2  ;;  %v715_v51 = vrot.slane %v714_v40, 2 }
  0x7e   : > { %3981 = vmatprep.mubr.msk.f32.mxu1 %vm410_vm0, %v1616_v57  ;;  %v721_v53 = vadd.f32 %v720_v27, %v719_v9  ;;  %v727_v56 = vrot.slane %v726_v28, 4  ;;  %v734_v6 = vrot.slane %v733_v43, 4  ;;  %v740_v7 = vsel %vm410_vm0, %v329_v13, 0.0  ;;  %3949 = vmatprep.mubr.msk.f32.mxu0 %vm410_vm0, %v1616_v57 }
  0x7f   : > { %v703_v0 = vrot.slane %v702_v58, 1  ;;  %v709_v61 = vadd.f32 %v708_v63, %v707_v39  ;;  %v716_v2 = vadd.f32 %v715_v51, %v714_v40  ;;  %v741_v36 = vrot.slane %v740_v7, 4 }
  0x80   : > { %v722_v29 = vrot.slane %v721_v53, 2  ;;  %v728_v44 = vadd.f32 %v727_v56, %v726_v28  ;;  %v735_v41 = vadd.f32 %v734_v6, %v733_v43  ;;  %v4712_v5 = vmul.f32 0.125, %v697_v46  ;;  %v331_v56 = vld [vmem:[%s4448_s19 + $0x188] sm:$0xff] }
  0x81   : > { %v704_v17 = vadd.f32 %v703_v0, %v702_v58  ;;  %v710_v9 = vrot.slane %v709_v61, 1  ;;  %v717_v27 = vrot.slane %v716_v2, 1  ;;  %v742_v15 = vadd.f32 %v741_v36, %v740_v7  ;;  %v332_v58 = vld [vmem:[%s4448_s19 + $0x190] sm:$0xff] }
  0x82   : > { %6170 = vst [vmem:[#allocation16_spill] sm:$0xff] %v4712_v5  ;;  %v723_v32 = vadd.f32 %v722_v29, %v721_v53  ;;  %v729_v13 = vrot.slane %v728_v44, 2  ;;  %v736_v31 = vrot.slane %v735_v41, 2  ;;  %v747_v57 = vsel %vm410_vm0, %v330_v4, 0.0  ;;  %v333_v4 = vld [vmem:[%s4448_s19 + $0x198] sm:$0xff] }
  0x83   : > { %v711_v39 = vadd.f32 %v710_v9, %v709_v61  ;;  %v718_v40 = vadd.f32 %v717_v27, %v716_v2  ;;  %v743_v63 = vrot.slane %v742_v15, 2  ;;  %v4715_v51 = vmul.f32 0.125, %v704_v17 }
  0x84   : > { %v724_v28 = vrot.slane %v723_v32, 1  ;;  %v730_v46 = vadd.f32 %v729_v13, %v728_v44  ;;  %v737_v43 = vadd.f32 %v736_v31, %v735_v41  ;;  %v748_v6 = vrot.slane %v747_v57, 4 }
  0x85   : > { %6171 = vst [vmem:[#allocation17_spill] sm:$0xff] %v4715_v51  ;;  %v744_v0 = vadd.f32 %v743_v63, %v742_v15  ;;  %v4719_v8 = vmul.f32 0.125, %v711_v39  ;;  %v4721_v29 = vmul.f32 0.125, %v718_v40  ;;  %v1617_v53 = vsel %vm1575_vm1, %v4715_v51, %v4712_v5  ;;  %v334_v39 = vld [vmem:[%s4448_s19 + $0x1a0] sm:$0xff] }
  0x86   : > { %v725_v7 = vadd.f32 %v724_v28, %v723_v32  ;;  %v731_v61 = vrot.slane %v730_v46, 1  ;;  %v738_v2 = vrot.slane %v737_v43, 1  ;;  %v749_v36 = vadd.f32 %v748_v6, %v747_v57  ;;  %v335_v57 = vld [vmem:[%s4448_s19 + $0x1a8] sm:$0xff] }
  0x87   : > { %6172 = vst [vmem:[#allocation18_spill] sm:$0xff] %v4719_v8  ;;  %6173 = vst [vmem:[#allocation19_spill] sm:$0xff] %v4721_v29  ;;  %v745_v44 = vrot.slane %v744_v0, 1  ;;  %v1618_v31 = vsel %vm1577_vm2, %v4719_v8, %v1617_v53  ;;  %v754_v15 = vsel %vm410_vm0, %v331_v56, 0.0  ;;  %v761_v41 = vsel %vm410_vm0, %v332_v58, 0.0 }
  0x88   : > { %v732_v17 = vadd.f32 %v731_v61, %v730_v46  ;;  %v739_v9 = vadd.f32 %v738_v2, %v737_v43  ;;  %v4731_v27 = vmul.f32 0.125, %v725_v7  ;;  %v1619_v13 = vsel %vm1579_vm3, %v4721_v29, %v1618_v31  ;;  %v336_v2 = vld [vmem:[%s4448_s19 + $0x1b0] sm:$0xff]  ;;  %v338_v29 = vld [vmem:[%s4448_s19 + $0x1c0] sm:$0xff] }
  0x89   : > { %v746_v32 = vadd.f32 %v745_v44, %v744_v0  ;;  %v750_v40 = vrot.slane %v749_v36, 2  ;;  %v755_v63 = vrot.slane %v754_v15, 4  ;;  %v762_v28 = vrot.slane %v761_v41, 4 }
  0x8a   : > { %6174 = vst [vmem:[#allocation20_spill] sm:$0xff] %v4731_v27  ;;  %v4737_v6 = vmul.f32 0.125, %v732_v17  ;;  %v4739_v53 = vmul.f32 0.125, %v739_v9  ;;  %v1620_v46 = vsel %vm1581_vm4, %v4731_v27, %v1619_v13  ;;  %v768_v43 = vsel %vm410_vm0, %v333_v4, 0.0 }
  0x8b   : > { %v4744_v56 = vmul.f32 0.125, %v746_v32  ;;  %v751_v58 = vadd.f32 %v750_v40, %v749_v36  ;;  %v756_v7 = vadd.f32 %v755_v63, %v754_v15  ;;  %v763_v0 = vadd.f32 %v762_v28, %v761_v41  ;;  %v337_v15 = vld [vmem:[%s4448_s19 + $0x1b8] sm:$0xff] }
  0x8c   : > { %6175 = vst [vmem:[#allocation21_spill] sm:$0xff] %v4737_v6  ;;  %6176 = vst [vmem:[#allocation22_spill] sm:$0xff] %v4739_v53  ;;  %v1621_v61 = vsel %vm1583_vm5, %v4737_v6, %v1620_v46  ;;  %v769_v44 = vrot.slane %v768_v43, 4  ;;  %v775_v31 = vsel %vm410_vm0, %v334_v39, 0.0  ;;  %v782_v17 = vsel %vm410_vm0, %v335_v57, 0.0 }
  0x8d   : > { %6177 = vst [vmem:[#allocation23_spill] sm:$0xff] %v4744_v56  ;;  %v1622_v9 = vsel %vm1585_vm6, %v4739_v53, %v1621_v61  ;;  %v752_v13 = vrot.slane %v751_v58, 1  ;;  %v757_v27 = vrot.slane %v756_v7, 2  ;;  %v764_v4 = vrot.slane %v763_v0, 2 }
  0x8e   : > { %v1623_v36 = vsel %vm1587_vm7, %v4744_v56, %v1622_v9  ;;  %v770_v41 = vadd.f32 %v769_v44, %v768_v43  ;;  %v776_v32 = vrot.slane %v775_v31, 4  ;;  %v783_v40 = vrot.slane %v782_v17, 4 }
  0x8f   : > { %3982 = vmatmul.mubr.msk.f32.gmra.mrb[4].mxu1 %vm410_vm0, %v1623_v36  ;;  %v753_v63 = vadd.f32 %v752_v13, %v751_v58  ;;  %v758_v39 = vadd.f32 %v757_v27, %v756_v7  ;;  %v765_v28 = vadd.f32 %v764_v4, %v763_v0  ;;  %v789_v57 = vsel %vm410_vm0, %v336_v2, 0.0  ;;  %3950 = vmatmul.mubr.msk.f32.gmra.mrb[4].mxu0 %vm410_vm0, %v1623_v36 }
  0x90   : > { %v771_v46 = vrot.slane %v770_v41, 2  ;;  %v777_v61 = vadd.f32 %v776_v32, %v775_v31  ;;  %v784_v53 = vadd.f32 %v783_v40, %v782_v17  ;;  %v790_v6 = vrot.slane %v789_v57, 4  ;;  %v339_v40 = vld [vmem:[%s4448_s19 + $0x1c8] sm:$0xff] }
  0x91   : > { %v759_v8 = vrot.slane %v758_v39, 1  ;;  %v766_v9 = vrot.slane %v765_v28, 1  ;;  %v796_v43 = vsel %vm410_vm0, %v337_v15, 0.0  ;;  %v4761_v44 = vmul.f32 0.125, %v753_v63 }
  0x92   : > { %v772_v56 = vadd.f32 %v771_v46, %v770_v41  ;;  %v778_v58 = vrot.slane %v777_v61, 2  ;;  %v785_v27 = vrot.slane %v784_v53, 2  ;;  %v791_v7 = vadd.f32 %v790_v6, %v789_v57 }
  0x93   : > { %6178 = vst [vmem:[#allocation24_spill] sm:$0xff] %v4761_v44  ;;  %v760_v0 = vadd.f32 %v759_v8, %v758_v39  ;;  %v767_v2 = vadd.f32 %v766_v9, %v765_v28  ;;  %v797_v13 = vrot.slane %v796_v43, 4  ;;  %v803_v4 = vsel %vm410_vm0, %v338_v29, 0.0 }
  0x94   : > { %v773_v31 = vrot.slane %v772_v56, 1  ;;  %v779_v17 = vadd.f32 %v778_v58, %v777_v61  ;;  %v786_v36 = vadd.f32 %v785_v27, %v784_v53  ;;  %v792_v32 = vrot.slane %v791_v7, 2  ;;  %v340_v58 = vld [vmem:[%s4448_s19 + $0x1d0] sm:$0xff] }
  0x95   : > { %v798_v51 = vadd.f32 %v797_v13, %v796_v43  ;;  %v4765_v5 = vmul.f32 0.125, %v760_v0  ;;  %v4767_v15 = vmul.f32 0.125, %v767_v2  ;;  %v804_v41 = vrot.slane %v803_v4, 4 }
  0x96   : > { %v774_v63 = vadd.f32 %v773_v31, %v772_v56  ;;  %v780_v6 = vrot.slane %v779_v17, 1  ;;  %v787_v8 = vrot.slane %v786_v36, 1  ;;  %v793_v39 = vadd.f32 %v792_v32, %v791_v7  ;;  %v341_v7 = vld [vmem:[%s4448_s19 + $0x1d8] sm:$0xff]  ;;  %v342_v32 = vld [vmem:[%s4448_s19 + $0x1e0] sm:$0xff] }
  0x97   : > { %6179 = vst [vmem:[#allocation25_spill] sm:$0xff] %v4765_v5  ;;  %6180 = vst [vmem:[#allocation26_spill] sm:$0xff] %v4767_v15  ;;  %v799_v28 = vrot.slane %v798_v51, 2  ;;  %v1624_v29 = vsel %vm1575_vm1, %v4765_v5, %v4761_v44  ;;  %v805_v53 = vadd.f32 %v804_v41, %v803_v4  ;;  %v810_v57 = vsel %vm410_vm0, %v339_v40, 0.0 }
  0x98   : > { %v781_v46 = vadd.f32 %v780_v6, %v779_v17  ;;  %v788_v61 = vadd.f32 %v787_v8, %v786_v36  ;;  %v794_v9 = vrot.slane %v793_v39, 1  ;;  %v4773_v43 = vmul.f32 0.125, %v774_v63 }
  0x99   : > { %v800_v27 = vadd.f32 %v799_v28, %v798_v51  ;;  %v1625_v56 = vsel %vm1577_vm2, %v4767_v15, %v1624_v29  ;;  %v806_v0 = vrot.slane %v805_v53, 2  ;;  %v811_v2 = vrot.slane %v810_v57, 4 }
  0x9a   : > { %6181 = vst [vmem:[#allocation27_spill] sm:$0xff] %v4773_v43  ;;  %v795_v13 = vadd.f32 %v794_v9, %v793_v39  ;;  %v4779_v4 = vmul.f32 0.125, %v781_v46  ;;  %v4781_v31 = vmul.f32 0.125, %v788_v61  ;;  %v1626_v17 = vsel %vm1579_vm3, %v4773_v43, %v1625_v56  ;;  %v343_v46 = vld [vmem:[%s4448_s19 + $0x1e8] sm:$0xff]  ;;  %v344_v61 = vld [vmem:[%s4448_s19 + $0x1f0] sm:$0xff] }
  0x9b   : > { %v801_v36 = vrot.slane %v800_v27, 1  ;;  %v807_v40 = vadd.f32 %v806_v0, %v805_v53  ;;  %v812_v51 = vadd.f32 %v811_v2, %v810_v57  ;;  %v817_v41 = vsel %vm410_vm0, %v340_v58, 0.0 }
  0x9c   : > { %6182 = vst [vmem:[#allocation28_spill] sm:$0xff] %v4779_v4  ;;  %6183 = vst [vmem:[#allocation29_spill] sm:$0xff] %v4781_v31  ;;  %v4787_v63 = vmul.f32 0.125, %v795_v13  ;;  %v1627_v6 = vsel %vm1581_vm4, %v4779_v4, %v1626_v17  ;;  %v818_v8 = vrot.slane %v817_v41, 4  ;;  %v824_v39 = vsel %vm410_vm0, %v341_v7, 0.0  ;;  %v345_v13 = vld [vmem:[%s4448_s19 + $0x1f8] sm:$0xff] }
  0x9d   : > { %v802_v28 = vadd.f32 %v801_v36, %v800_v27  ;;  %v1628_v29 = vsel %vm1583_vm5, %v4781_v31, %v1627_v6  ;;  %v808_v9 = vrot.slane %v807_v40, 1  ;;  %v813_v53 = vrot.slane %v812_v51, 2 }
  0x9e   : > { %6184 = vst [vmem:[#allocation30_spill] sm:$0xff] %v4787_v63  ;;  %v1629_v57 = vsel %vm1585_vm6, %v4787_v63, %v1628_v29  ;;  %v819_v58 = vadd.f32 %v818_v8, %v817_v41  ;;  %v825_v56 = vrot.slane %v824_v39, 4  ;;  %v831_v0 = vsel %vm410_vm0, %v342_v32, 0.0 }
  0x9f   : > { %v4799_v2 = vmul.f32 0.125, %v802_v28  ;;  %v809_v17 = vadd.f32 %v808_v9, %v807_v40  ;;  %v814_v7 = vadd.f32 %v813_v53, %v812_v51  ;;  %v832_v27 = vrot.slane %v831_v0, 4  ;;  %v346_v53 = vld [vmem:[%s4448_s19 + $0x200] sm:$0xff] }
  0xa0   : > { %v820_v36 = vrot.slane %v819_v58, 2  ;;  %v826_v4 = vadd.f32 %v825_v56, %v824_v39  ;;  %v838_v6 = vsel %vm410_vm0, %v343_v46, 0.0  ;;  %v845_v31 = vsel %vm410_vm0, %v344_v61, 0.0 }
  0xa1   : > { %6185 = vst [vmem:[#allocation31_spill] sm:$0xff] %v4799_v2  ;;  %v1630_v29 = vsel %vm1587_vm7, %v4799_v2, %v1629_v57  ;;  %v815_v41 = vrot.slane %v814_v7, 1  ;;  %v833_v8 = vadd.f32 %v832_v27, %v831_v0  ;;  %v839_v63 = vrot.slane %v838_v6, 4 }
  0xa2   : > { %3984 = vmatprep.mubr.msk.f32.mxu1 %vm410_vm0, %v1630_v29  ;;  %v821_v32 = vadd.f32 %v820_v36, %v819_v58  ;;  %v827_v28 = vrot.slane %v826_v4, 2  ;;  %v846_v40 = vrot.slane %v845_v31, 4  ;;  %v852_v51 = vsel %vm410_vm0, %v345_v13, 0.0  ;;  %3952 = vmatprep.mubr.msk.f32.mxu0 %vm410_vm0, %v1630_v29 }
  0xa3   : > { %v816_v39 = vadd.f32 %v815_v41, %v814_v7  ;;  %v834_v46 = vrot.slane %v833_v8, 2  ;;  %v840_v9 = vadd.f32 %v839_v63, %v838_v6  ;;  %v853_v61 = vrot.slane %v852_v51, 4  ;;  %v347_v7 = vld [vmem:[%s4448_s19 + $0x208] sm:$0xff] }
  0xa4   : > { %v822_v56 = vrot.slane %v821_v32, 1  ;;  %v828_v57 = vadd.f32 %v827_v28, %v826_v4  ;;  %v847_v2 = vadd.f32 %v846_v40, %v845_v31  ;;  %v4810_v0 = vmul.f32 0.125, %v809_v17 }
  0xa5   : > { %v835_v27 = vadd.f32 %v834_v46, %v833_v8  ;;  %v841_v43 = vrot.slane %v840_v9, 2  ;;  %v854_v58 = vadd.f32 %v853_v61, %v852_v51  ;;  %v4812_v36 = vmul.f32 0.125, %v816_v39  ;;  %v348_v39 = vld [vmem:[%s4448_s19 + $0x210] sm:$0xff] }
  0xa6   : > { %6186 = vst [vmem:[#allocation32_spill] sm:$0xff] %v4810_v0  ;;  %v823_v15 = vadd.f32 %v822_v56, %v821_v32  ;;  %v829_v13 = vrot.slane %v828_v57, 1  ;;  %v848_v29 = vrot.slane %v847_v2, 2  ;;  %v859_v41 = vsel %vm410_vm0, %v346_v53, 0.0 }
  0xa7   : > { %6187 = vst [vmem:[#allocation33_spill] sm:$0xff] %v4812_v36  ;;  %v836_v63 = vrot.slane %v835_v27, 1  ;;  %v842_v6 = vadd.f32 %v841_v43, %v840_v9  ;;  %v855_v5 = vrot.slane %v854_v58, 2  ;;  %v1631_v4 = vsel %vm1575_vm1, %v4812_v36, %v4810_v0 }
  0xa8   : > { %v830_v31 = vadd.f32 %v829_v13, %v828_v57  ;;  %v849_v17 = vadd.f32 %v848_v29, %v847_v2  ;;  %v4819_v8 = vmul.f32 0.125, %v823_v15  ;;  %v860_v28 = vrot.slane %v859_v41, 4  ;;  %v349_v15 = vld [vmem:[%s4448_s19 + $0x218] sm:$0xff] }
  0xa9   : > { %v837_v32 = vadd.f32 %v836_v63, %v835_v27  ;;  %v843_v40 = vrot.slane %v842_v6, 1  ;;  %v856_v51 = vadd.f32 %v855_v5, %v854_v58  ;;  %v866_v46 = vsel %vm410_vm0, %v347_v7, 0.0 }
  0xaa   : > { %6188 = vst [vmem:[#allocation34_spill] sm:$0xff] %v4819_v8  ;;  %v850_v61 = vrot.slane %v849_v17, 1  ;;  %v4823_v43 = vmul.f32 0.125, %v830_v31  ;;  %v1632_v9 = vsel %vm1577_vm2, %v4819_v8, %v1631_v4  ;;  %v861_v53 = vadd.f32 %v860_v28, %v859_v41 }
  0xab   : > { %v844_v56 = vadd.f32 %v843_v40, %v842_v6  ;;  %v857_v57 = vrot.slane %v856_v51, 1  ;;  %v4827_v2 = vmul.f32 0.125, %v837_v32  ;;  %v867_v13 = vrot.slane %v866_v46, 4  ;;  %v350_v6 = vld [vmem:[%s4448_s19 + $0x220] sm:$0xff] }
  0xac   : > { %6189 = vst [vmem:[#allocation35_spill] sm:$0xff] %v4823_v43  ;;  %v851_v27 = vadd.f32 %v850_v61, %v849_v17  ;;  %v1633_v5 = vsel %vm1579_vm3, %v4823_v43, %v1632_v9  ;;  %v862_v58 = vrot.slane %v861_v53, 2  ;;  %v873_v29 = vsel %vm410_vm0, %v348_v39, 0.0  ;;  %v352_v61 = vld [vmem:[%s4448_s19 + $0x230] sm:$0xff]  ;;  %v354_v43 = vld [vmem:[%s4448_s19 + $0x240] sm:$0xff] }
  0xad   : > { %6190 = vst [vmem:[#allocation36_spill] sm:$0xff] %v4827_v2  ;;  %v858_v7 = vadd.f32 %v857_v57, %v856_v51  ;;  %v4833_v63 = vmul.f32 0.125, %v844_v56  ;;  %v1634_v41 = vsel %vm1581_vm4, %v4827_v2, %v1633_v5  ;;  %v868_v4 = vadd.f32 %v867_v13, %v866_v46  ;;  %v351_v51 = vld [vmem:[%s4448_s19 + $0x228] sm:$0xff] }
  0xae   : > { %v4838_v31 = vmul.f32 0.125, %v851_v27  ;;  %v863_v28 = vadd.f32 %v862_v58, %v861_v53  ;;  %v874_v17 = vrot.slane %v873_v29, 4  ;;  %v880_v32 = vsel %vm410_vm0, %v349_v15, 0.0  ;;  %v353_v15 = vld [vmem:[%s4448_s19 + $0x238] sm:$0xff] }
  0xaf   : > { %6191 = vst [vmem:[#allocation37_spill] sm:$0xff] %v4833_v63  ;;  %v4841_v40 = vmul.f32 0.125, %v858_v7  ;;  %v1635_v39 = vsel %vm1583_vm5, %v4833_v63, %v1634_v41  ;;  %v869_v9 = vrot.slane %v868_v4, 2  ;;  %v881_v56 = vrot.slane %v880_v32, 4 }
  0xb0   : > { %6192 = vst [vmem:[#allocation38_spill] sm:$0xff] %v4838_v31  ;;  %v1636_v57 = vsel %vm1585_vm6, %v4838_v31, %v1635_v39  ;;  %v864_v46 = vrot.slane %v863_v28, 1  ;;  %v875_v13 = vadd.f32 %v874_v17, %v873_v29  ;;  %v887_v27 = vsel %vm410_vm0, %v350_v6, 0.0 }
  0xb1   : > { %6193 = vst [vmem:[#allocation39_spill] sm:$0xff] %v4841_v40  ;;  %v1637_v53 = vsel %vm1587_vm7, %v4841_v40, %v1636_v57  ;;  %v870_v5 = vadd.f32 %v869_v9, %v868_v4  ;;  %v882_v58 = vadd.f32 %v881_v56, %v880_v32  ;;  %v888_v7 = vrot.slane %v887_v27, 4 }
  0xb2   : > { %3985 = vmatmul.mubr.msk.f32.gmra.mrb[6].mxu1 %vm410_vm0, %v1637_v53  ;;  %v865_v41 = vadd.f32 %v864_v46, %v863_v28  ;;  %v876_v63 = vrot.slane %v875_v13, 2  ;;  %v894_v2 = vsel %vm410_vm0, %v351_v51, 0.0  ;;  %v901_v39 = vsel %vm410_vm0, %v352_v61, 0.0  ;;  %3953 = vmatmul.mubr.msk.f32.gmra.mrb[6].mxu0 %vm410_vm0, %v1637_v53 }
  0xb3   : > { %v871_v29 = vrot.slane %v870_v5, 1  ;;  %v883_v6 = vrot.slane %v882_v58, 2  ;;  %v889_v17 = vadd.f32 %v888_v7, %v887_v27  ;;  %v895_v31 = vrot.slane %v894_v2, 4 }
  0xb4   : > { %v877_v57 = vadd.f32 %v876_v63, %v875_v13  ;;  %v902_v40 = vrot.slane %v901_v39, 4  ;;  %v908_v4 = vsel %vm410_vm0, %v353_v15, 0.0  ;;  %v4859_v32 = vmul.f32 0.125, %v865_v41  ;;  %v355_v41 = vld [vmem:[%s4448_s19 + $0x248] sm:$0xff] }
  0xb5   : > { %v872_v28 = vadd.f32 %v871_v29, %v870_v5  ;;  %v884_v9 = vadd.f32 %v883_v6, %v882_v58  ;;  %v890_v56 = vrot.slane %v889_v17, 2  ;;  %v896_v51 = vadd.f32 %v895_v31, %v894_v2 }
  0xb6   : > { %6194 = vst [vmem:[#allocation40_spill] sm:$0xff] %v4859_v32  ;;  %v878_v46 = vrot.slane %v877_v57, 1  ;;  %v903_v61 = vadd.f32 %v902_v40, %v901_v39  ;;  %v909_v8 = vrot.slane %v908_v4, 4  ;;  %v915_v53 = vsel %vm410_vm0, %v354_v43, 0.0 }
  0xb7   : > { %v885_v36 = vrot.slane %v884_v9, 1  ;;  %v891_v27 = vadd.f32 %v890_v56, %v889_v17  ;;  %v897_v7 = vrot.slane %v896_v51, 2  ;;  %v4862_v0 = vmul.f32 0.125, %v872_v28 }
  0xb8   : > { %v879_v63 = vadd.f32 %v878_v46, %v877_v57  ;;  %v904_v13 = vrot.slane %v903_v61, 2  ;;  %v910_v15 = vadd.f32 %v909_v8, %v908_v4  ;;  %v916_v44 = vrot.slane %v915_v53, 4  ;;  %v356_v8 = vld [vmem:[%s4448_s19 + $0x250] sm:$0xff] }
  0xb9   : > { %6195 = vst [vmem:[#allocation41_spill] sm:$0xff] %v4862_v0  ;;  %v886_v5 = vadd.f32 %v885_v36, %v884_v9  ;;  %v892_v58 = vrot.slane %v891_v27, 1  ;;  %v898_v29 = vadd.f32 %v897_v7, %v896_v51  ;;  %v1638_v2 = vsel %vm1575_vm1, %v4862_v0, %v4859_v32  ;;  %v363_v32 = vld [vmem:[%s4448_s19 + $0x288] sm:$0xff] }
  0xba   : > { %v905_v31 = vadd.f32 %v904_v13, %v903_v61  ;;  %v911_v43 = vrot.slane %v910_v15, 2  ;;  %v4868_v40 = vmul.f32 0.125, %v879_v63  ;;  %v917_v39 = vadd.f32 %v916_v44, %v915_v53  ;;  %v357_v61 = vld [vmem:[%s4448_s19 + $0x258] sm:$0xff] }
  0xbb   : > { %v893_v6 = vadd.f32 %v892_v58, %v891_v27  ;;  %v899_v17 = vrot.slane %v898_v29, 1  ;;  %v4870_v57 = vmul.f32 0.125, %v886_v5  ;;  %v922_v4 = vsel %vm410_vm0, %v355_v41, 0.0  ;;  %v358_v5 = vld [vmem:[%s4448_s19 + $0x260] sm:$0xff] }
  0xbc   : > { %6196 = vst [vmem:[#allocation42_spill] sm:$0xff] %v4868_v40  ;;  %v906_v36 = vrot.slane %v905_v31, 1  ;;  %v912_v28 = vadd.f32 %v911_v43, %v910_v15  ;;  %v1639_v9 = vsel %vm1577_vm2, %v4868_v40, %v1638_v2  ;;  %v918_v56 = vrot.slane %v917_v39, 2 }
  0xbd   : > { %6197 = vst [vmem:[#allocation43_spill] sm:$0xff] %v4870_v57  ;;  %v900_v51 = vadd.f32 %v899_v17, %v898_v29  ;;  %v4876_v46 = vmul.f32 0.125, %v893_v6  ;;  %v1640_v44 = vsel %vm1579_vm3, %v4870_v57, %v1639_v9  ;;  %v923_v53 = vrot.slane %v922_v4, 4 }
  0xbe   : > { %v907_v27 = vadd.f32 %v906_v36, %v905_v31  ;;  %v913_v7 = vrot.slane %v912_v28, 1  ;;  %v919_v63 = vadd.f32 %v918_v56, %v917_v39  ;;  %v929_v13 = vsel %vm410_vm0, %v356_v8, 0.0  ;;  %v359_v39 = vld [vmem:[%s4448_s19 + $0x268] sm:$0xff]  ;;  %v360_v36 = vld [vmem:[%s4448_s19 + $0x270] sm:$0xff]  ;;  %v361_v8 = vld [vmem:[%s4448_s19 + $0x278] sm:$0xff] }
  0xbf   : > { %6198 = vst [vmem:[#allocation44_spill] sm:$0xff] %v4876_v46  ;;  %v4882_v15 = vmul.f32 0.125, %v900_v51  ;;  %v1641_v41 = vsel %vm1581_vm4, %v4876_v46, %v1640_v44  ;;  %v924_v58 = vadd.f32 %v923_v53, %v922_v4  ;;  %v930_v29 = vrot.slane %v929_v13, 4 }
  0xc0   : > { %v914_v2 = vadd.f32 %v913_v7, %v912_v28  ;;  %v4887_v43 = vmul.f32 0.125, %v907_v27  ;;  %v920_v6 = vrot.slane %v919_v63, 1  ;;  %v936_v17 = vsel %vm410_vm0, %v357_v61, 0.0 }
  0xc1   : > { %6199 = vst [vmem:[#allocation45_spill] sm:$0xff] %v4882_v15  ;;  %v1642_v31 = vsel %vm1583_vm5, %v4882_v15, %v1641_v41  ;;  %v925_v9 = vrot.slane %v924_v58, 2  ;;  %v931_v56 = vadd.f32 %v930_v29, %v929_v13  ;;  %v937_v51 = vrot.slane %v936_v17, 4 }
  0xc2   : > { %6200 = vst [vmem:[#allocation46_spill] sm:$0xff] %v4887_v43  ;;  %v4895_v57 = vmul.f32 0.125, %v914_v2  ;;  %v1643_v4 = vsel %vm1585_vm6, %v4887_v43, %v1642_v31  ;;  %v921_v28 = vadd.f32 %v920_v6, %v919_v63  ;;  %v943_v44 = vsel %vm410_vm0, %v358_v5, 0.0  ;;  %v362_v5 = vld [vmem:[%s4448_s19 + $0x280] sm:$0xff] }
  0xc3   : > { %v926_v53 = vadd.f32 %v925_v9, %v924_v58  ;;  %v932_v61 = vrot.slane %v931_v56, 2  ;;  %v938_v27 = vadd.f32 %v937_v51, %v936_v17  ;;  %v944_v7 = vrot.slane %v943_v44, 4 }
  0xc4   : > { %6201 = vst [vmem:[#allocation47_spill] sm:$0xff] %v4895_v57  ;;  %v1644_v41 = vsel %vm1587_vm7, %v4895_v57, %v1643_v4  ;;  %v950_v15 = vsel %vm410_vm0, %v359_v39, 0.0  ;;  %v957_v13 = vsel %vm410_vm0, %v360_v36, 0.0  ;;  %v964_v29 = vsel %vm410_vm0, %v361_v8, 0.0 }
  0xc5   : > { %3987 = vmatprep.mubr.msk.f32.mxu1 %vm410_vm0, %v1644_v41  ;;  %v927_v2 = vrot.slane %v926_v53, 1  ;;  %v933_v31 = vadd.f32 %v932_v61, %v931_v56  ;;  %v939_v63 = vrot.slane %v938_v27, 2  ;;  %v945_v6 = vadd.f32 %v944_v7, %v943_v44  ;;  %3955 = vmatprep.mubr.msk.f32.mxu0 %vm410_vm0, %v1644_v41 }
  0xc6   : > { %v951_v58 = vrot.slane %v950_v15, 4  ;;  %v958_v17 = vrot.slane %v957_v13, 4  ;;  %v965_v9 = vrot.slane %v964_v29, 4  ;;  %v4908_v51 = vmul.f32 0.125, %v921_v28 }
  0xc7   : > { %v928_v39 = vadd.f32 %v927_v2, %v926_v53  ;;  %v934_v4 = vrot.slane %v933_v31, 1  ;;  %v940_v36 = vadd.f32 %v939_v63, %v938_v27  ;;  %v946_v57 = vrot.slane %v945_v6, 2 }
  0xc8   : > { %6202 = vst [vmem:[#allocation48_spill] sm:$0xff] %v4908_v51  ;;  %v952_v8 = vadd.f32 %v951_v58, %v950_v15  ;;  %v959_v43 = vadd.f32 %v958_v17, %v957_v13  ;;  %v966_v46 = vadd.f32 %v965_v9, %v964_v29  ;;  %v971_v56 = vsel %vm410_vm0, %v362_v5, 0.0 }
  0xc9   : > { %v935_v61 = vadd.f32 %v934_v4, %v933_v31  ;;  %v941_v44 = vrot.slane %v940_v36, 1  ;;  %v947_v7 = vadd.f32 %v946_v57, %v945_v6  ;;  %v4911_v41 = vmul.f32 0.125, %v928_v39  ;;  %v364_v57 = vld [vmem:[%s4448_s19 + $0x290] sm:$0xff] }
  0xca   : > { %v953_v40 = vrot.slane %v952_v8, 2  ;;  %v960_v0 = vrot.slane %v959_v43, 2  ;;  %v967_v28 = vrot.slane %v966_v46, 2  ;;  %v972_v50 = vrot.slane %v971_v56, 4 }
  0xcb   : > { %6203 = vst [vmem:[#allocation49_spill] sm:$0xff] %v4911_v41  ;;  %v942_v53 = vadd.f32 %v941_v44, %v940_v36  ;;  %v948_v27 = vrot.slane %v947_v7, 1  ;;  %v4914_v2 = vmul.f32 0.125, %v935_v61  ;;  %v1645_v15 = vsel %vm1575_vm1, %v4911_v41, %v4908_v51  ;;  %v365_v36 = vld [vmem:[%s4448_s19 + $0x298] sm:$0xff]  ;;  %v366_v44 = vld [vmem:[%s4448_s19 + $0x2a0] sm:$0xff] }
  0xcc   : > { %v954_v13 = vadd.f32 %v953_v40, %v952_v8  ;;  %v961_v29 = vadd.f32 %v960_v0, %v959_v43  ;;  %v968_v31 = vadd.f32 %v967_v28, %v966_v46  ;;  %v973_v63 = vadd.f32 %v972_v50, %v971_v56  ;;  %v367_v28 = vld [vmem:[%s4448_s19 + $0x2a8] sm:$0xff] }
  0xcd   : > { %6204 = vst [vmem:[#allocation50_spill] sm:$0xff] %v4914_v2  ;;  %v949_v6 = vadd.f32 %v948_v27, %v947_v7  ;;  %v4920_v5 = vmul.f32 0.125, %v942_v53  ;;  %v1646_v58 = vsel %vm1577_vm2, %v4914_v2, %v1645_v15  ;;  %v978_v17 = vsel %vm410_vm0, %v363_v32, 0.0 }
  0xce   : > { %v955_v9 = vrot.slane %v954_v13, 1  ;;  %v962_v39 = vrot.slane %v961_v29, 1  ;;  %v969_v4 = vrot.slane %v968_v31, 1  ;;  %v974_v61 = vrot.slane %v973_v63, 2 }
  0xcf   : > { %6205 = vst [vmem:[#allocation51_spill] sm:$0xff] %v4920_v5  ;;  %v4926_v40 = vmul.f32 0.125, %v949_v6  ;;  %v1647_v50 = vsel %vm1579_vm3, %v4920_v5, %v1646_v58  ;;  %v979_v0 = vrot.slane %v978_v17, 4  ;;  %v985_v46 = vsel %vm410_vm0, %v364_v57, 0.0 }
  0xd0   : > { %v956_v43 = vadd.f32 %v955_v9, %v954_v13  ;;  %v963_v8 = vadd.f32 %v962_v39, %v961_v29  ;;  %v970_v56 = vadd.f32 %v969_v4, %v968_v31  ;;  %v975_v32 = vadd.f32 %v974_v61, %v973_v63  ;;  %v368_v29 = vld [vmem:[%s4448_s19 + $0x2b0] sm:$0xff] }
  0xd1   : > { %6206 = vst [vmem:[#allocation52_spill] sm:$0xff] %v4926_v40  ;;  %v1648_v7 = vsel %vm1581_vm4, %v4926_v40, %v1647_v50  ;;  %v980_v53 = vadd.f32 %v979_v0, %v978_v17  ;;  %v986_v27 = vrot.slane %v985_v46, 4  ;;  %v992_v15 = vsel %vm410_vm0, %v365_v36, 0.0  ;;  %v369_v50 = vld [vmem:[%s4448_s19 + $0x2b8] sm:$0xff] }
  0xd2   : > { %v4936_v6 = vmul.f32 0.125, %v956_v43  ;;  %v4938_v58 = vmul.f32 0.125, %v963_v8  ;;  %v4940_v5 = vmul.f32 0.125, %v970_v56  ;;  %v976_v13 = vrot.slane %v975_v32, 1 }
  0xd3   : > { %v981_v31 = vrot.slane %v980_v53, 2  ;;  %v987_v57 = vadd.f32 %v986_v27, %v985_v46  ;;  %v993_v63 = vrot.slane %v992_v15, 4  ;;  %v999_v9 = vsel %vm410_vm0, %v366_v44, 0.0 }
  0xd4   : > { %6207 = vst [vmem:[#allocation53_spill] sm:$0xff] %v4936_v6  ;;  %6208 = vst [vmem:[#allocation54_spill] sm:$0xff] %v4938_v58  ;;  %v1649_v17 = vsel %vm1583_vm5, %v4936_v6, %v1648_v7  ;;  %v977_v39 = vadd.f32 %v976_v13, %v975_v32  ;;  %v1000_v4 = vrot.slane %v999_v9, 4  ;;  %v1006_v36 = vsel %vm410_vm0, %v367_v28, 0.0  ;;  %v370_v6 = vld [vmem:[%s4448_s19 + $0x2c0] sm:$0xff] }
  0xd5   : > { %6209 = vst [vmem:[#allocation55_spill] sm:$0xff] %v4940_v5  ;;  %v1650_v61 = vsel %vm1585_vm6, %v4938_v58, %v1649_v17  ;;  %v982_v0 = vadd.f32 %v981_v31, %v980_v53  ;;  %v988_v43 = vrot.slane %v987_v57, 2  ;;  %v994_v8 = vadd.f32 %v993_v63, %v992_v15 }
  0xd6   : > { %v1651_v46 = vsel %vm1587_vm7, %v4940_v5, %v1650_v61  ;;  %v1001_v56 = vadd.f32 %v1000_v4, %v999_v9  ;;  %v1007_v44 = vrot.slane %v1006_v36, 4  ;;  %v1013_v27 = vsel %vm410_vm0, %v368_v29, 0.0 }
  0xd7   : > { %3988 = vmatmul.mubr.msk.f32.gmra.mrb[8].mxu1 %vm410_vm0, %v1651_v46  ;;  %v983_v32 = vrot.slane %v982_v0, 1  ;;  %v989_v7 = vadd.f32 %v988_v43, %v987_v57  ;;  %v995_v13 = vrot.slane %v994_v8, 2  ;;  %v1014_v28 = vrot.slane %v1013_v27, 4  ;;  %3956 = vmatmul.mubr.msk.f32.gmra.mrb[8].mxu0 %vm410_vm0, %v1651_v46 }
  0xd8   : > { %v1002_v17 = vrot.slane %v1001_v56, 2  ;;  %v1008_v53 = vadd.f32 %v1007_v44, %v1006_v36  ;;  %v1020_v15 = vsel %vm410_vm0, %v369_v50, 0.0  ;;  %v4957_v31 = vmul.f32 0.125, %v977_v39  ;;  %v371_v44 = vld [vmem:[%s4448_s19 + $0x2c8] sm:$0xff] }
  0xd9   : > { %v984_v63 = vadd.f32 %v983_v32, %v982_v0  ;;  %v990_v9 = vrot.slane %v989_v7, 1  ;;  %v996_v4 = vadd.f32 %v995_v13, %v994_v8  ;;  %v1015_v29 = vadd.f32 %v1014_v28, %v1013_v27  ;;  %v372_v13 = vld [vmem:[%s4448_s19 + $0x2d0] sm:$0xff] }
  0xda   : > { %6210 = vst [vmem:[#allocation56_spill] sm:$0xff] %v4957_v31  ;;  %v1003_v61 = vadd.f32 %v1002_v17, %v1001_v56  ;;  %v1009_v5 = vrot.slane %v1008_v53, 2  ;;  %v1021_v58 = vrot.slane %v1020_v15, 4  ;;  %v1027_v57 = vsel %vm410_vm0, %v370_v6, 0.0 }
  0xdb   : > { %v991_v43 = vadd.f32 %v990_v9, %v989_v7  ;;  %v997_v40 = vrot.slane %v996_v4, 1  ;;  %v1016_v46 = vrot.slane %v1015_v29, 2  ;;  %v4960_v2 = vmul.f32 0.125, %v984_v63  ;;  %v373_v9 = vld [vmem:[%s4448_s19 + $0x2d8] sm:$0xff] }
  0xdc   : > { %v1004_v36 = vrot.slane %v1003_v61, 1  ;;  %v1010_v50 = vadd.f32 %v1009_v5, %v1008_v53  ;;  %v1022_v39 = vadd.f32 %v1021_v58, %v1020_v15  ;;  %v1028_v41 = vrot.slane %v1027_v57, 4 }
  0xdd   : > { %6211 = vst [vmem:[#allocation57_spill] sm:$0xff] %v4960_v2  ;;  %v998_v0 = vadd.f32 %v997_v40, %v996_v4  ;;  %v1017_v8 = vadd.f32 %v1016_v46, %v1015_v29  ;;  %v4963_v27 = vmul.f32 0.125, %v991_v43  ;;  %v1652_v6 = vsel %vm1575_vm1, %v4960_v2, %v4957_v31 }
  0xde   : > { %v1005_v56 = vadd.f32 %v1004_v36, %v1003_v61  ;;  %v1011_v32 = vrot.slane %v1010_v50, 1  ;;  %v1023_v7 = vrot.slane %v1022_v39, 2  ;;  %v1029_v28 = vadd.f32 %v1028_v41, %v1027_v57 }
  0xdf   : > { %6212 = vst [vmem:[#allocation58_spill] sm:$0xff] %v4963_v27  ;;  %v1018_v17 = vrot.slane %v1017_v8, 1  ;;  %v4969_v5 = vmul.f32 0.125, %v998_v0  ;;  %v1653_v40 = vsel %vm1577_vm2, %v4963_v27, %v1652_v6  ;;  %v1034_v58 = vsel %vm410_vm0, %v371_v44, 0.0 }
  0xe0   : > { %v1012_v53 = vadd.f32 %v1011_v32, %v1010_v50  ;;  %v1024_v15 = vadd.f32 %v1023_v7, %v1022_v39  ;;  %v4974_v63 = vmul.f32 0.125, %v1005_v56  ;;  %v1030_v4 = vrot.slane %v1029_v28, 2  ;;  %v374_v50 = vld [vmem:[%s4448_s19 + $0x2e0] sm:$0xff]  ;;  %v375_v7 = vld [vmem:[%s4448_s19 + $0x2e8] sm:$0xff] }
  0xe1   : > { %6213 = vst [vmem:[#allocation59_spill] sm:$0xff] %v4969_v5  ;;  %v1019_v29 = vadd.f32 %v1018_v17, %v1017_v8  ;;  %v1654_v41 = vsel %vm1579_vm3, %v4969_v5, %v1653_v40  ;;  %v1035_v61 = vrot.slane %v1034_v58, 4  ;;  %v1041_v57 = vsel %vm410_vm0, %v372_v13, 0.0  ;;  %v376_v13 = vld [vmem:[%s4448_s19 + $0x2f0] sm:$0xff] }
  0xe2   : > { %6214 = vst [vmem:[#allocation60_spill] sm:$0xff] %v4974_v63  ;;  %v1025_v43 = vrot.slane %v1024_v15, 1  ;;  %v4980_v46 = vmul.f32 0.125, %v1012_v53  ;;  %v1655_v36 = vsel %vm1581_vm4, %v4974_v63, %v1654_v41  ;;  %v1031_v39 = vadd.f32 %v1030_v4, %v1029_v28 }
  0xe3   : > { %v4985_v44 = vmul.f32 0.125, %v1019_v29  ;;  %v1036_v0 = vadd.f32 %v1035_v61, %v1034_v58  ;;  %v1042_v8 = vrot.slane %v1041_v57, 4  ;;  %v1048_v6 = vsel %vm410_vm0, %v373_v9, 0.0  ;;  %v377_v58 = vld [vmem:[%s4448_s19 + $0x2f8] sm:$0xff] }
  0xe4   : > { %6215 = vst [vmem:[#allocation61_spill] sm:$0xff] %v4980_v46  ;;  %v1026_v56 = vadd.f32 %v1025_v43, %v1024_v15  ;;  %v1656_v32 = vsel %vm1583_vm5, %v4980_v46, %v1655_v36  ;;  %v1032_v17 = vrot.slane %v1031_v39, 1  ;;  %v1049_v40 = vrot.slane %v1048_v6, 4 }
  0xe5   : > { %6216 = vst [vmem:[#allocation62_spill] sm:$0xff] %v4985_v44  ;;  %v1657_v53 = vsel %vm1585_vm6, %v4985_v44, %v1656_v32  ;;  %v1037_v41 = vrot.slane %v1036_v0, 2  ;;  %v1043_v28 = vadd.f32 %v1042_v8, %v1041_v57  ;;  %v1055_v4 = vsel %vm410_vm0, %v374_v50, 0.0 }
  0xe6   : > { %v4995_v29 = vmul.f32 0.125, %v1026_v56  ;;  %v1033_v61 = vadd.f32 %v1032_v17, %v1031_v39  ;;  %v1050_v9 = vadd.f32 %v1049_v40, %v1048_v6  ;;  %v1056_v15 = vrot.slane %v1055_v4, 4 }
  0xe7   : > { %v1038_v43 = vadd.f32 %v1037_v41, %v1036_v0  ;;  %v1044_v63 = vrot.slane %v1043_v28, 2  ;;  %v1062_v36 = vsel %vm410_vm0, %v375_v7, 0.0  ;;  %v1069_v46 = vsel %vm410_vm0, %v376_v13, 0.0  ;;  %v378_v13 = vld [vmem:[%s4448_s19 + $0x300] sm:$0xff] }
  0xe8   : > { %6217 = vst [vmem:[#allocation63_spill] sm:$0xff] %v4995_v29  ;;  %v1658_v32 = vsel %vm1587_vm7, %v4995_v29, %v1657_v53  ;;  %v1051_v44 = vrot.slane %v1050_v9, 2  ;;  %v1057_v57 = vadd.f32 %v1056_v15, %v1055_v4  ;;  %v1063_v8 = vrot.slane %v1062_v36, 4 }
  0xe9   : > { %3990 = vmatprep.mubr.msk.f32.mxu1 %vm410_vm0, %v1658_v32  ;;  %v1039_v50 = vrot.slane %v1038_v43, 1  ;;  %v1045_v56 = vadd.f32 %v1044_v63, %v1043_v28  ;;  %v1070_v39 = vrot.slane %v1069_v46, 4  ;;  %v1076_v6 = vsel %vm410_vm0, %v377_v58, 0.0  ;;  %3958 = vmatprep.mubr.msk.f32.mxu0 %vm410_vm0, %v1658_v32 }
  0xea   : > { %v1052_v0 = vadd.f32 %v1051_v44, %v1050_v9  ;;  %v1058_v7 = vrot.slane %v1057_v57, 2  ;;  %v1064_v17 = vadd.f32 %v1063_v8, %v1062_v36  ;;  %v1077_v40 = vrot.slane %v1076_v6, 4  ;;  %v379_v8 = vld [vmem:[%s4448_s19 + $0x308] sm:$0xff] }
  0xeb   : > { %v1040_v41 = vadd.f32 %v1039_v50, %v1038_v43  ;;  %v1046_v53 = vrot.slane %v1045_v56, 1  ;;  %v1071_v29 = vadd.f32 %v1070_v39, %v1069_v46  ;;  %v5006_v4 = vmul.f32 0.125, %v1033_v61 }
  0xec   : > { %v1053_v15 = vrot.slane %v1052_v0, 1  ;;  %v1059_v5 = vadd.f32 %v1058_v7, %v1057_v57  ;;  %v1065_v27 = vrot.slane %v1064_v17, 2  ;;  %v1078_v63 = vadd.f32 %v1077_v40, %v1076_v6  ;;  %v380_v40 = vld [vmem:[%s4448_s19 + $0x310] sm:$0xff] }
  0xed   : > { %6218 = vst [vmem:[#allocation64_spill] sm:$0xff] %v5006_v4  ;;  %v1047_v28 = vadd.f32 %v1046_v53, %v1045_v56  ;;  %v1072_v2 = vrot.slane %v1071_v29, 2  ;;  %v5008_v58 = vmul.f32 0.125, %v1040_v41  ;;  %v1083_v44 = vsel %vm410_vm0, %v378_v13, 0.0  ;;  %v381_v53 = vld [vmem:[%s4448_s19 + $0x318] sm:$0xff] }
  0xee   : > { %v1054_v9 = vadd.f32 %v1053_v15, %v1052_v0  ;;  %v1060_v36 = vrot.slane %v1059_v5, 1  ;;  %v1066_v32 = vadd.f32 %v1065_v27, %v1064_v17  ;;  %v1079_v43 = vrot.slane %v1078_v63, 2 }
  0xef   : > { %6219 = vst [vmem:[#allocation65_spill] sm:$0xff] %v5008_v58  ;;  %v1073_v50 = vadd.f32 %v1072_v2, %v1071_v29  ;;  %v5012_v46 = vmul.f32 0.125, %v1047_v28  ;;  %v1659_v61 = vsel %vm1575_vm1, %v5008_v58, %v5006_v4  ;;  %v1084_v57 = vrot.slane %v1083_v44, 4 }
  0xf0   : > { %v1061_v56 = vadd.f32 %v1060_v36, %v1059_v5  ;;  %v1067_v39 = vrot.slane %v1066_v32, 1  ;;  %v1080_v6 = vadd.f32 %v1079_v43, %v1078_v63  ;;  %v5017_v7 = vmul.f32 0.125, %v1054_v9 }
  0xf1   : > { %6220 = vst [vmem:[#allocation66_spill] sm:$0xff] %v5012_v46  ;;  %v1074_v0 = vrot.slane %v1073_v50, 1  ;;  %v1660_v27 = vsel %vm1577_vm2, %v5012_v46, %v1659_v61  ;;  %v1085_v2 = vadd.f32 %v1084_v57, %v1083_v44  ;;  %v1090_v29 = vsel %vm410_vm0, %v379_v8, 0.0 }
  0xf2   : > { %6221 = vst [vmem:[#allocation67_spill] sm:$0xff] %v5017_v7  ;;  %v1068_v17 = vadd.f32 %v1067_v39, %v1066_v32  ;;  %v1081_v13 = vrot.slane %v1080_v6, 1  ;;  %v5023_v41 = vmul.f32 0.125, %v1061_v56  ;;  %v1661_v5 = vsel %vm1579_vm3, %v5017_v7, %v1660_v27  ;;  %v382_v32 = vld [vmem:[%s4448_s19 + $0x320] sm:$0xff] }
  0xf3   : > { %v1075_v15 = vadd.f32 %v1074_v0, %v1073_v50  ;;  %v1086_v63 = vrot.slane %v1085_v2, 2  ;;  %v1091_v28 = vrot.slane %v1090_v29, 4  ;;  %v1097_v9 = vsel %vm410_vm0, %v380_v40, 0.0  ;;  %v384_v0 = vld [vmem:[%s4448_s19 + $0x330] sm:$0xff]  ;;  %v386_v7 = vld [vmem:[%s4448_s19 + $0x340] sm:$0xff] }
  0xf4   : > { %6222 = vst [vmem:[#allocation68_spill] sm:$0xff] %v5023_v41  ;;  %v1082_v36 = vadd.f32 %v1081_v13, %v1080_v6  ;;  %v5029_v43 = vmul.f32 0.125, %v1068_v17  ;;  %v1662_v44 = vsel %vm1581_vm4, %v5023_v41, %v1661_v5  ;;  %v1098_v8 = vrot.slane %v1097_v9, 4  ;;  %v383_v6 = vld [vmem:[%s4448_s19 + $0x328] sm:$0xff] }
  0xf5   : > { %v5034_v61 = vmul.f32 0.125, %v1075_v15  ;;  %v1087_v57 = vadd.f32 %v1086_v63, %v1085_v2  ;;  %v1092_v56 = vadd.f32 %v1091_v28, %v1090_v29  ;;  %v1104_v50 = vsel %vm410_vm0, %v381_v53, 0.0  ;;  %v385_v29 = vld [vmem:[%s4448_s19 + $0x338] sm:$0xff] }
  0xf6   : > { %6223 = vst [vmem:[#allocation69_spill] sm:$0xff] %v5029_v43  ;;  %v5037_v39 = vmul.f32 0.125, %v1082_v36  ;;  %v1663_v40 = vsel %vm1583_vm5, %v5029_v43, %v1662_v44  ;;  %v1099_v27 = vadd.f32 %v1098_v8, %v1097_v9  ;;  %v1105_v17 = vrot.slane %v1104_v50, 4 }
  0xf7   : > { %6224 = vst [vmem:[#allocation70_spill] sm:$0xff] %v5034_v61  ;;  %v1664_v13 = vsel %vm1585_vm6, %v5034_v61, %v1663_v40  ;;  %v1088_v5 = vrot.slane %v1087_v57, 1  ;;  %v1093_v41 = vrot.slane %v1092_v56, 2  ;;  %v1111_v15 = vsel %vm410_vm0, %v382_v32, 0.0 }
  0xf8   : > { %6225 = vst [vmem:[#allocation71_spill] sm:$0xff] %v5037_v39  ;;  %v1665_v2 = vsel %vm1587_vm7, %v5037_v39, %v1664_v13  ;;  %v1100_v53 = vrot.slane %v1099_v27, 2  ;;  %v1106_v63 = vadd.f32 %v1105_v17, %v1104_v50  ;;  %v1112_v28 = vrot.slane %v1111_v15, 4 }
  0xf9   : > { %3991 = vmatmul.mubr.msk.f32.gmra.mrb[10].mxu1 %vm410_vm0, %v1665_v2  ;;  %v1089_v36 = vadd.f32 %v1088_v5, %v1087_v57  ;;  %v1094_v9 = vadd.f32 %v1093_v41, %v1092_v56  ;;  %v1118_v44 = vsel %vm410_vm0, %v383_v6, 0.0  ;;  %v1125_v8 = vsel %vm410_vm0, %v384_v0, 0.0  ;;  %3959 = vmatmul.mubr.msk.f32.gmra.mrb[10].mxu0 %vm410_vm0, %v1665_v2 }
  0xfa   : > { %v1101_v40 = vadd.f32 %v1100_v53, %v1099_v27  ;;  %v1107_v32 = vrot.slane %v1106_v63, 2  ;;  %v1113_v61 = vadd.f32 %v1112_v28, %v1111_v15  ;;  %v1119_v43 = vrot.slane %v1118_v44, 4 }
  0xfb   : > { %v1095_v13 = vrot.slane %v1094_v9, 1  ;;  %v1126_v39 = vrot.slane %v1125_v8, 4  ;;  %v1132_v50 = vsel %vm410_vm0, %v385_v29, 0.0  ;;  %v5055_v17 = vmul.f32 0.125, %v1089_v36 }
  0xfc   : > { %v1102_v46 = vrot.slane %v1101_v40, 1  ;;  %v1108_v57 = vadd.f32 %v1107_v32, %v1106_v63  ;;  %v1114_v41 = vrot.slane %v1113_v61, 2  ;;  %v1120_v56 = vadd.f32 %v1119_v43, %v1118_v44 }
  0xfd   : > { %6226 = vst [vmem:[#allocation72_spill] sm:$0xff] %v5055_v17  ;;  %v1096_v6 = vadd.f32 %v1095_v13, %v1094_v9  ;;  %v1127_v0 = vadd.f32 %v1126_v39, %v1125_v8  ;;  %v1133_v5 = vrot.slane %v1132_v50, 4  ;;  %v1139_v27 = vsel %vm410_vm0, %v386_v7, 0.0  ;;  %v387_v9 = vld [vmem:[%s4448_s19 + $0x348] sm:$0xff] }
  0xfe   : > { %v1103_v2 = vadd.f32 %v1102_v46, %v1101_v40  ;;  %v1109_v15 = vrot.slane %v1108_v57, 1  ;;  %v1115_v53 = vadd.f32 %v1114_v41, %v1113_v61  ;;  %v1121_v28 = vrot.slane %v1120_v56, 2 }
  0xff   : > { %v1128_v58 = vrot.slane %v1127_v0, 2  ;;  %v1134_v4 = vadd.f32 %v1133_v5, %v1132_v50  ;;  %v5058_v29 = vmul.f32 0.125, %v1096_v6  ;;  %v1140_v36 = vrot.slane %v1139_v27, 4  ;;  %v388_v50 = vld [vmem:[%s4448_s19 + $0x350] sm:$0xff] }
 0x100   : > { %v1110_v31 = vadd.f32 %v1109_v15, %v1108_v57  ;;  %v1116_v63 = vrot.slane %v1115_v53, 1  ;;  %v1122_v32 = vadd.f32 %v1121_v28, %v1120_v56  ;;  %v5060_v43 = vmul.f32 0.125, %v1103_v2 }
 0x101   : > { %6227 = vst [vmem:[#allocation73_spill] sm:$0xff] %v5058_v29  ;;  %v1129_v39 = vadd.f32 %v1128_v58, %v1127_v0  ;;  %v1135_v44 = vrot.slane %v1134_v4, 2  ;;  %v1666_v46 = vsel %vm1575_vm1, %v5058_v29, %v5055_v17  ;;  %v1141_v7 = vadd.f32 %v1140_v36, %v1139_v27  ;;  %v389_v27 = vld [vmem:[%s4448_s19 + $0x358] sm:$0xff]  ;;  %v395_v17 = vld [vmem:[%s4448_s19 + $0x388] sm:$0xff] }
 0x102   : > { %6228 = vst [vmem:[#allocation74_spill] sm:$0xff] %v5060_v43  ;;  %v1117_v61 = vadd.f32 %v1116_v63, %v1115_v53  ;;  %v1123_v8 = vrot.slane %v1122_v32, 1  ;;  %v5066_v40 = vmul.f32 0.125, %v1110_v31  ;;  %v1667_v13 = vsel %vm1577_vm2, %v5060_v43, %v1666_v46  ;;  %v390_v63 = vld [vmem:[%s4448_s19 + $0x360] sm:$0xff] }
 0x103   : > { %v1130_v57 = vrot.slane %v1129_v39, 1  ;;  %v1136_v41 = vadd.f32 %v1135_v44, %v1134_v4  ;;  %v1142_v56 = vrot.slane %v1141_v7, 2  ;;  %v1146_v58 = vsel %vm410_vm0, %v387_v9, 0.0 }
 0x104   : > { %6229 = vst [vmem:[#allocation75_spill] sm:$0xff] %v5066_v40  ;;  %v1124_v6 = vadd.f32 %v1123_v8, %v1122_v32  ;;  %v5072_v0 = vmul.f32 0.125, %v1117_v61  ;;  %v1668_v5 = vsel %vm1579_vm3, %v5066_v40, %v1667_v13  ;;  %v1147_v31 = vrot.slane %v1146_v58, 4  ;;  %v392_v13 = vld [vmem:[%s4448_s19 + $0x370] sm:$0xff] }
 0x105   : > { %v1131_v2 = vadd.f32 %v1130_v57, %v1129_v39  ;;  %v1137_v15 = vrot.slane %v1136_v41, 1  ;;  %v1143_v53 = vadd.f32 %v1142_v56, %v1141_v7  ;;  %v1153_v28 = vsel %vm410_vm0, %v388_v50, 0.0  ;;  %v391_v7 = vld [vmem:[%s4448_s19 + $0x368] sm:$0xff]  ;;  %v393_v50 = vld [vmem:[%s4448_s19 + $0x378] sm:$0xff] }
 0x106   : > { %6230 = vst [vmem:[#allocation76_spill] sm:$0xff] %v5072_v0  ;;  %v5078_v4 = vmul.f32 0.125, %v1124_v6  ;;  %v1669_v36 = vsel %vm1581_vm4, %v5072_v0, %v1668_v5  ;;  %v1148_v32 = vadd.f32 %v1147_v31, %v1146_v58  ;;  %v1154_v9 = vrot.slane %v1153_v28, 4 }
 0x107   : > { %v1138_v44 = vadd.f32 %v1137_v15, %v1136_v41  ;;  %v5083_v46 = vmul.f32 0.125, %v1131_v2  ;;  %v1144_v61 = vrot.slane %v1143_v53, 1  ;;  %v1160_v8 = vsel %vm410_vm0, %v389_v27, 0.0 }
 0x108   : > { %6231 = vst [vmem:[#allocation77_spill] sm:$0xff] %v5078_v4  ;;  %v1670_v39 = vsel %vm1583_vm5, %v5078_v4, %v1669_v36  ;;  %v1149_v57 = vrot.slane %v1148_v32, 2  ;;  %v1155_v56 = vadd.f32 %v1154_v9, %v1153_v28  ;;  %v1161_v6 = vrot.slane %v1160_v8, 4 }
 0x109   : > { %6232 = vst [vmem:[#allocation78_spill] sm:$0xff] %v5083_v46  ;;  %v5091_v40 = vmul.f32 0.125, %v1138_v44  ;;  %v1671_v58 = vsel %vm1585_vm6, %v5083_v46, %v1670_v39  ;;  %v1145_v41 = vadd.f32 %v1144_v61, %v1143_v53  ;;  %v1167_v5 = vsel %vm410_vm0, %v390_v63, 0.0  ;;  %v394_v63 = vld [vmem:[%s4448_s19 + $0x380] sm:$0xff] }
 0x10a   : > { %v1150_v31 = vadd.f32 %v1149_v57, %v1148_v32  ;;  %v1156_v27 = vrot.slane %v1155_v56, 2  ;;  %v1162_v2 = vadd.f32 %v1161_v6, %v1160_v8  ;;  %v1168_v15 = vrot.slane %v1167_v5, 4 }
 0x10b   : > { %6233 = vst [vmem:[#allocation79_spill] sm:$0xff] %v5091_v40  ;;  %v1672_v36 = vsel %vm1587_vm7, %v5091_v40, %v1671_v58  ;;  %v1174_v4 = vsel %vm410_vm0, %v391_v7, 0.0  ;;  %v1181_v28 = vsel %vm410_vm0, %v392_v13, 0.0  ;;  %v1188_v9 = vsel %vm410_vm0, %v393_v50, 0.0 }
 0x10c   : > { %3993 = vmatprep.mubr.msk.f32.mxu1 %vm410_vm0, %v1672_v36  ;;  %v1151_v44 = vrot.slane %v1150_v31, 1  ;;  %v1157_v39 = vadd.f32 %v1156_v27, %v1155_v56  ;;  %v1163_v53 = vrot.slane %v1162_v2, 2  ;;  %v1169_v61 = vadd.f32 %v1168_v15, %v1167_v5  ;;  %3961 = vmatprep.mubr.msk.f32.mxu0 %vm410_vm0, %v1672_v36 }
 0x10d   : > { %v1175_v32 = vrot.slane %v1174_v4, 4  ;;  %v1182_v8 = vrot.slane %v1181_v28, 4  ;;  %v1189_v57 = vrot.slane %v1188_v9, 4  ;;  %v5104_v6 = vmul.f32 0.125, %v1145_v41 }
 0x10e   : > { %v1152_v7 = vadd.f32 %v1151_v44, %v1150_v31  ;;  %v1158_v58 = vrot.slane %v1157_v39, 1  ;;  %v1164_v13 = vadd.f32 %v1163_v53, %v1162_v2  ;;  %v1170_v40 = vrot.slane %v1169_v61, 2 }
 0x10f   : > { %6234 = vst [vmem:[#allocation80_spill] sm:$0xff] %v5104_v6  ;;  %v1176_v50 = vadd.f32 %v1175_v32, %v1174_v4  ;;  %v1183_v46 = vadd.f32 %v1182_v8, %v1181_v28  ;;  %v1190_v0 = vadd.f32 %v1189_v57, %v1188_v9  ;;  %v1195_v56 = vsel %vm410_vm0, %v394_v63, 0.0 }
 0x110   : > { %v1159_v27 = vadd.f32 %v1158_v58, %v1157_v39  ;;  %v1165_v5 = vrot.slane %v1164_v13, 1  ;;  %v1171_v15 = vadd.f32 %v1170_v40, %v1169_v61  ;;  %v5107_v36 = vmul.f32 0.125, %v1152_v7  ;;  %v396_v40 = vld [vmem:[%s4448_s19 + $0x390] sm:$0xff] }
 0x111   : > { %v1177_v43 = vrot.slane %v1176_v50, 2  ;;  %v1184_v29 = vrot.slane %v1183_v46, 2  ;;  %v1191_v41 = vrot.slane %v1190_v0, 2  ;;  %v1196_v51 = vrot.slane %v1195_v56, 4 }
 0x112   : > { %6235 = vst [vmem:[#allocation81_spill] sm:$0xff] %v5107_v36  ;;  %v1166_v31 = vadd.f32 %v1165_v5, %v1164_v13  ;;  %v1172_v2 = vrot.slane %v1171_v15, 1  ;;  %v5110_v44 = vmul.f32 0.125, %v1159_v27  ;;  %v1673_v4 = vsel %vm1575_vm1, %v5107_v36, %v5104_v6  ;;  %v397_v13 = vld [vmem:[%s4448_s19 + $0x398] sm:$0xff]  ;;  %v398_v5 = vld [vmem:[%s4448_s19 + $0x3a0] sm:$0xff] }
 0x113   : > { %v1178_v28 = vadd.f32 %v1177_v43, %v1176_v50  ;;  %v1185_v9 = vadd.f32 %v1184_v29, %v1183_v46  ;;  %v1192_v39 = vadd.f32 %v1191_v41, %v1190_v0  ;;  %v1197_v53 = vadd.f32 %v1196_v51, %v1195_v56  ;;  %v399_v41 = vld [vmem:[%s4448_s19 + $0x3a8] sm:$0xff] }
 0x114   : > { %6236 = vst [vmem:[#allocation82_spill] sm:$0xff] %v5110_v44  ;;  %v1173_v61 = vadd.f32 %v1172_v2, %v1171_v15  ;;  %v5116_v63 = vmul.f32 0.125, %v1166_v31  ;;  %v1674_v32 = vsel %vm1577_vm2, %v5110_v44, %v1673_v4  ;;  %v1202_v8 = vsel %vm410_vm0, %v395_v17, 0.0 }
 0x115   : > { %v1179_v57 = vrot.slane %v1178_v28, 1  ;;  %v1186_v7 = vrot.slane %v1185_v9, 1  ;;  %v1193_v58 = vrot.slane %v1192_v39, 1  ;;  %v1198_v27 = vrot.slane %v1197_v53, 2 }
 0x116   : > { %6237 = vst [vmem:[#allocation83_spill] sm:$0xff] %v5116_v63  ;;  %v5122_v43 = vmul.f32 0.125, %v1173_v61  ;;  %v1675_v51 = vsel %vm1579_vm3, %v5116_v63, %v1674_v32  ;;  %v1203_v29 = vrot.slane %v1202_v8, 4  ;;  %v1209_v0 = vsel %vm410_vm0, %v396_v40, 0.0 }
 0x117   : > { %v1180_v46 = vadd.f32 %v1179_v57, %v1178_v28  ;;  %v1187_v50 = vadd.f32 %v1186_v7, %v1185_v9  ;;  %v1194_v56 = vadd.f32 %v1193_v58, %v1192_v39  ;;  %v1199_v17 = vadd.f32 %v1198_v27, %v1197_v53  ;;  %v400_v9 = vld [vmem:[%s4448_s19 + $0x3b0] sm:$0xff] }
 0x118   : > { %6238 = vst [vmem:[#allocation84_spill] sm:$0xff] %v5122_v43  ;;  %v1676_v15 = vsel %vm1581_vm4, %v5122_v43, %v1675_v51  ;;  %v1204_v31 = vadd.f32 %v1203_v29, %v1202_v8  ;;  %v1210_v2 = vrot.slane %v1209_v0, 4  ;;  %v1216_v4 = vsel %vm410_vm0, %v397_v13, 0.0 }
 0x119   : > { %v5132_v61 = vmul.f32 0.125, %v1180_v46  ;;  %v5134_v32 = vmul.f32 0.125, %v1187_v50  ;;  %v5136_v63 = vmul.f32 0.125, %v1194_v56  ;;  %v1200_v28 = vrot.slane %v1199_v17, 1  ;;  %v401_v46 = vld [vmem:[%s4448_s19 + $0x3b8] sm:$0xff] }
 0x11a   : > { %v1205_v39 = vrot.slane %v1204_v31, 2  ;;  %v1211_v40 = vadd.f32 %v1210_v2, %v1209_v0  ;;  %v1217_v53 = vrot.slane %v1216_v4, 4  ;;  %v1223_v57 = vsel %vm410_vm0, %v398_v5, 0.0 }
 0x11b   : > { %6239 = vst [vmem:[#allocation85_spill] sm:$0xff] %v5132_v61  ;;  %6240 = vst [vmem:[#allocation86_spill] sm:$0xff] %v5134_v32  ;;  %v1677_v8 = vsel %vm1583_vm5, %v5132_v61, %v1676_v15  ;;  %v1201_v7 = vadd.f32 %v1200_v28, %v1199_v17  ;;  %v1224_v58 = vrot.slane %v1223_v57, 4  ;;  %v1230_v13 = vsel %vm410_vm0, %v399_v41, 0.0  ;;  %v5143_v27 = vpop.f32.mrb[0].mxu1  ;;  %v5145_v51 = vpop.f32.mrb[0].mxu0 }
 0x11c   : > { %6241 = vst [vmem:[#allocation87_spill] sm:$0xff] %v5136_v63  ;;  %v1678_v29 = vsel %vm1585_vm6, %v5134_v32, %v1677_v8  ;;  %v1206_v0 = vadd.f32 %v1205_v39, %v1204_v31  ;;  %v1212_v50 = vrot.slane %v1211_v40, 2  ;;  %v1218_v56 = vadd.f32 %v1217_v53, %v1216_v4  ;;  %v5150_v5 = vpop.f32.mrb[1].mxu1  ;;  %v5152_v2 = vpop.f32.mrb[1].mxu0  ;;  %v402_v31 = vld [vmem:[%s4448_s19 + $0x3c0] sm:$0xff] }
 0x11d   : > { %v1679_v17 = vsel %vm1587_vm7, %v5136_v63, %v1678_v29  ;;  %v1225_v15 = vadd.f32 %v1224_v58, %v1223_v57  ;;  %v1231_v41 = vrot.slane %v1230_v13, 4  ;;  %v1237_v28 = vsel %vm410_vm0, %v400_v9, 0.0 }
 0x11e   : > { %3994 = vmatmul.mubr.msk.f32.gmra.mrb[12].mxu1 %vm410_vm0, %v1679_v17  ;;  %v1207_v61 = vrot.slane %v1206_v0, 1  ;;  %v1213_v8 = vadd.f32 %v1212_v50, %v1211_v40  ;;  %v1219_v32 = vrot.slane %v1218_v56, 2  ;;  %v1238_v43 = vrot.slane %v1237_v28, 4  ;;  %3962 = vmatmul.mubr.msk.f32.gmra.mrb[12].mxu0 %vm410_vm0, %v1679_v17 }
 0x11f   : > { %v1226_v4 = vrot.slane %v1225_v15, 2  ;;  %v1232_v39 = vadd.f32 %v1231_v41, %v1230_v13  ;;  %v1244_v53 = vsel %vm410_vm0, %v401_v46, 0.0  ;;  %v5161_v44 = vmul.f32 0.125, %v1201_v7  ;;  %v403_v41 = vld [vmem:[%s4448_s19 + $0x3c8] sm:$0xff] }
 0x120   : > { %v1208_v57 = vadd.f32 %v1207_v61, %v1206_v0  ;;  %v1214_v58 = vrot.slane %v1213_v8, 1  ;;  %v1220_v29 = vadd.f32 %v1219_v32, %v1218_v56  ;;  %v1239_v9 = vadd.f32 %v1238_v43, %v1237_v28 }
 0x121   : > { %6242 = vst [vmem:[#allocation88_spill] sm:$0xff] %v5161_v44  ;;  %v1227_v63 = vadd.f32 %v1226_v4, %v1225_v15  ;;  %v1233_v36 = vrot.slane %v1232_v39, 2  ;;  %v1245_v6 = vrot.slane %v1244_v53, 4  ;;  %v1251_v40 = vsel %vm410_vm0, %v402_v31, 0.0 }
 0x122   : > { %v1215_v50 = vadd.f32 %v1214_v58, %v1213_v8  ;;  %v1221_v38 = vrot.slane %v1220_v29, 1  ;;  %v1240_v17 = vrot.slane %v1239_v9, 2  ;;  %v5164_v60 = vmul.f32 0.125, %v1208_v57  ;;  %v404_v8 = vld [vmem:[%s4448_s19 + $0x3d0] sm:$0xff]  ;;  %v405_v58 = vld [vmem:[%s4448_s19 + $0x3d8] sm:$0xff] }
 0x123   : > { %v1228_v13 = vrot.slane %v1227_v63, 1  ;;  %v1234_v46 = vadd.f32 %v1233_v36, %v1232_v39  ;;  %v1246_v7 = vadd.f32 %v1245_v6, %v1244_v53  ;;  %v1252_v35 = vrot.slane %v1251_v40, 4 }
 0x124   : > { %6243 = vst [vmem:[#allocation89_spill] sm:$0xff] %v5164_v60  ;;  %v1222_v61 = vadd.f32 %v1221_v38, %v1220_v29  ;;  %v1241_v32 = vadd.f32 %v1240_v17, %v1239_v9  ;;  %v5167_v43 = vmul.f32 0.125, %v1215_v50  ;;  %v1680_v0 = vsel %vm1575_vm1, %v5164_v60, %v5161_v44 }
 0x125   : > { %v1229_v56 = vadd.f32 %v1228_v13, %v1227_v63  ;;  %v1235_v15 = vrot.slane %v1234_v46, 1  ;;  %v1247_v28 = vrot.slane %v1246_v7, 2  ;;  %v1253_v31 = vadd.f32 %v1252_v35, %v1251_v40 }
 0x126   : > { %6244 = vst [vmem:[#allocation90_spill] sm:$0xff] %v5167_v43  ;;  %v1242_v4 = vrot.slane %v1241_v32, 1  ;;  %v5173_v36 = vmul.f32 0.125, %v1222_v61  ;;  %v1681_v38 = vsel %vm1577_vm2, %v5167_v43, %v1680_v0  ;;  %v1258_v6 = vsel %vm410_vm0, %v403_v41, 0.0 }
 0x127   : > { %v1236_v39 = vadd.f32 %v1235_v15, %v1234_v46  ;;  %v1248_v53 = vadd.f32 %v1247_v28, %v1246_v7  ;;  %v5178_v57 = vmul.f32 0.125, %v1229_v56  ;;  %v1254_v29 = vrot.slane %v1253_v31, 2  ;;  %v406_v46 = vld [vmem:[%s4448_s19 + $0x3e0] sm:$0xff]  ;;  %v407_v28 = vld [vmem:[%s4448_s19 + $0x3e8] sm:$0xff] }
 0x128   : > { %6245 = vst [vmem:[#allocation91_spill] sm:$0xff] %v5173_v36  ;;  %v1243_v63 = vadd.f32 %v1242_v4, %v1241_v32  ;;  %v1682_v35 = vsel %vm1579_vm3, %v5173_v36, %v1681_v38  ;;  %v1259_v9 = vrot.slane %v1258_v6, 4  ;;  %v1265_v40 = vsel %vm410_vm0, %v404_v8, 0.0  ;;  %v408_v8 = vld [vmem:[%s4448_s19 + $0x3f0] sm:$0xff] }
 0x129   : > { %6246 = vst [vmem:[#allocation92_spill] sm:$0xff] %v5178_v57  ;;  %v1249_v50 = vrot.slane %v1248_v53, 1  ;;  %v5184_v17 = vmul.f32 0.125, %v1236_v39  ;;  %v1683_v13 = vsel %vm1581_vm4, %v5178_v57, %v1682_v35  ;;  %v1255_v7 = vadd.f32 %v1254_v29, %v1253_v31 }
 0x12a   : > { %v5189_v41 = vmul.f32 0.125, %v1243_v63  ;;  %v1260_v61 = vadd.f32 %v1259_v9, %v1258_v6  ;;  %v1266_v32 = vrot.slane %v1265_v40, 4  ;;  %v1272_v0 = vsel %vm410_vm0, %v405_v58, 0.0  ;;  %v409_v6 = vld [vmem:[%s4448_s19 + $0x3f8] sm:$0xff] }
 0x12b   : > { %6247 = vst [vmem:[#allocation93_spill] sm:$0xff] %v5184_v17  ;;  %v1250_v56 = vadd.f32 %v1249_v50, %v1248_v53  ;;  %v1684_v15 = vsel %vm1583_vm5, %v5184_v17, %v1683_v13  ;;  %v1256_v4 = vrot.slane %v1255_v7, 1  ;;  %v1273_v38 = vrot.slane %v1272_v0, 4 }
 0x12c   : > { %6248 = vst [vmem:[#allocation94_spill] sm:$0xff] %v5189_v41  ;;  %v1685_v39 = vsel %vm1585_vm6, %v5189_v41, %v1684_v15  ;;  %v1261_v35 = vrot.slane %v1260_v61, 2  ;;  %v1267_v31 = vadd.f32 %v1266_v32, %v1265_v40  ;;  %v1279_v29 = vsel %vm410_vm0, %v406_v46, 0.0 }
 0x12d   : > { %v5199_v63 = vmul.f32 0.125, %v1250_v56  ;;  %v1257_v9 = vadd.f32 %v1256_v4, %v1255_v7  ;;  %v1274_v58 = vadd.f32 %v1273_v38, %v1272_v0  ;;  %v1280_v53 = vrot.slane %v1279_v29, 4 }
 0x12e   : > { %v1262_v50 = vadd.f32 %v1261_v35, %v1260_v61  ;;  %v1268_v57 = vrot.slane %v1267_v31, 2  ;;  %v1286_v13 = vsel %vm410_vm0, %v407_v28, 0.0  ;;  %v1293_v17 = vsel %vm410_vm0, %v408_v8, 0.0 }
 0x12f   : > { %6249 = vst [vmem:[#allocation95_spill] sm:$0xff] %v5199_v63  ;;  %v1686_v36 = vsel %vm1587_vm7, %v5199_v63, %v1685_v39  ;;  %v1275_v15 = vrot.slane %v1274_v58, 2  ;;  %v1281_v41 = vadd.f32 %v1280_v53, %v1279_v29  ;;  %v1287_v40 = vrot.slane %v1286_v13, 4 }
 0x130   : > { %3996 = vmatprep.mubr.msk.f32.mxu1 %vm410_vm0, %v1686_v36  ;;  %v1263_v46 = vrot.slane %v1262_v50, 1  ;;  %v1269_v32 = vadd.f32 %v1268_v57, %v1267_v31  ;;  %v1294_v56 = vrot.slane %v1293_v17, 4  ;;  %v1300_v7 = vsel %vm410_vm0, %v409_v6, 0.0  ;;  %3964 = vmatprep.mubr.msk.f32.mxu0 %vm410_vm0, %v1686_v36 }
 0x131   : > { %v1276_v61 = vadd.f32 %v1275_v15, %v1274_v58  ;;  %v1282_v0 = vrot.slane %v1281_v41, 2  ;;  %v1288_v28 = vadd.f32 %v1287_v40, %v1286_v13  ;;  %v1301_v4 = vrot.slane %v1300_v7, 4 }
 0x132   : > { %v1264_v8 = vadd.f32 %v1263_v46, %v1262_v50  ;;  %v1270_v38 = vrot.slane %v1269_v32, 1  ;;  %v1295_v35 = vadd.f32 %v1294_v56, %v1293_v17  ;;  %v5209_v39 = vmul.f32 0.125, %v1257_v9  ;;  %v3812_v46 = vld [vmem:[%s6056_s2 + $0x20] sm:$0xff] }
 0x133   : > { %v1277_v29 = vrot.slane %v1276_v61, 1  ;;  %v1283_v53 = vadd.f32 %v1282_v0, %v1281_v41  ;;  %v1289_v63 = vrot.slane %v1288_v28, 2  ;;  %v1302_v43 = vadd.f32 %v1301_v4, %v1300_v7 }
 0x134   : > { %v1271_v60 = vadd.f32 %v1270_v38, %v1269_v32  ;;  %v1296_v57 = vrot.slane %v1295_v35, 2  ;;  %v5211_v31 = vmul.f32 0.125, %v1264_v8 }
 0x135   : > { %v1278_v6 = vadd.f32 %v1277_v29, %v1276_v61  ;;  %v1284_v44 = vrot.slane %v1283_v53, 1  ;;  %v1290_v36 = vadd.f32 %v1289_v63, %v1288_v28  ;;  %v1303_v58 = vrot.slane %v1302_v43, 2  ;;  %v3813_v63 = vld [vmem:[%s6056_s2 + $0x28] sm:$0xff] }
 0x136   : > { %v1297_v15 = vadd.f32 %v1296_v57, %v1295_v35  ;;  %v5213_v13 = vmul.f32 0.125, %v1271_v60  ;;  %v1687_v17 = vsel %vm1575_vm1, %v5211_v31, %v5209_v39  ;;  %v4087_v0 = vpack.c.bf16 %v3813_v63, %v3812_v46  ;;  %v3815_v57 = vld [vmem:[%s6056_s2 + $0x38] sm:$0xff] }
 0x137   : > { %v1285_v9 = vadd.f32 %v1284_v44, %v1283_v53  ;;  %v1291_v50 = vrot.slane %v1290_v36, 1  ;;  %v1304_v41 = vadd.f32 %v1303_v58, %v1302_v43  ;;  %v5218_v40 = vmul.f32 0.125, %v1278_v6  ;;  %v3814_v53 = vld [vmem:[%s6056_s2 + $0x30] sm:$0xff] }
 0x138   : > { %6250 = vst [vmem:[#allocation96_spill] sm:$0xff] %v5213_v13  ;;  %v1298_v32 = vrot.slane %v1297_v15, 1  ;;  %v1688_v60 = vsel %vm1577_vm2, %v5213_v13, %v1687_v17  ;;  %4088 = vmatprep.subr.bf16.mxu1 %v4087_v0 }
 0x139   : > { %6251 = vst [vmem:[#allocation97_spill] sm:$0xff] %v5218_v40  ;;  %v1292_v56 = vadd.f32 %v1291_v50, %v1290_v36  ;;  %v1305_v7 = vrot.slane %v1304_v41, 1  ;;  %v5228_v61 = vmul.f32 0.125, %v1285_v9  ;;  %v1689_v44 = vsel %vm1579_vm3, %v5218_v40, %v1688_v60  ;;  %4090 = vmatpush3.bf16.msra.mxu1 %v4087_v0 }
 0x13a   : > { %v1299_v43 = vadd.f32 %v1298_v32, %v1297_v15  ;;  %v4091_v36 = vpack.c.bf16 %v3815_v57, %v3814_v53 }
 0x13b   : > { %6252 = vst [vmem:[#allocation98_spill] sm:$0xff] %v5228_v61  ;;  %v1306_v28 = vadd.f32 %v1305_v7, %v1304_v41  ;;  %v5232_v4 = vmul.f32 0.125, %v1292_v56  ;;  %v1690_v8 = vsel %vm1581_vm4, %v5228_v61, %v1689_v44  ;;  %v5257_v41 = vld [vmem:[%s6058_s4] ss:$0 sm:$0xff] }
 0x13c   : > { %v5236_v38 = vmul.f32 0.125, %v1299_v43  ;;  %4092 = vmatprep.subr.bf16.mxu1 %v4091_v36  ;;  %v1970_v56 = vadd.f32 %v5143_v27, %v5257_v41  ;;  %v1965_v7 = vadd.f32 %v5257_v41, %v5150_v5  ;;  %v5270_v27 = vld [vmem:[%s6057_s3] ss:$0 sm:$0xff] }
 0x13d   : > { %6253 = vst [vmem:[#allocation99_spill] sm:$0xff] %v5232_v4  ;;  %v5238_v35 = vmul.f32 0.125, %v1306_v28  ;;  %v1691_v29 = vsel %vm1583_vm5, %v5232_v4, %v1690_v8  ;;  %4094 = vmatpush3.bf16.msra.mxu1 %v4091_v36 }
 0x13e   : > { %6254 = vst [vmem:[#allocation100_spill] sm:$0xff] %v5236_v38  ;;  %v1692_v6 = vsel %vm1585_vm6, %v5236_v38, %v1691_v29  ;;  %v3775_v0 = vmul.f32 -1.442695, %v1970_v56  ;;  %v3774_v8 = vmul.f32 -1.442695, %v1965_v7 }
 0x13f   : > { %6255 = vst [vmem:[#allocation101_spill] sm:$0xff] %v5238_v35  ;;  %v1693_v58 = vsel %vm1587_vm7, %v5238_v35, %v1692_v6 }
 0x140   : > { %3997 = vmatmul.mubr.msk.f32.gmra.mrb[14].mxu1 %vm410_vm0, %v1693_v58  ;;  %3965 = vmatmul.mubr.msk.f32.gmra.mrb[14].mxu0 %vm410_vm0, %v1693_v58  ;;  %v3980_v15 = vpop.f32.mrb[2].mxu1  ;;  %v3948_v17 = vpop.f32.mrb[2].mxu0  ;;  %4134 = vpow2.f32 %v3775_v0 }
 0x141   : > { %v1974_v9 = vpop.f32.mrb[3].mxu1  ;;  %v1802_v50 = vpop.f32.mrb[3].mxu0  ;;  %v1980_v44 = vadd.f32 %v3980_v15, %v5257_v41  ;;  %4136 = vpow2.f32 %v3774_v8 }
 0x142   : > { %v1975_v43 = vadd.f32 %v5257_v41, %v1974_v9  ;;  %v1793_v9 = vadd.f32 %v5270_v27, %v5152_v2 }
 0x143   : > { %v3777_v53 = vmul.f32 -1.442695, %v1980_v44 }
 0x144   : > { %v3776_v57 = vmul.f32 -1.442695, %v1975_v43  ;;  %v1798_v43 = vadd.f32 %v5145_v51, %v5270_v27 }
 0x145   : > { %4138 = vpow2.f32 %v3777_v53 }
 0x146   : > { %4140 = vpow2.f32 %v3776_v57  ;;  %v1803_v57 = vadd.f32 %v5270_v27, %v1802_v50 }
 0x14a   : > { %v4135_v5 = vpop.eup %4134 }
 0x14b   : > { %v4137_v58 = vpop.eup %4136 }
 0x14c   : > { %v2091_v7 = vadd.f32 1.0, %v4137_v58  ;;  %v5286_v58 = vmax.f32 %v1803_v57, 0.0 }
 0x14f   : > { %v4139_v15 = vpop.eup %4138 }
 0x150   : > { %v2094_v0 = vadd.f32 1.0, %v4139_v15 }
 0x162   : > { %v3983_v46 = vpop.f32.mrb[4].mxu1  ;;  %v3951_v63 = vpop.f32.mrb[4].mxu0 }
 0x163   : > { %v1984_v32 = vpop.f32.mrb[5].mxu1  ;;  %v1812_v60 = vpop.f32.mrb[5].mxu0  ;;  %v1990_v28 = vadd.f32 %v3983_v46, %v5257_v41 }
 0x164   : > { %v1985_v29 = vadd.f32 %v5257_v41, %v1984_v32  ;;  %v4141_v46 = vpop.eup %4140  ;;  %v2092_v32 = vadd.f32 1.0, %v4135_v5  ;;  %v5282_v5 = vmax.f32 %v1798_v43, 0.0 }
 0x165   : > { %v3779_v6 = vmul.f32 -1.442695, %v1990_v28  ;;  %v5276_v28 = vmax.f32 %v1793_v9, 0.0  ;;  %v2093_v8 = vadd.f32 1.0, %v4141_v46  ;;  %v3791_v9 = vld [vmem:[%s6055_s1 + $0x28] sm:$0xff] }
 0x166   : > { %v3778_v36 = vmul.f32 -1.442695, %v1985_v29  ;;  %v1808_v29 = vadd.f32 %v3948_v17, %v5270_v27  ;;  %v2165_v61 = vrot.slane %v5282_v5, 4 }
 0x167   : > { %4142 = vpow2.f32 %v3779_v6  ;;  %v1818_v6 = vadd.f32 %v3951_v63, %v5270_v27  ;;  %v2155_v17 = vrot.slane %v5276_v28, 1  ;;  %v2156_v63 = vrot.slane %v5276_v28, 2 }
 0x168   : > { %4144 = vpow2.f32 %v3778_v36  ;;  %v1813_v36 = vadd.f32 %v5270_v27, %v1812_v60  ;;  %v5284_v51 = vmax.f32 %v1808_v29, 0.0  ;;  %v3790_v60 = vld [vmem:[%s6055_s1 + $0x20] sm:$0xff]  ;;  %v2157_v46 = vrot.slane %v5276_v28, 3 }
 0x169   : > { %4146 = vrcp.f32 %v2092_v32  ;;  %v5289_v15 = vmax.f32 %v1818_v6, 0.0  ;;  %v2396_v32 = vsub.f32 %v4470_v11, %v2155_v17  ;;  %v2158_v43 = vrot.slane %v5276_v28, 4 }
 0x16a   : > { %4148 = vrcp.f32 %v2091_v7  ;;  %v5291_v50 = vmax.f32 %v1813_v36, 0.0  ;;  %v2163_v7 = vrot.slane %v5282_v5, 2  ;;  %v2159_v57 = vrot.slane %v5276_v28, 5 }
 0x16b   : > { %4150 = vrcp.f32 %v2094_v0  ;;  %v2397_v0 = vsub.f32 %v4472_v12, %v2156_v63  ;;  %v2398_v11 = vsub.f32 %v4474_v16, %v2157_v46  ;;  %v2651_v6 = vrot.slane %v2396_v32, 7 }
 0x16c   : > { %4152 = vrcp.f32 %v2093_v8  ;;  %v2164_v8 = vrot.slane %v5282_v5, 3  ;;  %v2160_v12 = vrot.slane %v5276_v28, 6  ;;  %v2399_v63 = vsub.f32 %v4477_v18, %v2158_v43 }
 0x16d   : > { %v2400_v16 = vsub.f32 %v4485_v24, %v2159_v57  ;;  %v2655_v24 = vrot.slane %v2398_v11, 5  ;;  %v2168_v11 = vrot.slane %v5282_v5, 7 }
 0x171   : > { %v4143_v56 = vpop.eup %4142 }
 0x172   : > { %v4145_v44 = vpop.eup %4144  ;;  %v2096_v53 = vadd.f32 1.0, %v4143_v56  ;;  %v2162_v56 = vrot.slane %v5282_v5, 1 }
 0x173   : > { %v2095_v2 = vadd.f32 1.0, %v4145_v44  ;;  %v4079_v44 = vpack.c.bf16 %v3791_v9, %v3790_v60  ;;  %v5315_v35 = vpop.eup %4146 }
 0x174   : > { %4154 = vrcp.f32 %v2096_v53  ;;  %v2404_v46 = vsub.f32 %v4518_v26, %v2162_v56  ;;  %v4149_v32 = vpop.eup %4148  ;;  %v2657_v26 = vrot.slane %v2399_v63, 4  ;;  %v2659_v56 = vrot.slane %v2400_v16, 3 }
 0x175   : > { %4156 = vrcp.f32 %v2095_v2  ;;  %v2395_v2 = vsub.f32 %v4468_v10, %v5276_v28  ;;  %4080 = vmatprep.subr.bf16.mxu0 %v4079_v44  ;;  %v2161_v10 = vrot.slane %v5276_v28, 7  ;;  %v5324_v18 = vpop.eup %4150 }
 0x176   : > { %4082 = vmatpush3.bf16.msra.mxu0 %v4079_v44  ;;  %v5329_v13 = vpop.eup %4152 }
 0x177   : > { %v2652_v4 = vsel %vm1575_vm1, %v2651_v6, %v2395_v2 }
 0x17e   : > { %v5331_v57 = vpop.eup %4154 }
 0x185   : > { %v3986_v29 = vpop.f32.mrb[6].mxu1  ;;  %v3954_v53 = vpop.f32.mrb[6].mxu0 }
 0x186   : > { %v2000_v36 = vadd.f32 %v3986_v29, %v5257_v41  ;;  %v1994_v17 = vpop.f32.mrb[7].mxu1  ;;  %v1828_v60 = vadd.f32 %v3954_v53, %v5270_v27  ;;  %v1822_v9 = vpop.f32.mrb[7].mxu0  ;;  %v2401_v53 = vsub.f32 %v4487_v25, %v2160_v12  ;;  %v2402_v25 = vsub.f32 %v4496_v33, %v2161_v10 }
 0x187   : > { %v1995_v38 = vadd.f32 %v5257_v41, %v1994_v17  ;;  %v1823_v44 = vadd.f32 %v5270_v27, %v1822_v9  ;;  %v2653_v17 = vrot.slane %v2397_v0, 6  ;;  %v2166_v0 = vrot.slane %v5282_v5, 5 }
 0x188   : > { %v3781_v29 = vmul.f32 -1.442695, %v2000_v36  ;;  %v5326_v40 = vmax.f32 %v1828_v60, 0.0  ;;  %v2661_v6 = vrot.slane %v2401_v53, 2  ;;  %v2167_v60 = vrot.slane %v5282_v5, 6 }
 0x189   : > { %v3780_v43 = vmul.f32 -1.442695, %v1995_v38  ;;  %v2654_v2 = vsel %vm1577_vm2, %v2653_v17, %v2652_v4  ;;  %v5335_v38 = vpop.eup %4156  ;;  %v2403_v12 = vsub.f32 %v4516_v23, %v5282_v5  ;;  %v2405_v33 = vsub.f32 %v4520_v30, %v2163_v7 }
 0x18a   : > { %4158 = vpow2.f32 %v3781_v29  ;;  %v2656_v36 = vsel %vm1579_vm3, %v2655_v24, %v2654_v2  ;;  %v2406_v4 = vsub.f32 %v4523_v34, %v2164_v8  ;;  %v2407_v10 = vsub.f32 %v4536_v48, %v2165_v61 }
 0x18b   : > { %4160 = vpow2.f32 %v3780_v43  ;;  %v2658_v9 = vsel %vm1581_vm4, %v2657_v26, %v2656_v36  ;;  %v2408_v16 = vsub.f32 %v4538_v49, %v2166_v0  ;;  %v2409_v29 = vsub.f32 %v4541_v52, %v2167_v60 }
 0x18c   : > { %v2660_v63 = vsel %vm1583_vm5, %v2659_v56, %v2658_v9  ;;  %v2663_v53 = vrot.slane %v2402_v25, 1  ;;  %v2410_v43 = vsub.f32 %v4551_v1, %v2168_v11  ;;  %v2665_v17 = vrot.slane %v2404_v46, 7  ;;  %v3792_v46 = vld [vmem:[%s6055_s1 + $0x30] sm:$0xff] }
 0x18d   : > { %v2667_v24 = vrot.slane %v2405_v33, 6  ;;  %v5351_v26 = vmax.f32 %v1823_v44, 0.0  ;;  %v2662_v23 = vsel %vm1585_vm6, %v2661_v6, %v2660_v63  ;;  %v2669_v30 = vrot.slane %v2406_v4, 5  ;;  %v3793_v44 = vld [vmem:[%s6055_s1 + $0x38] sm:$0xff] }
 0x18e   : > { %v2671_v7 = vrot.slane %v2407_v10, 4  ;;  %v2666_v34 = vsel %vm1575_vm1, %v2665_v17, %v2403_v12  ;;  %v2673_v8 = vrot.slane %v2408_v16, 3  ;;  %v2675_v56 = vrot.slane %v2409_v29, 2 }
 0x18f   : > { %v2169_v48 = vrot.slane %v5286_v58, 1  ;;  %v2668_v49 = vsel %vm1577_vm2, %v2667_v24, %v2666_v34  ;;  %v2170_v52 = vrot.slane %v5286_v58, 2  ;;  %v2171_v1 = vrot.slane %v5286_v58, 3 }
 0x190   : > { %v2172_v61 = vrot.slane %v5286_v58, 4  ;;  %v2664_v25 = vsel %vm1587_vm7, %v2663_v53, %v2662_v23  ;;  %v2670_v2 = vsel %vm1579_vm3, %v2669_v30, %v2668_v49  ;;  %v2677_v6 = vrot.slane %v2410_v43, 1 }
 0x191   : > { %v2173_v36 = vrot.slane %v5286_v58, 5  ;;  %v4083_v60 = vpack.c.bf16 %v3793_v44, %v3792_v46  ;;  %v2672_v11 = vsel %vm1581_vm4, %v2671_v7, %v2670_v2  ;;  %v2174_v9 = vrot.slane %v5286_v58, 6 }
 0x192   : > { %v2175_v12 = vrot.slane %v5286_v58, 7  ;;  %v2891_v4 = vmul.f32 %v4149_v32, %v2664_v25  ;;  %v2674_v63 = vsel %vm1583_vm5, %v2673_v8, %v2672_v11  ;;  %v2412_v10 = vsub.f32 %v4567_v54, %v2169_v48 }
 0x193   : > { %v2413_v16 = vsub.f32 %v4571_v62, %v2170_v52  ;;  %4084 = vmatprep.subr.bf16.mxu0 %v4083_v60  ;;  %v2676_v29 = vsel %vm1585_vm6, %v2675_v56, %v2674_v63  ;;  %v2411_v53 = vsub.f32 %v4565_v47, %v5286_v58  ;;  %v2414_v43 = vsub.f32 %v4576_v3, %v2171_v1 }
 0x194   : > { %v4159_v0 = vpop.eup %4158  ;;  %v2415_v17 = vsub.f32 %v4582_v14, %v2172_v61  ;;  %4086 = vmatpush3.bf16.msra.mxu0 %v4083_v60  ;;  %v5383_v32 = vadd.f32 %v2891_v4, %v5276_v28  ;;  %v2678_v54 = vsel %vm1587_vm7, %v2677_v6, %v2676_v29  ;;  %v2416_v62 = vsub.f32 %v4587_v21, %v2173_v36  ;;  %v6257_v4 = vld [vmem:[#allocation7_spill] sm:$0xff] }
 0x195   : > { %v4161_v33 = vpop.eup %4160  ;;  %v5380_v24 = vadd.f32 1.0, %v4159_v0  ;;  %v2892_v30 = vmul.f32 %v5315_v35, %v2678_v54  ;;  %v2417_v47 = vsub.f32 %v4594_v37, %v2174_v9  ;;  %v2418_v3 = vsub.f32 %v4604_v55, %v2175_v12  ;;  %v6256_v12 = vld [vmem:[#allocation6_spill] sm:$0xff] }
 0x196   : > { %v5387_v23 = vadd.f32 1.0, %v4161_v33  ;;  %4007 = vmatprep.mubr.msk.f32.mxu0 %vm410_vm0, %v5383_v32  ;;  %4039 = vmatprep.mubr.msk.f32.mxu1 %vm410_vm0, %v5383_v32  ;;  %v2679_v14 = vrot.slane %v2412_v10, 7  ;;  %v2681_v28 = vrot.slane %v2413_v16, 6  ;;  %v2683_v7 = vrot.slane %v2414_v43, 5 }
 0x197   : > { %v2685_v34 = vrot.slane %v2415_v17, 4  ;;  %v5397_v21 = vadd.f32 %v2892_v30, %v5282_v5  ;;  %v2687_v8 = vrot.slane %v2416_v62, 3  ;;  %v2689_v56 = vrot.slane %v2417_v47, 2 }
 0x198   : > { %v2691_v35 = vrot.slane %v2418_v3, 1  ;;  %v2680_v37 = vsel %vm1575_vm1, %v2679_v14, %v2411_v53  ;;  %v2176_v55 = vrot.slane %v5284_v51, 1  ;;  %v2177_v48 = vrot.slane %v5284_v51, 2 }
 0x199   : > { %v2178_v49 = vrot.slane %v5284_v51, 3  ;;  %4008 = vmatmul.mubr.msk.f32.vlgmr.msra.gmra.mrb[16].mxu0 %vm410_vm0, %v5397_v21  ;;  %4040 = vmatmul.mubr.msk.f32.vlgmr.msra.gmra.mrb[16].mxu1 %vm410_vm0, %v5397_v21  ;;  %v2682_v5 = vsel %vm1577_vm2, %v2681_v28, %v2680_v37  ;;  %v2179_v52 = vrot.slane %v5284_v51, 4  ;;  %v2180_v1 = vrot.slane %v5284_v51, 5 }
 0x19a   : > { %v2181_v61 = vrot.slane %v5284_v51, 6  ;;  %v2684_v46 = vsel %vm1579_vm3, %v2683_v7, %v2682_v5  ;;  %v2182_v44 = vrot.slane %v5284_v51, 7  ;;  %v2419_v25 = vsub.f32 %v4614_v22, %v5284_v51 }
 0x19b   : > { %v2420_v2 = vsub.f32 %v4617_v42, %v2176_v55  ;;  %v2686_v6 = vsel %vm1581_vm4, %v2685_v34, %v2684_v46  ;;  %v2421_v36 = vsub.f32 %v4619_v45, %v2177_v48  ;;  %v2422_v0 = vsub.f32 %v4625_v59, %v2178_v49  ;;  %v6260_v55 = vld [vmem:[#allocation10_spill] sm:$0xff]  ;;  %v6261_v49 = vld [vmem:[#allocation11_spill] sm:$0xff]  ;;  %v6263_v46 = vld [vmem:[#allocation13_spill] sm:$0xff] }
 0x19c   : > { %v2423_v60 = vsub.f32 %v4635_v19, %v2179_v52  ;;  %v2688_v11 = vsel %vm1583_vm5, %v2687_v8, %v2686_v6  ;;  %v2424_v9 = vsub.f32 %v4637_v20, %v2180_v1  ;;  %v2425_v33 = vsub.f32 %v6256_v12, %v2181_v61  ;;  %v6258_v8 = vld [vmem:[#allocation8_spill] sm:$0xff]  ;;  %v6265_v6 = vld [vmem:[#allocation15_spill] sm:$0xff] }
 0x19d   : > { %v2426_v63 = vsub.f32 %v6257_v4, %v2182_v44  ;;  %v2690_v22 = vsel %vm1585_vm6, %v2689_v56, %v2688_v11  ;;  %v2693_v10 = vrot.slane %v2420_v2, 7  ;;  %v2695_v42 = vrot.slane %v2421_v36, 6  ;;  %v6262_v1 = vld [vmem:[#allocation12_spill] sm:$0xff] }
 0x19e   : > { %v2697_v16 = vrot.slane %v2422_v0, 5  ;;  %v2692_v29 = vsel %vm1587_vm7, %v2691_v35, %v2690_v22  ;;  %v2699_v45 = vrot.slane %v2423_v60, 4  ;;  %v2701_v53 = vrot.slane %v2424_v9, 3  ;;  %v6259_v35 = vld [vmem:[#allocation9_spill] sm:$0xff] }
 0x19f   : > { %v2703_v59 = vrot.slane %v2425_v33, 2  ;;  %v2893_v19 = vmul.f32 %v5329_v13, %v2692_v29  ;;  %v2694_v43 = vsel %vm1575_vm1, %v2693_v10, %v2419_v25  ;;  %v2705_v17 = vrot.slane %v2426_v63, 1  ;;  %v6264_v25 = vld [vmem:[#allocation14_spill] sm:$0xff] }
 0x1a0   : > { %v2183_v20 = vrot.slane %v5291_v50, 1  ;;  %v2696_v54 = vsel %vm1577_vm2, %v2695_v42, %v2694_v43  ;;  %v2184_v62 = vrot.slane %v5291_v50, 2  ;;  %v2185_v30 = vrot.slane %v5291_v50, 3 }
 0x1a1   : > { %v2186_v47 = vrot.slane %v5291_v50, 4  ;;  %v5434_v3 = vadd.f32 %v2893_v19, %v5286_v58  ;;  %v2698_v14 = vsel %vm1579_vm3, %v2697_v16, %v2696_v54  ;;  %v2187_v13 = vrot.slane %v5291_v50, 5 }
 0x1a2   : > { %v2188_v28 = vrot.slane %v5291_v50, 6  ;;  %v2700_v7 = vsel %vm1581_vm4, %v2699_v45, %v2698_v14  ;;  %v2189_v34 = vrot.slane %v5291_v50, 7  ;;  %v2427_v56 = vsub.f32 %v6258_v8, %v5291_v50 }
 0x1a3   : > { %v2428_v37 = vsub.f32 %v6259_v35, %v2183_v20  ;;  %4162 = vrcp.f32 %v5380_v24  ;;  %4010 = vmatprep.mubr.msk.f32.mxu0 %vm410_vm0, %v5434_v3  ;;  %4042 = vmatprep.mubr.msk.f32.mxu1 %vm410_vm0, %v5434_v3  ;;  %v2702_v58 = vsel %vm1583_vm5, %v2701_v53, %v2700_v7  ;;  %v2429_v48 = vsub.f32 %v6260_v55, %v2184_v62  ;;  %v6266_v35 = vld [vmem:[#allocation16_spill] sm:$0xff] }
 0x1a4   : > { %v2430_v5 = vsub.f32 %v6261_v49, %v2185_v30  ;;  %v2704_v52 = vsel %vm1585_vm6, %v2703_v59, %v2702_v58  ;;  %v2431_v61 = vsub.f32 %v6262_v1, %v2186_v47  ;;  %v2432_v44 = vsub.f32 %v6263_v46, %v2187_v13  ;;  %v6267_v58 = vld [vmem:[#allocation17_spill] sm:$0xff]  ;;  %v6268_v49 = vld [vmem:[#allocation18_spill] sm:$0xff] }
 0x1a5   : > { %v2433_v24 = vsub.f32 %v6264_v25, %v2188_v28  ;;  %v2706_v2 = vsel %vm1587_vm7, %v2705_v17, %v2704_v52  ;;  %v2434_v36 = vsub.f32 %v6265_v6, %v2189_v34  ;;  %v2707_v0 = vrot.slane %v2428_v37, 7  ;;  %v6269_v52 = vld [vmem:[#allocation19_spill] sm:$0xff] }
 0x1a6   : > { %v2709_v60 = vrot.slane %v2429_v48, 6  ;;  %4164 = vrcp.f32 %v5387_v23  ;;  %v2894_v11 = vmul.f32 %v5324_v18, %v2706_v2  ;;  %v2711_v9 = vrot.slane %v2430_v5, 5  ;;  %v6273_v6 = vld [vmem:[#allocation23_spill] sm:$0xff] }
 0x1a7   : > { %v2713_v12 = vrot.slane %v2431_v61, 4  ;;  %v2708_v63 = vsel %vm1575_vm1, %v2707_v0, %v2427_v56  ;;  %v2715_v22 = vrot.slane %v2432_v44, 3  ;;  %v2717_v10 = vrot.slane %v2433_v24, 2  ;;  %v6270_v61 = vld [vmem:[#allocation20_spill] sm:$0xff]  ;;  %v6271_v44 = vld [vmem:[#allocation21_spill] sm:$0xff]  ;;  %v6272_v24 = vld [vmem:[#allocation22_spill] sm:$0xff] }
 0x1a8   : > { %v2190_v42 = vrot.slane %v5289_v15, 1  ;;  %v5464_v53 = vadd.f32 %v2894_v11, %v5284_v51  ;;  %v2710_v23 = vsel %vm1577_vm2, %v2709_v60, %v2708_v63  ;;  %v2719_v18 = vrot.slane %v2434_v36, 1 }
 0x1a9   : > { %v2712_v43 = vsel %vm1579_vm3, %v2711_v9, %v2710_v23  ;;  %v2191_v17 = vrot.slane %v5289_v15, 2  ;;  %v2192_v54 = vrot.slane %v5289_v15, 3  ;;  %v2193_v62 = vrot.slane %v5289_v15, 4 }
 0x1aa   : > { %v3989_v33 = vpop.f32.mrb[8].mxu1  ;;  %v3957_v4 = vpop.f32.mrb[8].mxu0  ;;  %4011 = vmatmul.mubr.msk.f32.gmra.mrb[18].mxu0 %vm410_vm0, %v5464_v53  ;;  %4043 = vmatmul.mubr.msk.f32.gmra.mrb[18].mxu1 %vm410_vm0, %v5464_v53  ;;  %v2714_v51 = vsel %vm1581_vm4, %v2713_v12, %v2712_v43  ;;  %v2194_v13 = vrot.slane %v5289_v15, 5  ;;  %v2195_v7 = vrot.slane %v5289_v15, 6  ;;  %v2196_v34 = vrot.slane %v5289_v15, 7 }
 0x1ab   : > { %v2010_v16 = vadd.f32 %v3989_v33, %v5257_v41  ;;  %v2004_v29 = vpop.f32.mrb[9].mxu1  ;;  %v1832_v45 = vpop.f32.mrb[9].mxu0  ;;  %v5469_v19 = vadd.f32 %v3957_v4, %v5270_v27  ;;  %v2716_v14 = vsel %vm1583_vm5, %v2715_v22, %v2714_v51  ;;  %v2435_v37 = vsub.f32 %v6266_v35, %v5289_v15  ;;  %v6275_v51 = vld [vmem:[#allocation25_spill] sm:$0xff] }
 0x1ac   : > { %v2005_v59 = vadd.f32 %v5257_v41, %v2004_v29  ;;  %v1833_v47 = vadd.f32 %v5270_v27, %v1832_v45  ;;  %v2718_v28 = vsel %vm1585_vm6, %v2717_v10, %v2716_v14  ;;  %v2436_v55 = vsub.f32 %v6267_v58, %v2190_v42 }
 0x1ad   : > { %v3783_v20 = vmul.f32 -1.442695, %v2010_v16  ;;  %v5486_v8 = vpop.eup %4162  ;;  %v2720_v56 = vsel %vm1587_vm7, %v2719_v18, %v2718_v28  ;;  %v2437_v5 = vsub.f32 %v6268_v49, %v2191_v17  ;;  %v2438_v1 = vsub.f32 %v6269_v52, %v2192_v54  ;;  %v6274_v17 = vld [vmem:[#allocation24_spill] sm:$0xff]  ;;  %v6281_v49 = vld [vmem:[#allocation31_spill] sm:$0xff] }
 0x1ae   : > { %v3782_v30 = vmul.f32 -1.442695, %v2005_v59  ;;  %v2895_v48 = vmul.f32 %v5335_v38, %v2720_v56  ;;  %v2439_v46 = vsub.f32 %v6270_v61, %v2193_v62  ;;  %v2440_v25 = vsub.f32 %v6271_v44, %v2194_v13  ;;  %v6277_v13 = vld [vmem:[#allocation27_spill] sm:$0xff] }
 0x1af   : > { %4166 = vpow2.f32 %v3783_v20  ;;  %v2441_v2 = vsub.f32 %v6272_v24, %v2195_v7  ;;  %v2442_v36 = vsub.f32 %v6273_v6, %v2196_v34  ;;  %v2721_v0 = vrot.slane %v2436_v55, 7  ;;  %v6278_v7 = vld [vmem:[#allocation28_spill] sm:$0xff]  ;;  %v6280_v55 = vld [vmem:[#allocation30_spill] sm:$0xff] }
 0x1b0   : > { %4168 = vpow2.f32 %v3782_v30  ;;  %v5499_v60 = vpop.eup %4164  ;;  %v5502_v11 = vadd.f32 %v2895_v48, %v5291_v50  ;;  %v2723_v9 = vrot.slane %v2437_v5, 6  ;;  %v2725_v38 = vrot.slane %v2438_v1, 5  ;;  %v6276_v30 = vld [vmem:[#allocation26_spill] sm:$0xff] }
 0x1b1   : > { %v2727_v12 = vrot.slane %v2439_v46, 4  ;;  %v2722_v33 = vsel %vm1575_vm1, %v2721_v0, %v2435_v37  ;;  %v2729_v4 = vrot.slane %v2440_v25, 3  ;;  %v2731_v63 = vrot.slane %v2441_v2, 2  ;;  %v6279_v37 = vld [vmem:[#allocation29_spill] sm:$0xff] }
 0x1b2   : > { %v2733_v22 = vrot.slane %v2442_v36, 1  ;;  %4013 = vmatprep.mubr.msk.f32.mxu0 %vm410_vm0, %v5502_v11  ;;  %4045 = vmatprep.mubr.msk.f32.mxu1 %vm410_vm0, %v5502_v11  ;;  %v2724_v10 = vsel %vm1577_vm2, %v2723_v9, %v2722_v33  ;;  %v2197_v42 = vrot.slane %v5351_v26, 1  ;;  %v2198_v50 = vrot.slane %v5351_v26, 2 }
 0x1b3   : > { %v2199_v16 = vrot.slane %v5351_v26, 3  ;;  %v2726_v29 = vsel %vm1579_vm3, %v2725_v38, %v2724_v10  ;;  %v2200_v45 = vrot.slane %v5351_v26, 4  ;;  %v2201_v23 = vrot.slane %v5351_v26, 5 }
 0x1b4   : > { %v2202_v18 = vrot.slane %v5351_v26, 6  ;;  %v2728_v59 = vsel %vm1581_vm4, %v2727_v12, %v2726_v29  ;;  %v2203_v43 = vrot.slane %v5351_v26, 7  ;;  %v2443_v20 = vsub.f32 %v6274_v17, %v5351_v26  ;;  %v6284_v17 = vld [vmem:[#allocation34_spill] sm:$0xff] }
 0x1b5   : > { %v2444_v54 = vsub.f32 %v6275_v51, %v2197_v42  ;;  %v2730_v62 = vsel %vm1583_vm5, %v2729_v4, %v2728_v59  ;;  %v2445_v14 = vsub.f32 %v6276_v30, %v2198_v50  ;;  %v2446_v28 = vsub.f32 %v6277_v13, %v2199_v16  ;;  %v6285_v51 = vld [vmem:[#allocation35_spill] sm:$0xff]  ;;  %v6287_v13 = vld [vmem:[#allocation37_spill] sm:$0xff] }
 0x1b6   : > { %v2447_v34 = vsub.f32 %v6278_v7, %v2200_v45  ;;  %v2732_v35 = vsel %vm1585_vm6, %v2731_v63, %v2730_v62  ;;  %v2448_v58 = vsub.f32 %v6279_v37, %v2201_v23  ;;  %v2449_v48 = vsub.f32 %v6280_v55, %v2202_v18  ;;  %v6282_v45 = vld [vmem:[#allocation32_spill] sm:$0xff]  ;;  %v6283_v18 = vld [vmem:[#allocation33_spill] sm:$0xff]  ;;  %v6288_v7 = vld [vmem:[#allocation38_spill] sm:$0xff] }
 0x1b7   : > { %v2450_v5 = vsub.f32 %v6281_v49, %v2203_v43  ;;  %v5530_v1 = vmax.f32 %v1833_v47, 0.0  ;;  %v2734_v61 = vsel %vm1587_vm7, %v2733_v22, %v2732_v35  ;;  %v2735_v46 = vrot.slane %v2444_v54, 7  ;;  %v6286_v62 = vld [vmem:[#allocation36_spill] sm:$0xff] }
 0x1b8   : > { %v2737_v44 = vrot.slane %v2445_v14, 6  ;;  %v2896_v24 = vmul.f32 %v5331_v57, %v2734_v61  ;;  %v2739_v2 = vrot.slane %v2446_v28, 5  ;;  %v2741_v6 = vrot.slane %v2447_v34, 4 }
 0x1b9   : > { %v4167_v56 = vpop.eup %4166  ;;  %v2736_v0 = vsel %vm1575_vm1, %v2735_v46, %v2443_v20  ;;  %v2743_v9 = vrot.slane %v2448_v58, 3  ;;  %v2745_v38 = vrot.slane %v2449_v48, 2  ;;  %v2747_v33 = vrot.slane %v2450_v5, 1 }
 0x1ba   : > { %v4169_v52 = vpop.eup %4168  ;;  %v5534_v36 = vadd.f32 1.0, %v4167_v56  ;;  %v5538_v12 = vadd.f32 %v2896_v24, %v5289_v15  ;;  %v2738_v47 = vsel %vm1577_vm2, %v2737_v44, %v2736_v0  ;;  %v2204_v63 = vrot.slane %v5326_v40, 1  ;;  %v6289_v56 = vld [vmem:[#allocation39_spill] sm:$0xff] }
 0x1bb   : > { %v2099_v25 = vadd.f32 1.0, %v4169_v52  ;;  %v2740_v4 = vsel %vm1579_vm3, %v2739_v2, %v2738_v47  ;;  %v2205_v57 = vrot.slane %v5326_v40, 2  ;;  %v2206_v22 = vrot.slane %v5326_v40, 3 }
 0x1bc   : > { %4014 = vmatmul.mubr.msk.f32.gmra.mrb[20].mxu0 %vm410_vm0, %v5538_v12  ;;  %4046 = vmatmul.mubr.msk.f32.gmra.mrb[20].mxu1 %vm410_vm0, %v5538_v12  ;;  %v2742_v15 = vsel %vm1581_vm4, %v2741_v6, %v2740_v4  ;;  %v2207_v10 = vrot.slane %v5326_v40, 4  ;;  %v2208_v42 = vrot.slane %v5326_v40, 5  ;;  %v2209_v50 = vrot.slane %v5326_v40, 6 }
 0x1bd   : > { %4170 = vrcp.f32 %v2099_v25  ;;  %v2744_v16 = vsel %vm1583_vm5, %v2743_v9, %v2742_v15  ;;  %v2210_v29 = vrot.slane %v5326_v40, 7  ;;  %v2451_v23 = vsub.f32 %v6282_v45, %v5326_v40  ;;  %v6292_v15 = vld [vmem:[#allocation42_spill] sm:$0xff] }
 0x1be   : > { %v2452_v59 = vsub.f32 %v6283_v18, %v2204_v63  ;;  %v2746_v43 = vsel %vm1585_vm6, %v2745_v38, %v2744_v16  ;;  %v2453_v20 = vsub.f32 %v6284_v17, %v2205_v57  ;;  %v2454_v54 = vsub.f32 %v6285_v51, %v2206_v22  ;;  %v6291_v57 = vld [vmem:[#allocation41_spill] sm:$0xff] }
 0x1bf   : > { %v2455_v30 = vsub.f32 %v6286_v62, %v2207_v10  ;;  %v2748_v14 = vsel %vm1587_vm7, %v2747_v33, %v2746_v43  ;;  %v2456_v28 = vsub.f32 %v6287_v13, %v2208_v42  ;;  %v2457_v34 = vsub.f32 %v6288_v7, %v2209_v50  ;;  %v6290_v33 = vld [vmem:[#allocation40_spill] sm:$0xff]  ;;  %v6293_v42 = vld [vmem:[#allocation43_spill] sm:$0xff] }
 0x1c0   : > { %v2458_v35 = vsub.f32 %v6289_v56, %v2210_v29  ;;  %v2897_v37 = vmul.f32 %v5499_v60, %v2748_v14  ;;  %v2749_v58 = vrot.slane %v2452_v59, 7  ;;  %v2751_v55 = vrot.slane %v2453_v20, 6  ;;  %v6294_v29 = vld [vmem:[#allocation44_spill] sm:$0xff]  ;;  %v6296_v59 = vld [vmem:[#allocation46_spill] sm:$0xff]  ;;  %v6297_v20 = vld [vmem:[#allocation47_spill] sm:$0xff] }
 0x1c1   : > { %v2753_v48 = vrot.slane %v2454_v54, 5  ;;  %v2755_v49 = vrot.slane %v2455_v30, 4  ;;  %v2757_v5 = vrot.slane %v2456_v28, 3  ;;  %v2759_v52 = vrot.slane %v2457_v34, 2 }
 0x1c2   : > { %v2761_v61 = vrot.slane %v2458_v35, 1  ;;  %v5568_v46 = vadd.f32 %v2897_v37, %v5351_v26  ;;  %v2750_v44 = vsel %vm1575_vm1, %v2749_v58, %v2451_v23  ;;  %v2211_v25 = vrot.slane %v5530_v1, 1  ;;  %v6295_v23 = vld [vmem:[#allocation45_spill] sm:$0xff] }
 0x1c3   : > { %v2212_v24 = vrot.slane %v5530_v1, 2  ;;  %v2752_v2 = vsel %vm1577_vm2, %v2751_v55, %v2750_v44  ;;  %v2213_v60 = vrot.slane %v5530_v1, 3  ;;  %v2214_v6 = vrot.slane %v5530_v1, 4 }
 0x1c4   : > { %v2215_v0 = vrot.slane %v5530_v1, 5  ;;  %4016 = vmatprep.mubr.msk.f32.mxu0 %vm410_vm0, %v5568_v46  ;;  %4048 = vmatprep.mubr.msk.f32.mxu1 %vm410_vm0, %v5568_v46  ;;  %v2754_v26 = vsel %vm1579_vm3, %v2753_v48, %v2752_v2  ;;  %v2216_v38 = vrot.slane %v5530_v1, 6  ;;  %v2217_v47 = vrot.slane %v5530_v1, 7 }
 0x1c5   : > { %v2459_v4 = vsub.f32 %v6290_v33, %v5530_v1  ;;  %v2756_v63 = vsel %vm1581_vm4, %v2755_v49, %v2754_v26  ;;  %v2460_v22 = vsub.f32 %v6291_v57, %v2211_v25  ;;  %v2461_v10 = vsub.f32 %v6292_v15, %v2212_v24  ;;  %v6298_v57 = vld [vmem:[#allocation48_spill] sm:$0xff]  ;;  %v6299_v15 = vld [vmem:[#allocation49_spill] sm:$0xff] }
 0x1c6   : > { %v2462_v50 = vsub.f32 %v6293_v42, %v2213_v60  ;;  %v2758_v16 = vsel %vm1583_vm5, %v2757_v5, %v2756_v63  ;;  %v2463_v45 = vsub.f32 %v6294_v29, %v2214_v6  ;;  %v2464_v18 = vsub.f32 %v6295_v23, %v2215_v0  ;;  %v6300_v42 = vld [vmem:[#allocation50_spill] sm:$0xff] }
 0x1c7   : > { %v4171_v9 = vpop.eup %4170  ;;  %v2465_v43 = vsub.f32 %v6296_v59, %v2216_v38  ;;  %v2760_v17 = vsel %vm1585_vm6, %v2759_v52, %v2758_v16  ;;  %v2466_v51 = vsub.f32 %v6297_v20, %v2217_v47  ;;  %v2763_v54 = vrot.slane %v2460_v22, 7  ;;  %v6301_v16 = vld [vmem:[#allocation51_spill] sm:$0xff] }
 0x1c8   : > { %v2765_v62 = vrot.slane %v2461_v10, 6  ;;  %v5597_v30 = vmax.f32 %v5469_v19, 0.0  ;;  %v2762_v14 = vsel %vm1587_vm7, %v2761_v61, %v2760_v17  ;;  %v2767_v13 = vrot.slane %v2462_v50, 5 }
 0x1c9   : > { %v2769_v28 = vrot.slane %v2463_v45, 4  ;;  %4172 = vrcp.f32 %v5534_v36  ;;  %v2898_v56 = vmul.f32 %v5486_v8, %v2762_v14  ;;  %v2764_v35 = vsel %vm1575_vm1, %v2763_v54, %v2459_v4  ;;  %v6302_v45 = vld [vmem:[#allocation52_spill] sm:$0xff] }
 0x1ca   : > { %v2771_v37 = vrot.slane %v2464_v18, 3  ;;  %v2766_v19 = vsel %vm1577_vm2, %v2765_v62, %v2764_v35  ;;  %v2773_v49 = vrot.slane %v2465_v43, 2  ;;  %v2775_v5 = vrot.slane %v2466_v51, 1  ;;  %v6303_v18 = vld [vmem:[#allocation53_spill] sm:$0xff]  ;;  %v6304_v43 = vld [vmem:[#allocation54_spill] sm:$0xff]  ;;  %v6305_v51 = vld [vmem:[#allocation55_spill] sm:$0xff] }
 0x1cb   : > { %v5608_v36 = vadd.f32 %v2898_v56, %v5326_v40  ;;  %v2768_v8 = vsel %vm1579_vm3, %v2767_v13, %v2766_v19  ;;  %v2218_v24 = vrot.slane %v5597_v30, 1  ;;  %v2219_v2 = vrot.slane %v5597_v30, 2 }
 0x1cc   : > { %v3992_v7 = vpop.f32.mrb[10].mxu1  ;;  %v3960_v34 = vpop.f32.mrb[10].mxu0  ;;  %v2770_v25 = vsel %vm1581_vm4, %v2769_v28, %v2768_v8  ;;  %v2221_v26 = vrot.slane %v5597_v30, 4  ;;  %v2222_v38 = vrot.slane %v5597_v30, 5  ;;  %v2223_v33 = vrot.slane %v5597_v30, 6 }
 0x1cd   : > { %v2020_v58 = vadd.f32 %v3992_v7, %v5257_v41  ;;  %v2014_v55 = vpop.f32.mrb[11].mxu1  ;;  %v1842_v48 = vpop.f32.mrb[11].mxu0  ;;  %4017 = vmatmul.mubr.msk.f32.gmra.mrb[22].mxu0 %vm410_vm0, %v5608_v36  ;;  %4049 = vmatmul.mubr.msk.f32.gmra.mrb[22].mxu1 %vm410_vm0, %v5608_v36  ;;  %v2772_v40 = vsel %vm1583_vm5, %v2771_v37, %v2770_v25  ;;  %v2224_v4 = vrot.slane %v5597_v30, 7  ;;  %v2467_v22 = vsub.f32 %v6298_v57, %v5597_v30  ;;  %v6307_v25 = vld [vmem:[#allocation57_spill] sm:$0xff] }
 0x1ce   : > { %v2015_v52 = vadd.f32 %v5257_v41, %v2014_v55  ;;  %v1843_v61 = vadd.f32 %v5270_v27, %v1842_v48  ;;  %v2220_v41 = vrot.slane %v5597_v30, 3  ;;  %v2774_v0 = vsel %vm1585_vm6, %v2773_v49, %v2772_v40  ;;  %v6309_v40 = vld [vmem:[#allocation59_spill] sm:$0xff] }
 0x1cf   : > { %v3785_v44 = vmul.f32 -1.442695, %v2020_v58  ;;  %v2776_v47 = vsel %vm1587_vm7, %v2775_v5, %v2774_v0  ;;  %v2468_v10 = vsub.f32 %v6299_v15, %v2218_v24  ;;  %v2469_v50 = vsub.f32 %v6300_v42, %v2219_v2  ;;  %v6308_v2 = vld [vmem:[#allocation58_spill] sm:$0xff] }
 0x1d0   : > { %v3784_v60 = vmul.f32 -1.442695, %v2015_v52  ;;  %v5614_v6 = vmax.f32 %v1843_v61, 0.0  ;;  %v2899_v63 = vmul.f32 %v4171_v9, %v2776_v47  ;;  %v2470_v29 = vsub.f32 %v6301_v16, %v2220_v41  ;;  %v6306_v61 = vld [vmem:[#allocation56_spill] sm:$0xff] }
 0x1d1   : > { %4174 = vpow2.f32 %v3785_v44  ;;  %v2471_v23 = vsub.f32 %v6302_v45, %v2221_v26  ;;  %v2472_v59 = vsub.f32 %v6303_v18, %v2222_v38  ;;  %v2473_v17 = vsub.f32 %v6304_v43, %v2223_v33  ;;  %v6310_v47 = vld [vmem:[#allocation60_spill] sm:$0xff]  ;;  %v6312_v18 = vld [vmem:[#allocation62_spill] sm:$0xff] }
 0x1d2   : > { %4176 = vpow2.f32 %v3784_v60  ;;  %v5637_v20 = vadd.f32 %v2899_v63, %v5530_v1  ;;  %v2474_v9 = vsub.f32 %v6305_v51, %v2224_v4  ;;  %v2777_v54 = vrot.slane %v2468_v10, 7  ;;  %v6311_v4 = vld [vmem:[#allocation61_spill] sm:$0xff]  ;;  %v6313_v51 = vld [vmem:[#allocation63_spill] sm:$0xff] }
 0x1d3   : > { %v2779_v62 = vrot.slane %v2469_v50, 6  ;;  %v4173_v14 = vpop.eup %4172  ;;  %v1848_v13 = vadd.f32 %v3960_v34, %v5270_v27  ;;  %v2781_v28 = vrot.slane %v2470_v29, 5  ;;  %v2783_v7 = vrot.slane %v2471_v23, 4 }
 0x1d4   : > { %v2785_v56 = vrot.slane %v2472_v59, 3  ;;  %4019 = vmatprep.mubr.msk.f32.mxu0 %vm410_vm0, %v5637_v20  ;;  %4051 = vmatprep.mubr.msk.f32.mxu1 %vm410_vm0, %v5637_v20  ;;  %v2778_v35 = vsel %vm1575_vm1, %v2777_v54, %v2467_v22  ;;  %v2787_v1 = vrot.slane %v2473_v17, 2  ;;  %v2225_v37 = vrot.slane %v5614_v6, 1 }
 0x1d5   : > { %v2226_v58 = vrot.slane %v5614_v6, 2  ;;  %v2780_v55 = vsel %vm1577_vm2, %v2779_v62, %v2778_v35  ;;  %v2227_v34 = vrot.slane %v5614_v6, 3  ;;  %v2228_v48 = vrot.slane %v5614_v6, 4 }
 0x1d6   : > { %v2229_v19 = vrot.slane %v5614_v6, 5  ;;  %v2782_v49 = vsel %vm1579_vm3, %v2781_v28, %v2780_v55  ;;  %v2789_v5 = vrot.slane %v2474_v9, 1  ;;  %v2230_v52 = vrot.slane %v5614_v6, 6 }
 0x1d7   : > { %v2475_v8 = vsub.f32 %v6306_v61, %v5614_v6  ;;  %v2784_v44 = vsel %vm1581_vm4, %v2783_v7, %v2782_v49  ;;  %v2476_v24 = vsub.f32 %v6307_v25, %v2225_v37  ;;  %v2477_v60 = vsub.f32 %v6308_v2, %v2226_v58  ;;  %v6315_v49 = vld [vmem:[#allocation65_spill] sm:$0xff] }
 0x1d8   : > { %v2478_v41 = vsub.f32 %v6309_v40, %v2227_v34  ;;  %v2786_v26 = vsel %vm1583_vm5, %v2785_v56, %v2784_v44  ;;  %v2231_v38 = vrot.slane %v5614_v6, 7  ;;  %v2479_v33 = vsub.f32 %v6310_v47, %v2228_v48  ;;  %v6314_v48 = vld [vmem:[#allocation64_spill] sm:$0xff]  ;;  %v6317_v44 = vld [vmem:[#allocation67_spill] sm:$0xff] }
 0x1d9   : > { %v2480_v63 = vsub.f32 %v6311_v4, %v2229_v19  ;;  %v1882_v15 = vmax.f32 %v1848_v13, 0.0  ;;  %v2788_v10 = vsel %vm1585_vm6, %v2787_v1, %v2786_v26  ;;  %v2791_v42 = vrot.slane %v2476_v24, 7  ;;  %v6318_v24 = vld [vmem:[#allocation68_spill] sm:$0xff]  ;;  %v6321_v26 = vld [vmem:[#allocation71_spill] sm:$0xff] }
 0x1da   : > { %v2790_v16 = vsel %vm1587_vm7, %v2789_v5, %v2788_v10  ;;  %v2793_v29 = vrot.slane %v2477_v60, 6  ;;  %v2795_v45 = vrot.slane %v2478_v41, 5  ;;  %v2481_v59 = vsub.f32 %v6312_v18, %v2230_v52  ;;  %v6316_v52 = vld [vmem:[#allocation66_spill] sm:$0xff]  ;;  %v6319_v60 = vld [vmem:[#allocation69_spill] sm:$0xff] }
 0x1db   : > { %v4175_v0 = vpop.eup %4174  ;;  %v2900_v23 = vmul.f32 %v4173_v14, %v2790_v16  ;;  %v2792_v43 = vsel %vm1575_vm1, %v2791_v42, %v2475_v8  ;;  %v2797_v17 = vrot.slane %v2479_v33, 4  ;;  %v2482_v9 = vsub.f32 %v6313_v51, %v2231_v38  ;;  %v6320_v41 = vld [vmem:[#allocation70_spill] sm:$0xff] }
 0x1dc   : > { %v4177_v57 = vpop.eup %4176  ;;  %v2102_v22 = vadd.f32 1.0, %v4175_v0  ;;  %v2794_v54 = vsel %vm1577_vm2, %v2793_v29, %v2792_v43  ;;  %v2799_v62 = vrot.slane %v2480_v63, 3  ;;  %v2232_v7 = vrot.slane %v1882_v15, 1 }
 0x1dd   : > { %v2101_v50 = vadd.f32 1.0, %v4177_v57  ;;  %v5671_v13 = vadd.f32 %v2900_v23, %v5597_v30  ;;  %v2796_v28 = vsel %vm1579_vm3, %v2795_v45, %v2794_v54  ;;  %v2233_v56 = vrot.slane %v1882_v15, 2 }
 0x1de   : > { %v2798_v14 = vsel %vm1581_vm4, %v2797_v17, %v2796_v28  ;;  %v2234_v35 = vrot.slane %v1882_v15, 3  ;;  %v2235_v1 = vrot.slane %v1882_v15, 4  ;;  %v2801_v37 = vrot.slane %v2481_v59, 2 }
 0x1df   : > { %4178 = vrcp.f32 %v2101_v50  ;;  %4020 = vmatmul.mubr.msk.f32.gmra.mrb[24].mxu0 %vm410_vm0, %v5671_v13  ;;  %4052 = vmatmul.mubr.msk.f32.gmra.mrb[24].mxu1 %vm410_vm0, %v5671_v13  ;;  %v2236_v58 = vrot.slane %v1882_v15, 5  ;;  %v2237_v55 = vrot.slane %v1882_v15, 6  ;;  %v2238_v34 = vrot.slane %v1882_v15, 7 }
 0x1e0   : > { %4180 = vrcp.f32 %v2102_v22  ;;  %v2800_v30 = vsel %vm1583_vm5, %v2799_v62, %v2798_v14  ;;  %v2483_v19 = vsub.f32 %v6314_v48, %v1882_v15  ;;  %v2484_v5 = vsub.f32 %v6315_v49, %v2232_v7 }
 0x1e1   : > { %v2485_v61 = vsub.f32 %v6316_v52, %v2233_v56  ;;  %v2803_v8 = vrot.slane %v2482_v9, 1  ;;  %v2486_v25 = vsub.f32 %v6317_v44, %v2234_v35  ;;  %v2487_v2 = vsub.f32 %v6318_v24, %v2235_v1  ;;  %v6323_v44 = vld [vmem:[#allocation73_spill] sm:$0xff]  ;;  %v6324_v24 = vld [vmem:[#allocation74_spill] sm:$0xff] }
 0x1e2   : > { %v2488_v40 = vsub.f32 %v6319_v60, %v2236_v58  ;;  %v2489_v0 = vsub.f32 %v6320_v41, %v2237_v55  ;;  %v2490_v38 = vsub.f32 %v6321_v26, %v2238_v34  ;;  %v2805_v47 = vrot.slane %v2484_v5, 7  ;;  %v5721_v58 = vld [vmem:[%s6057_s3] ss:$0 sm:$0xff]  ;;  %v6325_v60 = vld [vmem:[#allocation75_spill] sm:$0xff] }
 0x1e3   : > { %v2807_v33 = vrot.slane %v2485_v61, 6  ;;  %v2802_v4 = vsel %vm1585_vm6, %v2801_v37, %v2800_v30  ;;  %v2809_v63 = vrot.slane %v2486_v25, 5  ;;  %v2811_v57 = vrot.slane %v2487_v2, 4  ;;  %v6322_v61 = vld [vmem:[#allocation72_spill] sm:$0xff] }
 0x1e4   : > { %v2806_v22 = vsel %vm1575_vm1, %v2805_v47, %v2483_v19  ;;  %v2813_v10 = vrot.slane %v2488_v40, 3  ;;  %v2815_v50 = vrot.slane %v2489_v0, 2  ;;  %v2804_v29 = vsel %vm1587_vm7, %v2803_v8, %v2802_v4 }
 0x1e5   : > { %v2808_v42 = vsel %vm1577_vm2, %v2807_v33, %v2806_v22  ;;  %v2817_v23 = vrot.slane %v2490_v38, 1 }
 0x1e6   : > { %v2810_v45 = vsel %vm1579_vm3, %v2809_v63, %v2808_v42 }
 0x1e7   : > { %v2812_v43 = vsel %vm1581_vm4, %v2811_v57, %v2810_v45  ;;  %v6326_v57 = vld [vmem:[#allocation76_spill] sm:$0xff] }
 0x1e8   : > { %v2814_v17 = vsel %vm1583_vm5, %v2813_v10, %v2812_v43  ;;  %v6327_v45 = vld [vmem:[#allocation80_spill] sm:$0xff]  ;;  %v6329_v43 = vld [vmem:[#allocation82_spill] sm:$0xff] }
 0x1e9   : > { %v4179_v16 = vpop.eup %4178  ;;  %v2816_v9 = vsel %vm1585_vm6, %v2815_v50, %v2814_v17 }
 0x1ea   : > { %v4181_v18 = vpop.eup %4180  ;;  %v2901_v59 = vmul.f32 %v4179_v16, %v2804_v29  ;;  %v2818_v54 = vsel %vm1587_vm7, %v2817_v23, %v2816_v9 }
 0x1eb   : > { %v2902_v62 = vmul.f32 %v4181_v18, %v2818_v54  ;;  %v6328_v18 = vld [vmem:[#allocation81_spill] sm:$0xff]  ;;  %v6330_v54 = vld [vmem:[#allocation83_spill] sm:$0xff] }
 0x1ec   : > { %v5696_v51 = vadd.f32 %v2901_v59, %v5614_v6  ;;  %v5709_v6 = vld [vmem:[%s6058_s4] ss:$0 sm:$0xff] }
 0x1ed   : > { %v5704_v28 = vadd.f32 %v2902_v62, %v1882_v15 }
 0x1ee   : > { %4022 = vmatprep.mubr.msk.f32.mxu0 %vm410_vm0, %v5696_v51  ;;  %4054 = vmatprep.mubr.msk.f32.mxu1 %vm410_vm0, %v5696_v51 }
 0x1ef   : > { %4023 = vmatmul.mubr.msk.f32.gmra.mrb[26].mxu0 %vm410_vm0, %v5704_v28  ;;  %4055 = vmatmul.mubr.msk.f32.gmra.mrb[26].mxu1 %vm410_vm0, %v5704_v28 }
 0x1f1   : > { %v3995_v7 = vpop.f32.mrb[12].mxu1  ;;  %v3963_v14 = vpop.f32.mrb[12].mxu0 }
 0x1f2   : > { %v2030_v56 = vadd.f32 %v5709_v6, %v3995_v7  ;;  %v2024_v35 = vpop.f32.mrb[13].mxu1  ;;  %v1858_v1 = vadd.f32 %v3963_v14, %v5270_v27  ;;  %v1852_v37 = vpop.f32.mrb[13].mxu0  ;;  %v6331_v7 = vld [vmem:[#allocation84_spill] sm:$0xff] }
 0x1f3   : > { %v2025_v15 = vadd.f32 %v5709_v6, %v2024_v35  ;;  %v1853_v55 = vadd.f32 %v5721_v58, %v1852_v37  ;;  %v6333_v37 = vld [vmem:[#allocation77_spill] sm:$0xff] }
 0x1f4   : > { %v3787_v34 = vmul.f32 -1.442695, %v2030_v56  ;;  %v5726_v27 = vmax.f32 %v1858_v1, 0.0  ;;  %v6332_v56 = vld [vmem:[#allocation85_spill] sm:$0xff] }
 0x1f5   : > { %v3786_v30 = vmul.f32 -1.442695, %v2025_v15  ;;  %v5724_v48 = vmax.f32 %v1853_v55, 0.0 }
 0x1f6   : > { %4182 = vpow2.f32 %v3787_v34  ;;  %v2246_v41 = vrot.slane %v5726_v27, 1  ;;  %v2247_v0 = vrot.slane %v5726_v27, 2  ;;  %v2248_v47 = vrot.slane %v5726_v27, 3 }
 0x1f7   : > { %4184 = vpow2.f32 %v3786_v30  ;;  %v2239_v19 = vrot.slane %v5724_v48, 1  ;;  %v2240_v49 = vrot.slane %v5724_v48, 2  ;;  %v2241_v5 = vrot.slane %v5724_v48, 3 }
 0x1f8   : > { %v2242_v52 = vrot.slane %v5724_v48, 4  ;;  %v2491_v8 = vsub.f32 %v6322_v61, %v5724_v48  ;;  %v2249_v33 = vrot.slane %v5726_v27, 4  ;;  %v2243_v4 = vrot.slane %v5724_v48, 5 }
 0x1f9   : > { %v2492_v25 = vsub.f32 %v6323_v44, %v2239_v19  ;;  %v2493_v2 = vsub.f32 %v6324_v24, %v2240_v49  ;;  %v2494_v40 = vsub.f32 %v6325_v60, %v2241_v5  ;;  %v2244_v63 = vrot.slane %v5724_v48, 6  ;;  %v6334_v44 = vld [vmem:[#allocation86_spill] sm:$0xff] }
 0x1fa   : > { %v2495_v22 = vsub.f32 %v6326_v57, %v2242_v52  ;;  %v2250_v50 = vrot.slane %v5726_v27, 5  ;;  %v2251_v16 = vrot.slane %v5726_v27, 6  ;;  %v2499_v23 = vsub.f32 %v6327_v45, %v5726_v27  ;;  %v6335_v60 = vld [vmem:[#allocation78_spill] sm:$0xff] }
 0x1fb   : > { %v2819_v26 = vrot.slane %v2492_v25, 7  ;;  %v2821_v38 = vrot.slane %v2493_v2, 6  ;;  %v2823_v42 = vrot.slane %v2494_v40, 5  ;;  %v2500_v59 = vsub.f32 %v6328_v18, %v2246_v41 }
 0x1fc   : > { %v2501_v17 = vsub.f32 %v6329_v43, %v2247_v0  ;;  %v2245_v9 = vrot.slane %v5724_v48, 7  ;;  %v2502_v62 = vsub.f32 %v6330_v54, %v2248_v47  ;;  %v2503_v14 = vsub.f32 %v6331_v7, %v2249_v33  ;;  %v6336_v33 = vld [vmem:[#allocation87_spill] sm:$0xff] }
 0x1fd   : > { %v2820_v10 = vsel %vm1575_vm1, %v2819_v26, %v2491_v8  ;;  %v2504_v35 = vsub.f32 %v6332_v56, %v2250_v50  ;;  %v2496_v15 = vsub.f32 %v6333_v37, %v2243_v4  ;;  %v2825_v55 = vrot.slane %v2495_v22, 4  ;;  %v6337_v22 = vld [vmem:[#allocation79_spill] sm:$0xff] }
 0x1fe   : > { %v2822_v29 = vsel %vm1577_vm2, %v2821_v38, %v2820_v10  ;;  %v2252_v34 = vrot.slane %v5726_v27, 7  ;;  %v2833_v30 = vrot.slane %v2500_v59, 7  ;;  %v2835_v52 = vrot.slane %v2501_v17, 6 }
 0x1ff   : > { %v2824_v5 = vsel %vm1579_vm3, %v2823_v42, %v2822_v29  ;;  %v2837_v61 = vrot.slane %v2502_v62, 5  ;;  %v2505_v25 = vsub.f32 %v6334_v44, %v2251_v16  ;;  %v2839_v2 = vrot.slane %v2503_v14, 4 }
 0x200   : > { %v4183_v1 = vpop.eup %4182  ;;  %v2834_v24 = vsel %vm1575_vm1, %v2833_v30, %v2499_v23  ;;  %v2497_v40 = vsub.f32 %v6335_v60, %v2244_v63  ;;  %v2841_v0 = vrot.slane %v2504_v35, 3  ;;  %v2827_v26 = vrot.slane %v2496_v15, 3  ;;  %v6341_v60 = vld [vmem:[#allocation91_spill] sm:$0xff] }
 0x201   : > { %v4185_v19 = vpop.eup %4184  ;;  %v2104_v49 = vadd.f32 1.0, %v4183_v1  ;;  %v2836_v41 = vsel %vm1577_vm2, %v2835_v52, %v2834_v24  ;;  %v2826_v47 = vsel %vm1581_vm4, %v2825_v55, %v2824_v5  ;;  %v2506_v4 = vsub.f32 %v6336_v33, %v2252_v34  ;;  %v6340_v24 = vld [vmem:[#allocation90_spill] sm:$0xff] }
 0x202   : > { %v2103_v8 = vadd.f32 1.0, %v4185_v19  ;;  %v2838_v38 = vsel %vm1579_vm3, %v2837_v61, %v2836_v41  ;;  %v2498_v10 = vsub.f32 %v6337_v22, %v2245_v9  ;;  %v2843_v42 = vrot.slane %v2505_v25, 2  ;;  %v6342_v22 = vld [vmem:[#allocation92_spill] sm:$0xff] }
 0x203   : > { %4186 = vrcp.f32 %v2104_v49  ;;  %v2840_v57 = vsel %vm1581_vm4, %v2839_v2, %v2838_v38  ;;  %v2829_v50 = vrot.slane %v2497_v40, 2  ;;  %v2828_v63 = vsel %vm1583_vm5, %v2827_v26, %v2826_v47 }
 0x204   : > { %4188 = vrcp.f32 %v2103_v8  ;;  %v2842_v16 = vsel %vm1583_vm5, %v2841_v0, %v2840_v57  ;;  %v2845_v29 = vrot.slane %v2506_v4, 1  ;;  %v2831_v45 = vrot.slane %v2498_v10, 1 }
 0x205   : > { %v2844_v23 = vsel %vm1585_vm6, %v2843_v42, %v2842_v16  ;;  %v2830_v18 = vsel %vm1585_vm6, %v2829_v50, %v2828_v63 }
 0x206   : > { %v2846_v43 = vsel %vm1587_vm7, %v2845_v29, %v2844_v23  ;;  %v2832_v54 = vsel %vm1587_vm7, %v2831_v45, %v2830_v18  ;;  %v6343_v18 = vld [vmem:[#allocation96_spill] sm:$0xff] }
 0x20d   : > { %v4187_v59 = vpop.eup %4186 }
 0x20e   : > { %v4189_v17 = vpop.eup %4188  ;;  %v2904_v62 = vmul.f32 %v4187_v59, %v2846_v43 }
 0x20f   : > { %v2903_v9 = vmul.f32 %v4189_v17, %v2832_v54  ;;  %v6344_v17 = vld [vmem:[#allocation97_spill] sm:$0xff] }
 0x210   : > { %v5775_v7 = vadd.f32 %v2904_v62, %v5726_v27  ;;  %v6345_v62 = vld [vmem:[#allocation98_spill] sm:$0xff] }
 0x211   : > { %v5778_v14 = vadd.f32 %v2903_v9, %v5724_v48 }
 0x213   : > { %v3998_v56 = vpop.f32.mrb[14].mxu1  ;;  %v3966_v35 = vpop.f32.mrb[14].mxu0  ;;  %4025 = vmatprep.mubr.msk.f32.mxu0 %vm410_vm0, %v5778_v14  ;;  %4057 = vmatprep.mubr.msk.f32.mxu1 %vm410_vm0, %v5778_v14 }
 0x214   : > { %v2040_v1 = vadd.f32 %v5709_v6, %v3998_v56  ;;  %v2034_v37 = vpop.f32.mrb[15].mxu1  ;;  %v1868_v15 = vadd.f32 %v5721_v58, %v3966_v35  ;;  %v1862_v55 = vpop.f32.mrb[15].mxu0  ;;  %4026 = vmatmul.mubr.msk.f32.gmra.mrb[28].mxu0 %vm410_vm0, %v5775_v7  ;;  %4058 = vmatmul.mubr.msk.f32.gmra.mrb[28].mxu1 %vm410_vm0, %v5775_v7  ;;  %v6346_v56 = vld [vmem:[#allocation99_spill] sm:$0xff] }
 0x215   : > { %v2035_v48 = vadd.f32 %v5709_v6, %v2034_v37  ;;  %v1863_v27 = vadd.f32 %v5721_v58, %v1862_v55  ;;  %v6338_v6 = vld [vmem:[#allocation88_spill] sm:$0xff]  ;;  %v6339_v58 = vld [vmem:[#allocation89_spill] sm:$0xff] }
 0x216   : > { %v3789_v34 = vmul.f32 -1.442695, %v2040_v1  ;;  %v5794_v49 = vmax.f32 %v1868_v15, 0.0  ;;  %v6347_v37 = vld [vmem:[#allocation93_spill] sm:$0xff] }
 0x217   : > { %v3788_v30 = vmul.f32 -1.442695, %v2035_v48  ;;  %v5792_v19 = vmax.f32 %v1863_v27, 0.0 }
 0x218   : > { %4190 = vpow2.f32 %v3789_v34  ;;  %v2260_v41 = vrot.slane %v5794_v49, 1  ;;  %v2261_v0 = vrot.slane %v5794_v49, 2  ;;  %v2262_v47 = vrot.slane %v5794_v49, 3 }
 0x219   : > { %4192 = vpow2.f32 %v3788_v30  ;;  %v2253_v5 = vrot.slane %v5792_v19, 1  ;;  %v2254_v52 = vrot.slane %v5792_v19, 2  ;;  %v2255_v61 = vrot.slane %v5792_v19, 3 }
 0x21a   : > { %v2256_v8 = vrot.slane %v5792_v19, 4  ;;  %v2507_v44 = vsub.f32 %v6338_v6, %v5792_v19  ;;  %v2263_v33 = vrot.slane %v5794_v49, 4  ;;  %v2257_v4 = vrot.slane %v5792_v19, 5 }
 0x21b   : > { %v2508_v25 = vsub.f32 %v6339_v58, %v2253_v5  ;;  %v2509_v2 = vsub.f32 %v6340_v24, %v2254_v52  ;;  %v2510_v40 = vsub.f32 %v6341_v60, %v2255_v61  ;;  %v2258_v57 = vrot.slane %v5792_v19, 6  ;;  %v6348_v61 = vld [vmem:[#allocation100_spill] sm:$0xff]  ;;  %v6349_v58 = vld [vmem:[#allocation94_spill] sm:$0xff] }
 0x21c   : > { %v2511_v10 = vsub.f32 %v6342_v22, %v2256_v8  ;;  %v2264_v16 = vrot.slane %v5794_v49, 5  ;;  %v2265_v63 = vrot.slane %v5794_v49, 6  ;;  %v2515_v45 = vsub.f32 %v5209_v39, %v5794_v49 }
 0x21d   : > { %v2847_v26 = vrot.slane %v2508_v25, 7  ;;  %v2849_v38 = vrot.slane %v2509_v2, 6  ;;  %v2851_v50 = vrot.slane %v2510_v40, 5  ;;  %v2516_v23 = vsub.f32 %v5211_v31, %v2260_v41 }
 0x21e   : > { %v2517_v59 = vsub.f32 %v6343_v18, %v2261_v0  ;;  %v2259_v43 = vrot.slane %v5792_v19, 7  ;;  %v2518_v54 = vsub.f32 %v6344_v17, %v2262_v47  ;;  %v2519_v9 = vsub.f32 %v6345_v62, %v2263_v33  ;;  %v6350_v0 = vld [vmem:[#allocation101_spill] sm:$0xff]  ;;  %v6351_v47 = vld [vmem:[#allocation95_spill] sm:$0xff] }
 0x21f   : > { %v2848_v42 = vsel %vm1575_vm1, %v2847_v26, %v2507_v44  ;;  %v2520_v35 = vsub.f32 %v6346_v56, %v2264_v16  ;;  %v2512_v15 = vsub.f32 %v6347_v37, %v2257_v4  ;;  %v2853_v55 = vrot.slane %v2511_v10, 4 }
 0x220   : > { %v2850_v29 = vsel %vm1577_vm2, %v2849_v38, %v2848_v42  ;;  %v2266_v48 = vrot.slane %v5794_v49, 7  ;;  %v2861_v27 = vrot.slane %v2516_v23, 7  ;;  %v2863_v30 = vrot.slane %v2517_v59, 6 }
 0x221   : > { %v2852_v31 = vsel %vm1579_vm3, %v2851_v50, %v2850_v29  ;;  %v2865_v5 = vrot.slane %v2518_v54, 5  ;;  %v2521_v8 = vsub.f32 %v6348_v61, %v2265_v63  ;;  %v2867_v44 = vrot.slane %v2519_v9, 4 }
 0x222   : > { %v4191_v1 = vpop.eup %4190  ;;  %v2862_v6 = vsel %vm1575_vm1, %v2861_v27, %v2515_v45  ;;  %v2513_v25 = vsub.f32 %v6349_v58, %v2258_v57  ;;  %v2869_v2 = vrot.slane %v2520_v35, 3  ;;  %v2855_v60 = vrot.slane %v2512_v15, 3  ;;  %v5866_v27 = vld [vmem:[%s6057_s3 + $0x1] ss:$0 sm:$0xff] }
 0x223   : > { %v4193_v39 = vpop.eup %4192  ;;  %v2106_v34 = vadd.f32 1.0, %v4191_v1  ;;  %v2864_v24 = vsel %vm1577_vm2, %v2863_v30, %v2862_v6  ;;  %v2854_v41 = vsel %vm1581_vm4, %v2853_v55, %v2852_v31  ;;  %v2522_v26 = vsub.f32 %v6350_v0, %v2266_v48 }
 0x224   : > { %v2105_v52 = vadd.f32 1.0, %v4193_v39  ;;  %v2866_v40 = vsel %vm1579_vm3, %v2865_v5, %v2864_v24  ;;  %v2514_v33 = vsub.f32 %v6351_v47, %v2259_v43  ;;  %v2871_v4 = vrot.slane %v2521_v8, 2 }
 0x225   : > { %4194 = vrcp.f32 %v2106_v34  ;;  %v2868_v38 = vsel %vm1581_vm4, %v2867_v44, %v2866_v40  ;;  %v2857_v22 = vrot.slane %v2513_v25, 2  ;;  %v2856_v57 = vsel %vm1583_vm5, %v2855_v60, %v2854_v41 }
 0x226   : > { %4196 = vrcp.f32 %v2105_v52  ;;  %v2870_v10 = vsel %vm1583_vm5, %v2869_v2, %v2868_v38  ;;  %v2873_v42 = vrot.slane %v2522_v26, 1  ;;  %v2859_v50 = vrot.slane %v2514_v33, 1  ;;  %v5877_v38 = vld [vmem:[%s6059_s5] ss:$0 sm:$0xff] }
 0x227   : > { %v2872_v16 = vsel %vm1585_vm6, %v2871_v4, %v2870_v10  ;;  %v2858_v63 = vsel %vm1585_vm6, %v2857_v22, %v2856_v57  ;;  %vm3626_vm1 = vcmask 720512   ;;  %vm3633_vm2 = vcmask 786112  }
 0x228   : > { %v2874_v45 = vsel %vm1587_vm7, %v2873_v42, %v2872_v16  ;;  %v2860_v18 = vsel %vm1587_vm7, %v2859_v50, %v2858_v63  ;;  %vm3640_vm3 = vcmask 851712   ;;  %vm3647_vm4 = vcmask 917312  }
 0x229   : > { %vm3654_vm5 = vcmask 982912   ;;  %vm3661_vm6 = vcmask 1048512  }
 0x22f   : > { %v4195_v29 = vpop.eup %4194 }
 0x230   : > { %v4197_v23 = vpop.eup %4196  ;;  %v2906_v59 = vmul.f32 %v4195_v29, %v2874_v45 }
 0x231   : > { %v2905_v43 = vmul.f32 %v4197_v23, %v2860_v18 }
 0x232   : > { %v5843_v17 = vadd.f32 %v2906_v59, %v5794_v49  ;;  %v5859_v49 = vld [vmem:[%s6058_s4 + $0x1] ss:$0 sm:$0xff] }
 0x233   : > { %v5846_v54 = vadd.f32 %v2905_v43, %v5792_v19 }
 0x235   : > { %4028 = vmatprep.mubr.msk.f32.mxu0 %vm410_vm0, %v5846_v54  ;;  %4060 = vmatprep.mubr.msk.f32.mxu1 %vm410_vm0, %v5846_v54 }
 0x236   : > { %4029 = vmatmul.mubr.msk.f32.gmra.mrb[30].mxu0 %vm410_vm0, %v5843_v17  ;;  %4061 = vmatmul.mubr.msk.f32.gmra.mrb[30].mxu1 %vm410_vm0, %v5843_v17 }
 0x26c   : > { %v4009_v62 = vpop.f32.mrb[16].mxu0  ;;  %v4041_v19 = vpop.f32.mrb[16].mxu1 }
 0x26d   : > { %v3230_v9 = vadd.f32 %v4041_v19, %v5859_v49  ;;  %v3050_v56 = vpop.f32.mrb[17].mxu0  ;;  %v3224_v35 = vpop.f32.mrb[17].mxu1  ;;  %v3056_v8 = vadd.f32 %v4009_v62, %v5866_v27 }
 0x26e   : > { %v3225_v1 = vadd.f32 %v5859_v49, %v3224_v35  ;;  %v3051_v44 = vadd.f32 %v5866_v27, %v3050_v56 }
 0x26f   : > { %v3835_v37 = vmul.f32 -1.442695, %v3230_v9  ;;  %v3130_v24 = vmax.f32 %v3056_v8, 0.0 }
 0x270   : > { %v3834_v15 = vmul.f32 -1.442695, %v3225_v1  ;;  %v3129_v2 = vmax.f32 %v3051_v44, 0.0 }
 0x271   : > { %4198 = vpow2.f32 %v3835_v37  ;;  %v3400_v60 = vsub.f32 %v5397_v21, %v3130_v24 }
 0x272   : > { %4200 = vpow2.f32 %v3834_v15  ;;  %v3399_v41 = vsub.f32 %v5383_v32, %v3129_v2 }
 0x27b   : > { %v4199_v55 = vpop.eup %4198 }
 0x27c   : > { %v4201_v48 = vpop.eup %4200  ;;  %v3352_v39 = vadd.f32 1.0, %v4199_v55 }
 0x27d   : > { %v3351_v34 = vadd.f32 1.0, %v4201_v48  ;;  %v4012_v31 = vpop.f32.mrb[18].mxu0  ;;  %v4044_v30 = vpop.f32.mrb[18].mxu1 }
 0x27e   : > { %4202 = vrcp.f32 %v3352_v39  ;;  %v3240_v5 = vadd.f32 %v4044_v30, %v5859_v49  ;;  %v3060_v52 = vpop.f32.mrb[19].mxu0  ;;  %v3234_v61 = vpop.f32.mrb[19].mxu1  ;;  %v3066_v29 = vadd.f32 %v4012_v31, %v5866_v27 }
 0x27f   : > { %4204 = vrcp.f32 %v3351_v34  ;;  %v3235_v6 = vadd.f32 %v5859_v49, %v3234_v61  ;;  %v3061_v59 = vadd.f32 %v5866_v27, %v3060_v52 }
 0x280   : > { %v3837_v58 = vmul.f32 -1.442695, %v3240_v5  ;;  %v3132_v56 = vmax.f32 %v3066_v29, 0.0 }
 0x281   : > { %v3836_v25 = vmul.f32 -1.442695, %v3235_v6  ;;  %v3131_v35 = vmax.f32 %v3061_v59, 0.0 }
 0x282   : > { %4206 = vpow2.f32 %v3837_v58  ;;  %v3402_v1 = vsub.f32 %v5464_v53, %v3132_v56 }
 0x283   : > { %4208 = vpow2.f32 %v3836_v25  ;;  %v3401_v15 = vsub.f32 %v5434_v3, %v3131_v35 }
 0x288   : > { %v4203_v40 = vpop.eup %4202 }
 0x289   : > { %v4205_v0 = vpop.eup %4204  ;;  %v3416_v26 = vmul.f32 %v4203_v40, %v3400_v60 }
 0x28a   : > { %v3415_v47 = vmul.f32 %v4205_v0, %v3399_v41 }
 0x28b   : > { %v3432_v33 = vadd.f32 %v3416_v26, %v3130_v24 }
 0x28c   : > { %v4207_v4 = vpop.eup %4206  ;;  %v3431_v22 = vadd.f32 %v3415_v47, %v3129_v2 }
 0x28d   : > { %v4209_v10 = vpop.eup %4208  ;;  %v3354_v57 = vadd.f32 1.0, %v4207_v4  ;;  %v3455_v42 = vmul.f32 %v5877_v38, %v3432_v33 }
 0x28e   : > { %v3353_v50 = vadd.f32 1.0, %v4209_v10  ;;  %v3454_v63 = vmul.f32 %v5877_v38, %v3431_v22 }
 0x28f   : > { %4210 = vrcp.f32 %v3354_v57  ;;  %v4015_v21 = vpop.f32.mrb[20].mxu0  ;;  %v4047_v16 = vpop.f32.mrb[20].mxu1  ;;  %v3473_v32 = vsel %vm410_vm0, %v3455_v42, 0.0 }
 0x290   : > { %4212 = vrcp.f32 %v3353_v50  ;;  %v3250_v45 = vadd.f32 %v4047_v16, %v5859_v49  ;;  %v3070_v23 = vpop.f32.mrb[21].mxu0  ;;  %v3244_v18 = vpop.f32.mrb[21].mxu1  ;;  %3474 = vadd.xlane.f32.xlu0 %v3473_v32  ;;  %v3470_v9 = vsel %vm410_vm0, %v3454_v63, 0.0  ;;  %v3076_v2 = vadd.f32 %v4015_v21, %v5866_v27 }
 0x291   : > { %v3245_v43 = vadd.f32 %v5859_v49, %v3244_v18  ;;  %v3071_v40 = vadd.f32 %v5866_v27, %v3070_v23 }
 0x292   : > { %v3839_v62 = vmul.f32 -1.442695, %v3250_v45  ;;  %v3134_v47 = vmax.f32 %v3076_v2, 0.0 }
 0x293   : > { %v3838_v19 = vmul.f32 -1.442695, %v3245_v43  ;;  %v3133_v33 = vmax.f32 %v3071_v40, 0.0 }
 0x294   : > { %4214 = vpow2.f32 %v3839_v62  ;;  %3471 = vadd.xlane.f32.xlu0 %v3470_v9  ;;  %v3404_v4 = vsub.f32 %v5538_v12, %v3134_v47 }
 0x295   : > { %4216 = vpow2.f32 %v3838_v19  ;;  %v3403_v10 = vsub.f32 %v5502_v11, %v3133_v33 }
 0x299   : > { %v4211_v37 = vpop.eup %4210 }
 0x29a   : > { %v4213_v55 = vpop.eup %4212  ;;  %v3418_v48 = vmul.f32 %v4211_v37, %v3402_v1 }
 0x29b   : > { %v3417_v39 = vmul.f32 %v4213_v55, %v3401_v15 }
 0x29c   : > { %v3434_v34 = vadd.f32 %v3418_v48, %v3132_v56 }
 0x29d   : > { %v3433_v31 = vadd.f32 %v3417_v39, %v3131_v35 }
 0x29e   : > { %v4215_v30 = vpop.eup %4214  ;;  %v3457_v5 = vmul.f32 %v5877_v38, %v3434_v34 }
 0x29f   : > { %v4217_v52 = vpop.eup %4216  ;;  %v3356_v61 = vadd.f32 1.0, %v4215_v30  ;;  %v3456_v53 = vmul.f32 %v5877_v38, %v3433_v31 }
 0x2a0   : > { %v3355_v8 = vadd.f32 1.0, %v4217_v52  ;;  %v4018_v6 = vpop.f32.mrb[22].mxu0  ;;  %v4050_v44 = vpop.f32.mrb[22].mxu1  ;;  %v3479_v58 = vsel %vm410_vm0, %v3457_v5, 0.0 }
 0x2a1   : > { %4218 = vrcp.f32 %v3356_v61  ;;  %v3260_v3 = vadd.f32 %v4050_v44, %v5859_v49  ;;  %v3080_v25 = vpop.f32.mrb[23].mxu0  ;;  %v3254_v24 = vpop.f32.mrb[23].mxu1  ;;  %3480 = vadd.xlane.f32.xlu1 %v3479_v58  ;;  %v3476_v26 = vsel %vm410_vm0, %v3456_v53, 0.0  ;;  %v3086_v11 = vadd.f32 %v4018_v6, %v5866_v27 }
 0x2a2   : > { %4220 = vrcp.f32 %v3355_v8  ;;  %v3255_v60 = vadd.f32 %v5859_v49, %v3254_v24  ;;  %v3081_v35 = vadd.f32 %v5866_v27, %v3080_v25 }
 0x2a3   : > { %v3841_v41 = vmul.f32 -1.442695, %v3260_v3  ;;  %v3136_v55 = vmax.f32 %v3086_v11, 0.0 }
 0x2a4   : > { %v3840_v0 = vmul.f32 -1.442695, %v3255_v60  ;;  %v3135_v48 = vmax.f32 %v3081_v35, 0.0 }
 0x2a5   : > { %4222 = vpow2.f32 %v3841_v41  ;;  %3477 = vadd.xlane.f32.xlu1 %v3476_v26  ;;  %v3406_v39 = vsub.f32 %v5608_v36, %v3136_v55 }
 0x2a6   : > { %4224 = vpow2.f32 %v3840_v0  ;;  %v3405_v31 = vsub.f32 %v5568_v46, %v3135_v48 }
 0x2ab   : > { %v4219_v22 = vpop.eup %4218 }
 0x2ac   : > { %v4221_v57 = vpop.eup %4220  ;;  %v3420_v42 = vmul.f32 %v4219_v22, %v3404_v4 }
 0x2ad   : > { %v3419_v50 = vmul.f32 %v4221_v57, %v3403_v10 }
 0x2ae   : > { %v3436_v21 = vadd.f32 %v3420_v42, %v3134_v47 }
 0x2af   : > { %v4223_v16 = vpop.eup %4222  ;;  %v3435_v32 = vadd.f32 %v3419_v50, %v3133_v33 }
 0x2b0   : > { %v4225_v63 = vpop.eup %4224  ;;  %v3358_v29 = vadd.f32 1.0, %v4223_v16  ;;  %v3459_v45 = vmul.f32 %v5877_v38, %v3436_v21 }
 0x2b1   : > { %v3357_v23 = vadd.f32 1.0, %v4225_v63  ;;  %v3458_v18 = vmul.f32 %v5877_v38, %v3435_v32 }
 0x2b2   : > { %4226 = vrcp.f32 %v3358_v29  ;;  %v4021_v59 = vpop.f32.mrb[24].mxu0  ;;  %v4053_v43 = vpop.f32.mrb[24].mxu1  ;;  %v3485_v12 = vsel %vm410_vm0, %v3459_v45, 0.0 }
 0x2b3   : > { %4228 = vrcp.f32 %v3357_v23  ;;  %v3270_v62 = vadd.f32 %v4053_v43, %v5859_v49  ;;  %v3090_v19 = vpop.f32.mrb[25].mxu0  ;;  %v3264_v9 = vpop.f32.mrb[25].mxu1  ;;  %v3482_v56 = vsel %vm410_vm0, %v3458_v18, 0.0  ;;  %3486 = vadd.xlane.f32.xlu1 %v3485_v12  ;;  %v3096_v26 = vadd.f32 %v4021_v59, %v5866_v27 }
 0x2b4   : > { %v3265_v1 = vadd.f32 %v5859_v49, %v3264_v9  ;;  %3483 = vadd.xlane.f32.xlu0 %v3482_v56  ;;  %v3091_v33 = vadd.f32 %v5866_v27, %v3090_v19 }
 0x2b5   : > { %v3843_v37 = vmul.f32 -1.442695, %v3270_v62  ;;  %v3138_v22 = vmax.f32 %v3096_v26, 0.0 }
 0x2b6   : > { %v3842_v15 = vmul.f32 -1.442695, %v3265_v1  ;;  %v3137_v10 = vmax.f32 %v3091_v33, 0.0 }
 0x2b7   : > { %4230 = vpow2.f32 %v3843_v37  ;;  %v3408_v57 = vsub.f32 %v5671_v13, %v3138_v22 }
 0x2b8   : > { %4232 = vpow2.f32 %v3842_v15  ;;  %v3407_v50 = vsub.f32 %v5637_v20, %v3137_v10 }
 0x2bc   : > { %v4227_v34 = vpop.eup %4226 }
 0x2bd   : > { %v4229_v30 = vpop.eup %4228  ;;  %v3422_v5 = vmul.f32 %v4227_v34, %v3406_v39 }
 0x2be   : > { %v3421_v52 = vmul.f32 %v4229_v30, %v3405_v31 }
 0x2bf   : > { %v3438_v61 = vadd.f32 %v3422_v5, %v3136_v55 }
 0x2c0   : > { %v3437_v8 = vadd.f32 %v3421_v52, %v3135_v48 }
 0x2c1   : > { %v4231_v6 = vpop.eup %4230  ;;  %v3461_v44 = vmul.f32 %v5877_v38, %v3438_v61 }
 0x2c2   : > { %v4233_v58 = vpop.eup %4232  ;;  %v3360_v53 = vadd.f32 1.0, %v4231_v6  ;;  %v4024_v3 = vpop.f32.mrb[26].mxu0  ;;  %v3460_v24 = vmul.f32 %v5877_v38, %v3437_v8 }
 0x2c3   : > { %v4056_v25 = vpop.f32.mrb[26].mxu1  ;;  %v3359_v2 = vadd.f32 1.0, %v4233_v58  ;;  %v3100_v60 = vpop.f32.mrb[27].mxu0  ;;  %v3491_v46 = vsel %vm410_vm0, %v3461_v44, 0.0  ;;  %v3106_v11 = vadd.f32 %v4024_v3, %v5866_v27 }
 0x2c4   : > { %v3280_v36 = vadd.f32 %v4056_v25, %v5859_v49  ;;  %v3274_v40 = vpop.f32.mrb[27].mxu1  ;;  %4234 = vrcp.f32 %v3360_v53  ;;  %v3488_v0 = vsel %vm410_vm0, %v3460_v24, 0.0  ;;  %3492 = vadd.xlane.f32.xlu1 %v3491_v46  ;;  %v3101_v20 = vadd.f32 %v5866_v27, %v3100_v60 }
 0x2c5   : > { %v3275_v41 = vadd.f32 %v5859_v49, %v3274_v40  ;;  %4236 = vrcp.f32 %v3359_v2  ;;  %3489 = vadd.xlane.f32.xlu0 %v3488_v0  ;;  %v3140_v19 = vmax.f32 %v3106_v11, 0.0 }
 0x2c6   : > { %v3845_v47 = vmul.f32 -1.442695, %v3280_v36  ;;  %v3139_v9 = vmax.f32 %v3101_v20, 0.0 }
 0x2c7   : > { %v3844_v4 = vmul.f32 -1.442695, %v3275_v41  ;;  %v3410_v56 = vsub.f32 %v5704_v28, %v3140_v19 }
 0x2c8   : > { %4238 = vpow2.f32 %v3845_v47  ;;  %v3409_v1 = vsub.f32 %v5696_v51, %v3139_v9 }
 0x2c9   : > { %4240 = vpow2.f32 %v3844_v4 }
 0x2ce   : > { %v4235_v42 = vpop.eup %4234 }
 0x2cf   : > { %v4237_v21 = vpop.eup %4236  ;;  %v3424_v16 = vmul.f32 %v4235_v42, %v3408_v57 }
 0x2d0   : > { %v3423_v32 = vmul.f32 %v4237_v21, %v3407_v50 }
 0x2d1   : > { %v3440_v29 = vadd.f32 %v3424_v16, %v3138_v22 }
 0x2d2   : > { %v4239_v63 = vpop.eup %4238  ;;  %v3439_v18 = vadd.f32 %v3423_v32, %v3137_v10 }
 0x2d3   : > { %v4241_v45 = vpop.eup %4240  ;;  %v3362_v23 = vadd.f32 1.0, %v4239_v63  ;;  %v3463_v43 = vmul.f32 %v5877_v38, %v3440_v29 }
 0x2d4   : > { %v3361_v59 = vadd.f32 1.0, %v4241_v45  ;;  %v3462_v12 = vmul.f32 %v5877_v38, %v3439_v18 }
 0x2d5   : > { %4242 = vrcp.f32 %v3362_v23  ;;  %v3497_v13 = vsel %vm410_vm0, %v3463_v43, 0.0 }
 0x2d6   : > { %4244 = vrcp.f32 %v3361_v59  ;;  %v3494_v62 = vsel %vm410_vm0, %v3462_v12, 0.0  ;;  %3498 = vadd.xlane.f32.xlu1 %v3497_v13 }
 0x2d7   : > { %3495 = vadd.xlane.f32.xlu0 %v3494_v62 }
 0x2df   : > { %v4243_v35 = vpop.eup %4242 }
 0x2e0   : > { %v4245_v37 = vpop.eup %4244  ;;  %v3426_v15 = vmul.f32 %v4243_v35, %v3410_v56 }
 0x2e1   : > { %v3425_v55 = vmul.f32 %v4245_v37, %v3409_v1 }
 0x2e2   : > { %v3442_v48 = vadd.f32 %v3426_v15, %v3140_v19 }
 0x2e3   : > { %v3441_v39 = vadd.f32 %v3425_v55, %v3139_v9 }
 0x2e4   : > { %v3465_v34 = vmul.f32 %v5877_v38, %v3442_v48 }
 0x2e5   : > { %v3464_v5 = vmul.f32 %v5877_v38, %v3441_v39 }
 0x2e6   : > { %v3503_v28 = vsel %vm410_vm0, %v3465_v34, 0.0  ;;  %v3552_v34 = vlaneseq }
 0x2e7   : > { %v4027_v31 = vpop.f32.mrb[28].mxu0  ;;  %v4059_v30 = vpop.f32.mrb[28].mxu1  ;;  %v3500_v51 = vsel %vm410_vm0, %v3464_v5, 0.0  ;;  %3504 = vadd.xlane.f32.xlu1 %v3503_v28 }
 0x2e8   : > { %v3290_v52 = vadd.f32 %v4059_v30, %v5859_v49  ;;  %v3110_v61 = vpop.f32.mrb[29].mxu0  ;;  %v3284_v8 = vpop.f32.mrb[29].mxu1  ;;  %3501 = vadd.xlane.f32.xlu0 %v3500_v51  ;;  %v3116_v2 = vadd.f32 %v4027_v31, %v5866_v27  ;;  %v5951_v30 = vand.u32 127, %v3552_v34 }
 0x2e9   : > { %v3285_v6 = vadd.f32 %v5859_v49, %v3284_v8  ;;  %v3111_v36 = vadd.f32 %v5866_v27, %v3110_v61  ;;  %v5957_v8 = vstv %s3518_s21 }
 0x2ea   : > { %v3847_v44 = vmul.f32 -1.442695, %v3290_v52  ;;  %v3142_v60 = vmax.f32 %v3116_v2, 0.0  ;;  %v3565_v5 = vadd.s32 4294967280, %v5951_v30  ;;  %v5954_v52 = vshrl.u32 %v3552_v34, 7 }
 0x2eb   : > { %v3846_v58 = vmul.f32 -1.442695, %v3285_v6  ;;  %v3141_v40 = vmax.f32 %v3111_v36, 0.0 }
 0x2ec   : > { %4246 = vpow2.f32 %v3847_v44  ;;  %v3412_v46 = vsub.f32 %v5775_v7, %v3142_v60  ;;  %v3556_v6 = vsub.s32 %v5951_v30, %v5954_v52  ;;  %v3572_v44 = vadd.s32 4294967272, %v5951_v30 }
 0x2ed   : > { %4248 = vpow2.f32 %v3846_v58  ;;  %v3411_v0 = vsub.f32 %v5778_v14, %v3141_v40  ;;  %v3568_v58 = vsub.s32 %v3565_v5, %v5954_v52 }
 0x2f6   : > { %v4247_v53 = vpop.eup %4246 }
 0x2f7   : > { %v4249_v3 = vpop.eup %4248  ;;  %v3364_v25 = vadd.f32 1.0, %v4247_v53 }
 0x2f8   : > { %v3363_v24 = vadd.f32 1.0, %v4249_v3 }
 0x2f9   : > { %4250 = vrcp.f32 %v3364_v25 }
 0x2fa   : > { %4252 = vrcp.f32 %v3363_v24  ;;  %v3579_v24 = vadd.s32 4294967264, %v5951_v30 }
 0x303   : > { %v4251_v41 = vpop.eup %4250 }
 0x304   : > { %v4253_v26 = vpop.eup %4252  ;;  %v3428_v47 = vmul.f32 %v4251_v41, %v3412_v46 }
 0x305   : > { %v3427_v33 = vmul.f32 %v4253_v26, %v3411_v0  ;;  %v3586_v26 = vadd.s32 4294967256, %v5951_v30 }
 0x306   : > { %v3444_v4 = vadd.f32 %v3428_v47, %v3142_v60  ;;  %v3575_v60 = vsub.s32 %v3572_v44, %v5954_v52  ;;  %v3582_v47 = vsub.s32 %v3579_v24, %v5954_v52  ;;  %v3656_v24 = vadd.s32 4294967176, %v5951_v30 }
 0x307   : > { %v3443_v22 = vadd.f32 %v3427_v33, %v3141_v40 }
 0x308   : > { %v3467_v10 = vmul.f32 %v5877_v38, %v3444_v4 }
 0x309   : > { %v4030_v57 = vpop.f32.mrb[30].mxu0  ;;  %v4062_v42 = vpop.f32.mrb[30].mxu1  ;;  %v3466_v50 = vmul.f32 %v5877_v38, %v3443_v22 }
 0x30a   : > { %v3300_v21 = vadd.f32 %v4062_v42, %v5859_v49  ;;  %v3120_v16 = vpop.f32.mrb[31].mxu0  ;;  %v3294_v32 = vpop.f32.mrb[31].mxu1  ;;  %v3509_v7 = vsel %vm410_vm0, %v3467_v10, 0.0  ;;  %v3126_v12 = vadd.f32 %v4030_v57, %v5866_v27  ;;  %v3593_v10 = vadd.s32 4294967248, %v5951_v30 }
 0x30b   : > { %v3295_v63 = vadd.f32 %v5859_v49, %v3294_v32  ;;  %v3506_v14 = vsel %vm410_vm0, %v3466_v50, 0.0  ;;  %3510 = vadd.xlane.f32.xlu1 %v3509_v7  ;;  %v3121_v11 = vadd.f32 %v5866_v27, %v3120_v16  ;;  %v3589_v42 = vsub.s32 %v3586_v26, %v5954_v52 }
 0x30c   : > { %v3849_v29 = vmul.f32 -1.442695, %v3300_v21  ;;  %3507 = vadd.xlane.f32.xlu0 %v3506_v14  ;;  %v3144_v13 = vmax.f32 %v3126_v12, 0.0  ;;  %v3600_v21 = vadd.s32 4294967240, %v5951_v30  ;;  %v3596_v14 = vsub.s32 %v3593_v10, %v5954_v52 }
 0x30d   : > { %v3848_v45 = vmul.f32 -1.442695, %v3295_v63  ;;  %v3143_v49 = vmax.f32 %v3121_v11, 0.0  ;;  %v3621_v11 = vadd.s32 4294967216, %v5951_v30 }
 0x30e   : > { %4254 = vpow2.f32 %v3849_v29  ;;  %v3414_v20 = vsub.f32 %v5843_v17, %v3144_v13 }
 0x30f   : > { %4256 = vpow2.f32 %v3848_v45  ;;  %v3413_v19 = vsub.f32 %v5846_v54, %v3143_v49  ;;  %v3607_v45 = vadd.s32 4294967232, %v5951_v30 }
 0x318   : > { %v4255_v23 = vpop.eup %4254 }
 0x319   : > { %v4257_v18 = vpop.eup %4256  ;;  %v3366_v59 = vadd.f32 1.0, %v4255_v23  ;;  %v3614_v23 = vadd.s32 4294967224, %v5951_v30 }
 0x31a   : > { %v3365_v43 = vadd.f32 1.0, %v4257_v18 }
 0x31b   : > { %4258 = vrcp.f32 %v3366_v59  ;;  %v3603_v59 = vsub.s32 %v3600_v21, %v5954_v52 }
 0x31c   : > { %4260 = vrcp.f32 %v3365_v43 }
 0x31d   : > { %v3475_v39 = vpop.xlane.xlu0 %3474 }
 0x31e   : > { %v3521_v25 = vadd.f32 %v5957_v8, %v3475_v39 }
 0x321   : > { %v3472_v54 = vpop.xlane.xlu0 %3471 }
 0x322   : > { %v3520_v51 = vadd.f32 %v5957_v8, %v3472_v54 }
 0x324   : > { %v3557_v2 = vrot.slane %v3520_v51, %v3556_v6 }
 0x325   : > { %v4259_v62 = vpop.eup %4258 }
 0x326   : > { %v4261_v9 = vpop.eup %4260  ;;  %v3430_v56 = vmul.f32 %v4259_v62, %v3414_v20  ;;  %v3610_v20 = vsub.s32 %v3607_v45, %v5954_v52 }
 0x327   : > { %v3429_v35 = vmul.f32 %v4261_v9, %v3413_v19  ;;  %v3617_v19 = vsub.s32 %v3614_v23, %v5954_v52 }
 0x328   : > { %v3446_v1 = vadd.f32 %v3430_v56, %v3144_v13 }
 0x329   : > { %v3445_v37 = vadd.f32 %v3429_v35, %v3143_v49 }
 0x32a   : > { %v3469_v15 = vmul.f32 %v5877_v38, %v3446_v1 }
 0x32b   : > { %v3468_v55 = vmul.f32 %v5877_v38, %v3445_v37  ;;  %v3558_v38 = vadd.s32 4294967288, %v5951_v30  ;;  %v3628_v37 = vadd.s32 4294967208, %v5951_v30 }
 0x32c   : > { %v3515_v48 = vsel %vm410_vm0, %v3469_v15, 0.0  ;;  %v3624_v15 = vsub.s32 %v3621_v11, %v5954_v52 }
 0x32d   : > { %v3512_v27 = vsel %vm410_vm0, %v3468_v55, 0.0  ;;  %3516 = vadd.xlane.f32.xlu1 %v3515_v48  ;;  %v3561_v3 = vsub.s32 %v3558_v38, %v5954_v52  ;;  %v3635_v55 = vadd.s32 4294967200, %v5951_v30  ;;  %vm3619_vm0 = vcmask 654912  }
 0x32e   : > { %3513 = vadd.xlane.f32.xlu0 %v3512_v27  ;;  %v3481_v17 = vpop.xlane.xlu1 %3480 }
 0x32f   : > { %v3562_v41 = vrot.slane %v3521_v25, %v3561_v3  ;;  %v3523_v0 = vadd.f32 %v5957_v8, %v3481_v17  ;;  %v3642_v17 = vadd.s32 4294967192, %v5951_v30 }
 0x331   : > { %v3564_v4 = vsel %vm3563_vm8, %v3562_v41, %v3557_v2  ;;  %v3576_v57 = vrot.slane %v3523_v0, %v3575_v60  ;;  %v3649_v2 = vadd.s32 4294967184, %v5951_v30  ;;  %v3659_v41 = vsub.s32 %v3656_v24, %v5954_v52 }
 0x332   : > { %v3478_v31 = vpop.xlane.xlu1 %3477 }
 0x333   : > { %v3522_v53 = vadd.f32 %v5957_v8, %v3478_v31  ;;  %v3631_v31 = vsub.s32 %v3628_v37, %v5954_v52  ;;  %v3652_v0 = vsub.s32 %v3649_v2, %v5954_v52 }
 0x335   : > { %v3569_v40 = vrot.slane %v3522_v53, %v3568_v58  ;;  %v3645_v58 = vsub.s32 %v3642_v17, %v5954_v52 }
 0x337   : > { %v3571_v22 = vsel %vm3570_vm9, %v3569_v40, %v3564_v4 }
 0x338   : > { %v3578_v63 = vsel %vm3577_vm10, %v3576_v57, %v3571_v22 }
 0x340   : > { %v3487_v28 = vpop.xlane.xlu1 %3486 }
 0x341   : > { %v3484_v61 = vpop.xlane.xlu0 %3483  ;;  %v3525_v50 = vadd.f32 %v5957_v8, %v3487_v28  ;;  %v3638_v28 = vsub.s32 %v3635_v55, %v5954_v52 }
 0x342   : > { %v3524_v33 = vadd.f32 %v5957_v8, %v3484_v61 }
 0x343   : > { %v3590_v18 = vrot.slane %v3525_v50, %v3589_v42 }
 0x344   : > { %v3583_v32 = vrot.slane %v3524_v33, %v3582_v47 }
 0x346   : > { %v3585_v12 = vsel %vm3584_vm11, %v3583_v32, %v3578_v63 }
 0x347   : > { %v3592_v56 = vsel %vm3591_vm12, %v3590_v18, %v3585_v12 }
 0x351   : > { %v3493_v46 = vpop.xlane.xlu1 %3492 }
 0x352   : > { %v3490_v36 = vpop.xlane.xlu0 %3489  ;;  %v3527_v43 = vadd.f32 %v5957_v8, %v3493_v46 }
 0x353   : > { %v3526_v29 = vadd.f32 %v5957_v8, %v3490_v36 }
 0x354   : > { %v3604_v35 = vrot.slane %v3527_v43, %v3603_v59 }
 0x355   : > { %v3597_v49 = vrot.slane %v3526_v29, %v3596_v14 }
 0x357   : > { %v3599_v48 = vsel %vm3598_vm13, %v3597_v49, %v3592_v56 }
 0x358   : > { %v3606_v34 = vsel %vm3605_vm14, %v3604_v35, %v3599_v48 }
 0x363   : > { %v3499_v7 = vpop.xlane.xlu1 %3498 }
 0x364   : > { %v3496_v16 = vpop.xlane.xlu0 %3495  ;;  %v3529_v1 = vadd.f32 %v5957_v8, %v3499_v7 }
 0x365   : > { %v3528_v62 = vadd.f32 %v5957_v8, %v3496_v16 }
 0x366   : > { %v3618_v54 = vrot.slane %v3529_v1, %v3617_v19 }
 0x367   : > { %v3611_v27 = vrot.slane %v3528_v62, %v3610_v20 }
 0x369   : > { %v3613_v6 = vsel %vm3612_vm15, %v3611_v27, %v3606_v34 }
 0x36a   : > { %v3620_v53 = vsel %vm3619_vm0, %v3618_v54, %v3613_v6 }
 0x374   : > { %v3505_v9 = vpop.xlane.xlu1 %3504 }
 0x375   : > { %v3502_v13 = vpop.xlane.xlu0 %3501  ;;  %v3531_v5 = vadd.f32 %v5957_v8, %v3505_v9 }
 0x376   : > { %v3530_v39 = vadd.f32 %v5957_v8, %v3502_v13 }
 0x377   : > { %v3632_v3 = vrot.slane %v3531_v5, %v3631_v31 }
 0x378   : > { %v3625_v51 = vrot.slane %v3530_v39, %v3624_v15 }
 0x37a   : > { %v3627_v36 = vsel %vm3626_vm1, %v3625_v51, %v3620_v53 }
 0x37b   : > { %v3634_v40 = vsel %vm3633_vm2, %v3632_v3, %v3627_v36 }
 0x398   : > { %v3511_v61 = vpop.xlane.xlu1 %3510 }
 0x399   : > { %v3508_v38 = vpop.xlane.xlu0 %3507  ;;  %v3533_v25 = vadd.f32 %v5957_v8, %v3511_v61 }
 0x39a   : > { %v3532_v44 = vadd.f32 %v5957_v8, %v3508_v38 }
 0x39b   : > { %v3646_v46 = vrot.slane %v3533_v25, %v3645_v58 }
 0x39c   : > { %v3639_v60 = vrot.slane %v3532_v44, %v3638_v28 }
 0x39e   : > { %v3641_v4 = vsel %vm3640_vm3, %v3639_v60, %v3634_v40 }
 0x39f   : > { %v3648_v30 = vsel %vm3647_vm4, %v3646_v46, %v3641_v4 }
 0x3ba   : > { %v3517_v26 = vpop.xlane.xlu1 %3516 }
 0x3bb   : > { %v3514_v47 = vpop.xlane.xlu0 %3513  ;;  %v3535_v33 = vadd.f32 %v5957_v8, %v3517_v26 }
 0x3bc   : > { %v3534_v22 = vadd.f32 %v5957_v8, %v3514_v47 }
 0x3bd   : > { %v3660_v10 = vrot.slane %v3535_v33, %v3659_v41 }
 0x3be   : > { %v3653_v57 = vrot.slane %v3534_v22, %v3652_v0 }
 0x3c0   : > { %v3655_v42 = vsel %vm3654_vm5, %v3653_v57, %v3648_v30 }
 0x3c1   : > { %v3662_v52 = vsel %vm3661_vm6, %v3660_v10, %v3655_v42 }
 0x3c2   : > { %3664 = vst [vmem:[%s274_s23] sm:$0x1] %v3662_v52 }
 0x3c3   : > { %4277 = shalt.err (!%p4274_p3)
}
 0x3c4   : > { %s4278_s20 = scalar_lea.hbm %s6012_s6, 16  ;;  %s4282_s19 = scalar_lea.hbm %s6061_s7, 64 }
 0x3c5   : > { %p4279_p4 = scmp.ne.s32.totalorder %s6012_s6, %s4278_s20  ;;  %p4283_p9 = scmp.lt.u32.totalorder %s6012_s6, %s6061_s7 }
 0x3c6   : > { %p4284_p10 = scmp.lt.u32.totalorder %s4282_s19, %s4278_s20  ;;  %p4286_p12 = scmp.lt.u32.totalorder %s4278_s20, %s6012_s6 }
 0x3c7   : > { %p4280_p7 = pnand %p4279_p4, %p4407_p5 }
 0x3c8   : > { %p4285_p11 = por %p4284_p10, %p4283_p9 }
 0x3c9   : > { %p4281_p8 = pneg %p4280_p7 }
 0x3ca   : > { %p4287_p13 = por %p4286_p12, %p4285_p11 }
 0x3cc   : > { %p4288_p0 = pnand %p4287_p13, %p4281_p8 }
 0x3ce   : > { %4291 = shalt.err (!%p4288_p0)
}
 0x3cf   : > { %4095 = dma.vmem_to_hbm [thread:$0]  (%p4407_p5), %s6014_s24, 16, %s6012_s6, %s3666_s9  }
 0x3d0 PF: > { %p4101_p1 = scmp.ge.s32.totalorder %s4326_s29, 2  ;;  %s3690_s23 = sand.u32 1, %s4314_s26  }
 0x3d1   : > { %s3691_s25 = scalar_lea.sflag [#allocation4], %s3690_s23 }
 0x3d2   : > { %p4098_p2 = pnand %p4101_p1, %p4411_p6 }
 0x3d4   : > { %4309 = dma.done.wait (!%p4098_p2), %s3691_s25, 16  }
 0x3d5   : > { %4311 = vsyncadd (!%p4098_p2), %s3691_s25, 4294967280  ;;  %p18_p3 = scmp.ge.s32.totalorder %s4395_s8, 6   ;;  %s6352_s26 = smov %s4318_s27 }
 0x3d6   : > { %s6353_s27 = smov %s4322_s28  ;;  %s6354_s28 = smov %s4405_s11 }
 0x3d7   : > { %s6355_s29 = smov %s4395_s8  ;;  %20 = sbr.rel (!%p18_p3) target bundleno = 5 (0x5), region = 87 }
 0x3de   :  { %3695 = vsyncpa [#allocation4], 1 }
 0x3df   :  { %3697 = vsyncpa [#allocation4 + $0x1], 1 }

</bundles_post_ra>
